<compile_context>
chip_gen: v6e
topology: v6e:2x2x1
jax: 0.10.0
libtpu: 0.0.40
codegen_flags: <defaults>
</compile_context>

<pallas_src>
import functools

import jax
import jax.numpy as jnp
from jax import lax
from jax.experimental import pallas as pl
from jax.experimental.pallas import tpu as pltpu


# ---------------------------------------------------------------------------
# Kernel: grid = (row_tiles, col_tiles); column axis is an online reduction.
# ---------------------------------------------------------------------------
def _supcon_kernel(f_t_ref, s_t_ref, z_t_ref, zm_t_ref,
                   fT_ref, sT_ref, zT_ref, zmT_ref,
                   rpc_ref, rpec_ref, rpr_ref, rper_ref, nb_ref,
                   out_ref,
                   valid_sc, wrow_sc, swa_sc, mz_sc, sz_sc, mzm_sc, szm_sc,
                   *, split, temperature, base_temperature, lmbd, reweighting):
    R = f_t_ref.shape[0]
    C = fT_ref.shape[1]
    n_groups = R // split
    i = pl.program_id(0)
    j = pl.program_id(1)
    nj = pl.num_programs(1)
    tb = temperature / base_temperature
    inv_t = 1.0 / temperature

    @pl.when(j == 0)
    def _init():
        valid_sc[...] = jnp.zeros_like(valid_sc)
        wrow_sc[...] = jnp.zeros_like(wrow_sc)
        swa_sc[...] = jnp.zeros_like(swa_sc)
        sz_sc[...] = jnp.zeros_like(sz_sc)
        szm_sc[...] = jnp.zeros_like(szm_sc)
        mz_sc[...] = jnp.full_like(mz_sc, -jnp.inf)
        mzm_sc[...] = jnp.full_like(mzm_sc, -jnp.inf)

    def mm(a, bT):
        # [R, D] (bf16) @ [D, C] (bf16, pre-transposed) -> [R, C] f32 on the MXU.
        return lax.dot_general(a, bT, (((1,), (0,)), ((), ())),
                               preferred_element_type=jnp.float32)

    cos = mm(f_t_ref[...], fT_ref[...])                       # [R, C]
    cos_e = mm(s_t_ref[...], sT_ref[...])
    # 1/temperature folded into the small [R, D] LHS instead of the [R, C] result.
    adc_z = mm(z_t_ref[...] * inv_t, zT_ref[...])
    adc_zm = mm(zm_t_ref[...] * inv_t, zmT_ref[...])

    rp_col, rpe_col = rpc_ref[...], rpec_ref[...]             # [R, 1] f32 (hoisted Rpoint)
    rp_row, rpe_row = rpr_ref[...], rper_ref[...]             # [1, C] f32

    # Self-exclusion mask for this (row tile, col tile) block (boolean, no f32 cast).
    rows = lax.broadcasted_iota(jnp.int32, (R, C), 0) + i * R
    cols = lax.broadcasted_iota(jnp.int32, (R, C), 1) + j * C
    not_self = rows != cols

    mask_one = jnp.logical_or(rp_col < cos, rp_row < cos)
    mask_ema = jnp.logical_or(rpe_col < cos_e, rpe_row < cos_e)
    # neglect mask uses mask_one BEFORE the self column is removed (matches torch ordering)
    nnm = jnp.logical_and(jnp.logical_or(mask_one, nb_ref[...] > 0.0), not_self)

    # Row-validity: any positive in (mask_one & not_self) across the whole row.
    valid_blk = jnp.max(jnp.where(jnp.logical_and(mask_one, not_self), 1.0, 0.0),
                        axis=1, keepdims=True)
    valid_sc[...] = jnp.maximum(valid_sc[...], valid_blk)

    # Weighted mask and its running row reductions.
    wm = jnp.where(not_self,
                   jnp.where(mask_one, 1.0, 0.0) + jnp.where(mask_ema, lmbd, 0.0),
                   0.0)
    wrow_sc[...] += jnp.sum(wm, axis=1, keepdims=True)
    swa_sc[...] += jnp.sum(wm * (adc_z + adc_zm), axis=1, keepdims=True)

    # Online masked-softmax denominators for the z and z_mix paths.
    def online_denom(adc, m_sc, s_sc):
        m_new = jnp.maximum(m_sc[...], jnp.max(adc, axis=1, keepdims=True))
        e = jnp.where(nnm, jnp.exp(adc - m_new), 0.0)
        s_sc[...] = s_sc[...] * jnp.exp(m_sc[...] - m_new) + jnp.sum(e, axis=1, keepdims=True)
        m_sc[...] = m_new

    online_denom(adc_z, mz_sc, sz_sc)
    online_denom(adc_zm, mzm_sc, szm_sc)

    # --- finalize this row tile after the last column block -------------------
    @pl.when(j == nj - 1)
    def _finalize():
        valid = valid_sc[...]                                  # [R, 1]
        wrow = wrow_sc[...]
        # sum(wm * logp) = sum(wm * adc) - wrow * (rowmax + log denom); guard log(0) on
        # rows that are dropped as invalid anyway.
        log_den = (jnp.log(jnp.where(sz_sc[...] > 0.0, sz_sc[...], 1.0))
                   + jnp.log(jnp.where(szm_sc[...] > 0.0, szm_sc[...], 1.0)))
        num = (swa_sc[...] - wrow * (mz_sc[...] + mzm_sc[...] + log_den)) * valid
        wrow_v = wrow * valid

        acc = jnp.float32(0.0)
        if reweighting == 1:
            # per mini-iteration:  sum_r num_r / sum_r wrow_r  (n_valid cancels analytically)
            for g in range(n_groups):
                sl = slice(g * split, (g + 1) * split)
                w_g = jnp.sum(wrow_v[sl])
                n_g = jnp.sum(num[sl])
                acc = acc + jnp.where(w_g > 0.0, n_g / jnp.where(w_g > 0.0, w_g, 1.0), 0.0)
        else:
            mlpp = num / jnp.where(wrow_v > 0.0, wrow_v, 1.0)  # 0 on invalid rows
            for g in range(n_groups):
                sl = slice(g * split, (g + 1) * split)
                nv_g = jnp.sum(valid[sl])
                m_g = jnp.sum(mlpp[sl])
                acc = acc + jnp.where(nv_g > 0.0, m_g / jnp.where(nv_g > 0.0, nv_g, 1.0), 0.0)

        # lane-aligned per-row-tile partial loss block (row axis stays "parallel")
        out_ref[...] = jnp.full(out_ref.shape, -tb * acc, out_ref.dtype)


# ---------------------------------------------------------------------------
# Tile choosers / VMEM cap
# ---------------------------------------------------------------------------
def _choose_rows(split, mini_iters, target_rows):
    """Rows per row tile: whole mini-iterations, sublane aligned, prefer even tile count."""
    B = split * mini_iters
    target = min(max(int(target_rows), split), B)
    cands = []
    for k in range(1, mini_iters + 1):
        if mini_iters % k == 0:
            cands.append(k * split)
    for align in (16, 8):                       # bf16-friendly first, then f32 minimum
        aligned = [r for r in cands if r % align == 0]
        if not aligned:
            continue
        even = [r for r in aligned if r >= target and (B // r) % 2 == 0]
        if even:
            return min(even)
        ge = [r for r in aligned if r >= target]
        if ge:
            return min(ge)
        return max(aligned)
    return B


def _choose_cols(B, target_cols):
    """Columns per col block: lane-aligned divisor of B (full width if B % 128 != 0)."""
    target = max(128, min(int(target_cols), B))
    best = None
    for c in range(128, B + 1, 128):
        if B % c == 0 and c <= target:
            best = c
    return best if best is not None else B


def _vmem_cap_bytes():
    try:
        phys = int(pltpu.get_tpu_info().vmem_capacity_bytes)
        if phys > 0:
            return int(phys * 0.8)              # headroom for Mosaic internal scratch
    except Exception:
        pass
    return 48 * 1024 * 1024                     # conservative fallback (fits every gen)


# ---------------------------------------------------------------------------
# Host-side wrapper
# ---------------------------------------------------------------------------
def supcon_loss(modeloutput_z, modeloutput_s_pr, modeloutput_f,
                pool_ag, pool_sp, modeloutput_z_mix, mask_neglect_base,
                *, spatial_size, temperature=0.07, base_temperature=0.07,
                lmbd=0.5, reweighting=1,
                target_rows_per_tile=256, target_cols_per_tile=512):
    B, D = modeloutput_z.shape
    split = int(spatial_size * spatial_size)
    assert B % split == 0, "batch must be a whole number of mini-iterations"
    mini_iters = B // split

    R = _choose_rows(split, mini_iters, target_rows_per_tile)
    assert R % 8 == 0, (
        "row tile must be sublane aligned; pad split (=spatial_size**2) to a multiple of 8")
    C = _choose_cols(B, target_cols_per_tile)
    assert C == B or C % 128 == 0
    ni, nj = B // R, B // C

    bf16, f32 = jnp.bfloat16, jnp.float32
    f16 = modeloutput_f.astype(bf16)
    s16 = modeloutput_s_pr.astype(bf16)
    z16 = modeloutput_z.astype(bf16)
    zm16 = modeloutput_z_mix.astype(bf16)

    def mm_host(a, b):                            # bf16 operands / f32 acc (autocast recipe)
        return lax.dot_general(a.astype(bf16), b.astype(bf16), (((1,), (1,)), ((), ())),
                               preferred_element_type=f32)

    # Hoisted Rpoint / Rpoint_ema: tiny [B, P] matmuls + row max, computed once in XLA.
    rp = jnp.max(mm_host(modeloutput_f, pool_ag), axis=1)       # [B] f32
    rpe = jnp.max(mm_host(modeloutput_s_pr, pool_sp), axis=1)
    rp_col, rpe_col = rp.reshape(B, 1), rpe.reshape(B, 1)
    rp_row, rpe_row = rp.reshape(1, B), rpe.reshape(1, B)

    # mask_neglect_base is reused for every mini-iteration: broadcast once to tile height.
    nb_full = jnp.tile(mask_neglect_base.astype(f32), (R // split, 1))   # [R, B]

    kern = functools.partial(
        _supcon_kernel, split=split,
        temperature=float(temperature), base_temperature=float(base_temperature),
        lmbd=float(lmbd), reweighting=int(reweighting),
    )

    row_tile = pl.BlockSpec((R, D), lambda i, j: (i, 0))   # LHS row tiles (bf16)
    col_slab = pl.BlockSpec((D, C), lambda i, j: (0, j))   # pre-transposed RHS slabs (bf16)
    col_vec = pl.BlockSpec((R, 1), lambda i, j: (i, 0))    # Rpoint as column vector
    row_vec = pl.BlockSpec((1, C), lambda i, j: (0, j))    # Rpoint as row vector
    nb_spec = pl.BlockSpec((R, C), lambda i, j: (0, j))    # neglect mask column block

    # Generation-aware VMEM budget from the actual per-step footprint.
    bpe = 2
    blk_bytes = (4 * R * D * bpe + 4 * D * C * bpe + 2 * R * 128 * 4
                 + 2 * 8 * C * 4 + R * C * 4)
    est = 2 * blk_bytes + 2 * 8 * 128 * 4 + 7 * R * 128 * 4 + 16 * R * C * 4
    vmem_limit = int(min(_vmem_cap_bytes(), max(2 * est, 48 * 1024 * 1024)))

    cost = pl.CostEstimate(
        flops=int(4 * 2 * B * B * D),
        transcendentals=int(2 * B * B),
        bytes_accessed=int(4 * B * D * bpe
                           + ni * (4 * D * B * bpe + R * B * 4 + 2 * B * 4 + 2 * R * 4)
                           + ni * 8 * 128 * 4),
    )

    partials = pl.pallas_call(
        kern,
        out_shape=jax.ShapeDtypeStruct((ni * 8, 128), f32),
        grid=(ni, nj),
        in_specs=[row_tile, row_tile, row_tile, row_tile,       # f, s, z, z_mix row tiles
                  col_slab, col_slab, col_slab, col_slab,       # f^T, s^T, z^T, z_mix^T slabs
                  col_vec, col_vec, row_vec, row_vec,           # Rpoint / Rpoint_ema
                  nb_spec],                                     # neglect mask
        out_specs=pl.BlockSpec((8, 128), lambda i, j: (i, 0)),
        scratch_shapes=[pltpu.VMEM((R, 1), f32)] * 7,
        compiler_params=pltpu.CompilerParams(
            dimension_semantics=("parallel", "arbitrary"),
            vmem_limit_bytes=vmem_limit,
        ),
        cost_estimate=cost,
    )(f16, s16, z16, zm16,
      f16.T, s16.T, z16.T, zm16.T,
      rp_col, rpe_col, rp_row, rpe_row, nb_full)

    # Each row tile broadcast its partial loss over its (8, 128) block; read one rep each.
    loss = jnp.sum(partials[::8, 0])
    return loss / mini_iters / 2.0


# ---------------------------------------------------------------------------
# Pure-JAX reference (per-mini-iteration loop, same bf16-matmul recipe) for checking.
# ---------------------------------------------------------------------------
def supcon_loss_reference(z, s_pr, f, pool_ag, pool_sp, z_mix, mask_neglect_base,
                          *, spatial_size, temperature=0.07, base_temperature=0.07,
                          lmbd=0.5, reweighting=1):
    B, D = z.shape
    split = int(spatial_size * spatial_size)
    mini_iters = B // split
    tb = temperature / base_temperature
    bf16 = jnp.bfloat16

    def mm(a, b):
        return lax.dot_general(a.astype(bf16), b.astype(bf16), (((1,), (1,)), ((), ())),
                               preferred_element_type=jnp.float32)

    nb = mask_neglect_base.astype(jnp.float32)
    rp = jnp.max(mm(f, pool_ag), axis=1)
    rpe = jnp.max(mm(s_pr, pool_sp), axis=1)
    cols = jnp.arange(B)[None, :]
    loss = jnp.float32(0.0)
    for mi in range(mini_iters):
        sl = slice(mi * split, (mi + 1) * split)
        rows = jnp.arange(split)[:, None] + mi * split
        neg = (cols != rows).astype(jnp.float32)
        cos = mm(f[sl], f)
        mask_one = jnp.logical_or(rp[sl][:, None] < cos, rp[None, :] < cos).astype(jnp.float32)
        nnm = jnp.maximum(mask_one, nb) * neg
        mask_one = mask_one * neg
        cos_e = mm(s_pr[sl], s_pr)
        mask_ema = jnp.logical_or(rpe[sl][:, None] < cos_e,
                                  rpe[None, :] < cos_e).astype(jnp.float32) * neg

        def log_prob(x):
            adc = mm(x[sl], x) / temperature
            logits = adc - jnp.max(adc, axis=1, keepdims=True)
            denom = jnp.sum(jnp.exp(logits) * nnm, axis=1, keepdims=True)
            return logits - jnp.log(jnp.where(denom > 0.0, denom, 1.0))

        lp = log_prob(z)
        lp_m = log_prob(z_mix)
        valid = (jnp.sum(mask_one, axis=1) > 0.0).astype(jnp.float32)
        n_valid = jnp.sum(valid)
        wm = (mask_one + lmbd * mask_ema) * valid[:, None]
        wrow = jnp.sum(wm, axis=1)
        safe_wrow = jnp.where(wrow > 0.0, wrow, 1.0)
        mlpp = jnp.sum(wm * lp, axis=1) / safe_wrow
        mlpp_m = jnp.sum(wm * lp_m, axis=1) / safe_wrow
        if reweighting == 1:
            W = jnp.sum(wrow)
            pnm = wrow / jnp.where(W > 0.0, W, 1.0) * n_valid
        else:
            pnm = valid
        inv_nv = jnp.where(n_valid > 0.0, 1.0 / jnp.where(n_valid > 0.0, n_valid, 1.0), 0.0)
        loss = loss - jnp.sum(tb * mlpp * pnm) * inv_nv
        loss = loss - jnp.sum(tb * mlpp_m * pnm) * inv_nv
    return loss / mini_iters / 2.0


# ---------------------------------------------------------------------------
if __name__ == "__main__":
    key = jax.random.PRNGKey(0)
    spatial_size = 4                  # split = 16
    split = spatial_size * spatial_size
    mini_iters = 16
    B = split * mini_iters            # 256
    D = 64
    P = 8
    rho = 0.5
    lmbd = 0.5

    ks = jax.random.split(key, 7)

    def unit(k_, shape):
        x = jax.random.normal(k_, shape, dtype=jnp.float32)
        return x / jnp.linalg.norm(x, axis=-1, keepdims=True)

    modeloutput_z = unit(ks[0], (B, D))
    modeloutput_s_pr = unit(ks[1], (B, D))
    modeloutput_f = unit(ks[2], (B, D))
    modeloutput_z_mix = unit(ks[3], (B, D))
    pool_ag = 0.05 * jax.random.normal(ks[4], (P, D), dtype=jnp.float32)
    pool_sp = 0.05 * jax.random.normal(ks[5], (P, D), dtype=jnp.float32)
    mask_neglect_base = (jax.random.uniform(ks[6], (split, B)) < rho).astype(jnp.float32)

    # Small tile targets so this test exercises the full (2 x 2) grid: two "parallel" row
    # tiles and two online-accumulated column blocks.  Real workloads use the defaults.
    loss = supcon_loss(
        modeloutput_z, modeloutput_s_pr, modeloutput_f,
        pool_ag, pool_sp, modeloutput_z_mix, mask_neglect_base,
        spatial_size=spatial_size, temperature=0.07, base_temperature=0.07,
        lmbd=lmbd, reweighting=1,
        target_rows_per_tile=128, target_cols_per_tile=128,
    )
    loss = jax.block_until_ready(loss)

    ref = supcon_loss_reference(
        modeloutput_z, modeloutput_s_pr, modeloutput_f,
        pool_ag, pool_sp, modeloutput_z_mix, mask_neglect_base,
        spatial_size=spatial_size, temperature=0.07, base_temperature=0.07,
        lmbd=lmbd, reweighting=1,
    )
    ref = jax.block_until_ready(ref)

    assert bool(jnp.isfinite(loss)), f"non-finite loss: {loss}"
    assert abs(float(loss) - float(ref)) <= 1e-2 * (1.0 + abs(float(ref))), \
        f"kernel={float(loss)} ref={float(ref)}"
    print("KERNEL_OK")
</pallas_src>

<mosaic_0001>
module attributes {stable_mosaic.version = 11 : i64} {
  func.func @_supcon_kernel(%arg0: i32, %arg1: i32, %arg2: memref<128x64xbf16, #tpu.memory_space<vmem>>, %arg3: memref<128x64xbf16, #tpu.memory_space<vmem>>, %arg4: memref<128x64xbf16, #tpu.memory_space<vmem>>, %arg5: memref<128x64xbf16, #tpu.memory_space<vmem>>, %arg6: memref<64x128xbf16, #tpu.memory_space<vmem>>, %arg7: memref<64x128xbf16, #tpu.memory_space<vmem>>, %arg8: memref<64x128xbf16, #tpu.memory_space<vmem>>, %arg9: memref<64x128xbf16, #tpu.memory_space<vmem>>, %arg10: memref<128x1xf32, #tpu.memory_space<vmem>>, %arg11: memref<128x1xf32, #tpu.memory_space<vmem>>, %arg12: memref<1x128xf32, #tpu.memory_space<vmem>>, %arg13: memref<1x128xf32, #tpu.memory_space<vmem>>, %arg14: memref<128x128xf32, #tpu.memory_space<vmem>>, %arg15: memref<8x128xf32, #tpu.memory_space<vmem>>, %arg16: memref<128x1xf32, #tpu.memory_space<vmem>>, %arg17: memref<128x1xf32, #tpu.memory_space<vmem>>, %arg18: memref<128x1xf32, #tpu.memory_space<vmem>>, %arg19: memref<128x1xf32, #tpu.memory_space<vmem>>, %arg20: memref<128x1xf32, #tpu.memory_space<vmem>>, %arg21: memref<128x1xf32, #tpu.memory_space<vmem>>, %arg22: memref<128x1xf32, #tpu.memory_space<vmem>>) attributes {dimension_semantics = [#tpu.dimension_semantics<parallel>, #tpu.dimension_semantics<arbitrary>], iteration_bounds = array<i64: 2, 2>, scalar_prefetch = 0 : i64, scratch_operands = 7 : i64, tpu.core_type = #tpu.core_type<tc>, window_params = [{transform_indices = @transform_0, window_bounds = array<i64: 128, 64>}, {transform_indices = @transform_1, window_bounds = array<i64: 128, 64>}, {transform_indices = @transform_2, window_bounds = array<i64: 128, 64>}, {transform_indices = @transform_3, window_bounds = array<i64: 128, 64>}, {transform_indices = @transform_4, window_bounds = array<i64: 64, 128>}, {transform_indices = @transform_5, window_bounds = array<i64: 64, 128>}, {transform_indices = @transform_6, window_bounds = array<i64: 64, 128>}, {transform_indices = @transform_7, window_bounds = array<i64: 64, 128>}, {transform_indices = @transform_8, window_bounds = array<i64: 128, 1>}, {transform_indices = @transform_9, window_bounds = array<i64: 128, 1>}, {transform_indices = @transform_10, window_bounds = array<i64: 1, 128>}, {transform_indices = @transform_11, window_bounds = array<i64: 1, 128>}, {transform_indices = @transform_12, window_bounds = array<i64: 128, 128>}, {transform_indices = @transform_13, window_bounds = array<i64: 8, 128>}]} {
    %c0_i32 = arith.constant 0 : i32
    %0 = arith.cmpi eq, %arg1, %c0_i32 : i32
    %1 = arith.extui %0 : i1 to i32
    %c0_i32_0 = arith.constant 0 : i32
    %2 = arith.cmpi ne, %1, %c0_i32_0 : i32
    scf.if %2 {
      %cst_82 = arith.constant 0.000000e+00 : f32
      %118 = vector.broadcast %cst_82 : f32 to vector<128x1xf32>
      %c0_83 = arith.constant 0 : index
      %c0_84 = arith.constant 0 : index
      %119 = vector.load %arg16[%c0_83, %c0_84] : memref<128x1xf32, #tpu.memory_space<vmem>>, vector<128x1xf32>
      tpu.vector_store %arg16[%c0_83, %c0_84], %118 {strides = array<i32>} : memref<128x1xf32, #tpu.memory_space<vmem>>, vector<128x1xf32>,
      %cst_85 = arith.constant 0.000000e+00 : f32
      %120 = vector.broadcast %cst_85 : f32 to vector<128x1xf32>
      %c0_86 = arith.constant 0 : index
      %c0_87 = arith.constant 0 : index
      %121 = vector.load %arg17[%c0_86, %c0_87] : memref<128x1xf32, #tpu.memory_space<vmem>>, vector<128x1xf32>
      tpu.vector_store %arg17[%c0_86, %c0_87], %120 {strides = array<i32>} : memref<128x1xf32, #tpu.memory_space<vmem>>, vector<128x1xf32>,
      %cst_88 = arith.constant 0.000000e+00 : f32
      %122 = vector.broadcast %cst_88 : f32 to vector<128x1xf32>
      %c0_89 = arith.constant 0 : index
      %c0_90 = arith.constant 0 : index
      %123 = vector.load %arg18[%c0_89, %c0_90] : memref<128x1xf32, #tpu.memory_space<vmem>>, vector<128x1xf32>
      tpu.vector_store %arg18[%c0_89, %c0_90], %122 {strides = array<i32>} : memref<128x1xf32, #tpu.memory_space<vmem>>, vector<128x1xf32>,
      %cst_91 = arith.constant 0.000000e+00 : f32
      %124 = vector.broadcast %cst_91 : f32 to vector<128x1xf32>
      %c0_92 = arith.constant 0 : index
      %c0_93 = arith.constant 0 : index
      %125 = vector.load %arg20[%c0_92, %c0_93] : memref<128x1xf32, #tpu.memory_space<vmem>>, vector<128x1xf32>
      tpu.vector_store %arg20[%c0_92, %c0_93], %124 {strides = array<i32>} : memref<128x1xf32, #tpu.memory_space<vmem>>, vector<128x1xf32>,
      %cst_94 = arith.constant 0.000000e+00 : f32
      %126 = vector.broadcast %cst_94 : f32 to vector<128x1xf32>
      %c0_95 = arith.constant 0 : index
      %c0_96 = arith.constant 0 : index
      %127 = vector.load %arg22[%c0_95, %c0_96] : memref<128x1xf32, #tpu.memory_space<vmem>>, vector<128x1xf32>
      tpu.vector_store %arg22[%c0_95, %c0_96], %126 {strides = array<i32>} : memref<128x1xf32, #tpu.memory_space<vmem>>, vector<128x1xf32>,
      %cst_97 = arith.constant 0xFF800000 : f32
      %128 = vector.broadcast %cst_97 : f32 to vector<128x1xf32>
      %c0_98 = arith.constant 0 : index
      %c0_99 = arith.constant 0 : index
      %129 = vector.load %arg19[%c0_98, %c0_99] : memref<128x1xf32, #tpu.memory_space<vmem>>, vector<128x1xf32>
      tpu.vector_store %arg19[%c0_98, %c0_99], %128 {strides = array<i32>} : memref<128x1xf32, #tpu.memory_space<vmem>>, vector<128x1xf32>,
      %cst_100 = arith.constant 0xFF800000 : f32
      %130 = vector.broadcast %cst_100 : f32 to vector<128x1xf32>
      %c0_101 = arith.constant 0 : index
      %c0_102 = arith.constant 0 : index
      %131 = vector.load %arg21[%c0_101, %c0_102] : memref<128x1xf32, #tpu.memory_space<vmem>>, vector<128x1xf32>
      tpu.vector_store %arg21[%c0_101, %c0_102], %130 {strides = array<i32>} : memref<128x1xf32, #tpu.memory_space<vmem>>, vector<128x1xf32>,
    } else {
    }
    %c0 = arith.constant 0 : index
    %c0_1 = arith.constant 0 : index
    %3 = vector.load %arg2[%c0, %c0_1] : memref<128x64xbf16, #tpu.memory_space<vmem>>, vector<128x64xbf16>
    %c0_2 = arith.constant 0 : index
    %c0_3 = arith.constant 0 : index
    %4 = vector.load %arg6[%c0_2, %c0_3] : memref<64x128xbf16, #tpu.memory_space<vmem>>, vector<64x128xbf16>
    %cst = arith.constant dense<0.000000e+00> : vector<128x128xf32>
    %5 = tpu.matmul %3, %4, %cst {dimension_numbers = #tpu.dot_dimension_numbers<[1], [0], [0], [1], [0, 0, 1, 1], [], []>} : vector<128x64xbf16>, vector<64x128xbf16>, vector<128x128xf32> -> vector<128x128xf32>
    %c0_4 = arith.constant 0 : index
    %c0_5 = arith.constant 0 : index
    %6 = vector.load %arg3[%c0_4, %c0_5] : memref<128x64xbf16, #tpu.memory_space<vmem>>, vector<128x64xbf16>
    %c0_6 = arith.constant 0 : index
    %c0_7 = arith.constant 0 : index
    %7 = vector.load %arg7[%c0_6, %c0_7] : memref<64x128xbf16, #tpu.memory_space<vmem>>, vector<64x128xbf16>
    %cst_8 = arith.constant dense<0.000000e+00> : vector<128x128xf32>
    %8 = tpu.matmul %6, %7, %cst_8 {dimension_numbers = #tpu.dot_dimension_numbers<[1], [0], [0], [1], [0, 0, 1, 1], [], []>} : vector<128x64xbf16>, vector<64x128xbf16>, vector<128x128xf32> -> vector<128x128xf32>
    %c0_9 = arith.constant 0 : index
    %c0_10 = arith.constant 0 : index
    %9 = vector.load %arg4[%c0_9, %c0_10] : memref<128x64xbf16, #tpu.memory_space<vmem>>, vector<128x64xbf16>
    %cst_11 = arith.constant 1.431250e+01 : bf16
    %10 = vector.broadcast %cst_11 : bf16 to vector<128x64xbf16>
    %11 = arith.mulf %9, %10 : vector<128x64xbf16>
    %c0_12 = arith.constant 0 : index
    %c0_13 = arith.constant 0 : index
    %12 = vector.load %arg8[%c0_12, %c0_13] : memref<64x128xbf16, #tpu.memory_space<vmem>>, vector<64x128xbf16>
    %cst_14 = arith.constant dense<0.000000e+00> : vector<128x128xf32>
    %13 = tpu.matmul %11, %12, %cst_14 {dimension_numbers = #tpu.dot_dimension_numbers<[1], [0], [0], [1], [0, 0, 1, 1], [], []>} : vector<128x64xbf16>, vector<64x128xbf16>, vector<128x128xf32> -> vector<128x128xf32>
    %c0_15 = arith.constant 0 : index
    %c0_16 = arith.constant 0 : index
    %14 = vector.load %arg5[%c0_15, %c0_16] : memref<128x64xbf16, #tpu.memory_space<vmem>>, vector<128x64xbf16>
    %cst_17 = arith.constant 1.431250e+01 : bf16
    %15 = vector.broadcast %cst_17 : bf16 to vector<128x64xbf16>
    %16 = arith.mulf %14, %15 : vector<128x64xbf16>
    %c0_18 = arith.constant 0 : index
    %c0_19 = arith.constant 0 : index
    %17 = vector.load %arg9[%c0_18, %c0_19] : memref<64x128xbf16, #tpu.memory_space<vmem>>, vector<64x128xbf16>
    %cst_20 = arith.constant dense<0.000000e+00> : vector<128x128xf32>
    %18 = tpu.matmul %16, %17, %cst_20 {dimension_numbers = #tpu.dot_dimension_numbers<[1], [0], [0], [1], [0, 0, 1, 1], [], []>} : vector<128x64xbf16>, vector<64x128xbf16>, vector<128x128xf32> -> vector<128x128xf32>
    %c0_21 = arith.constant 0 : index
    %c0_22 = arith.constant 0 : index
    %19 = vector.load %arg10[%c0_21, %c0_22] : memref<128x1xf32, #tpu.memory_space<vmem>>, vector<128x1xf32>
    %c0_23 = arith.constant 0 : index
    %c0_24 = arith.constant 0 : index
    %20 = vector.load %arg11[%c0_23, %c0_24] : memref<128x1xf32, #tpu.memory_space<vmem>>, vector<128x1xf32>
    %c0_25 = arith.constant 0 : index
    %c0_26 = arith.constant 0 : index
    %21 = vector.load %arg12[%c0_25, %c0_26] : memref<1x128xf32, #tpu.memory_space<vmem>>, vector<1x128xf32>
    %c0_27 = arith.constant 0 : index
    %c0_28 = arith.constant 0 : index
    %22 = vector.load %arg13[%c0_27, %c0_28] : memref<1x128xf32, #tpu.memory_space<vmem>>, vector<1x128xf32>
    %23 = tpu.iota {dimensions = array<i32: 0>} : vector<128x128xi32>
    %c128_i32 = arith.constant 128 : i32
    %24 = arith.muli %arg0, %c128_i32 : i32
    %25 = vector.broadcast %24 : i32 to vector<128x128xi32>
    %26 = arith.addi %23, %25 : vector<128x128xi32>
    %27 = tpu.iota {dimensions = array<i32: 1>} : vector<128x128xi32>
    %c128_i32_29 = arith.constant 128 : i32
    %28 = arith.muli %arg1, %c128_i32_29 : i32
    %29 = vector.broadcast %28 : i32 to vector<128x128xi32>
    %30 = arith.addi %27, %29 : vector<128x128xi32>
    %31 = arith.cmpi ne, %26, %30 : vector<128x128xi32>
    %32 = vector.broadcast %19 : vector<128x1xf32> to vector<128x128xf32>
    %33 = arith.cmpf olt, %32, %5 : vector<128x128xf32>
    %34 = vector.broadcast %21 : vector<1x128xf32> to vector<128x128xf32>
    %35 = arith.cmpf olt, %34, %5 : vector<128x128xf32>
    %36 = arith.ori %33, %35 : vector<128x128xi1>
    %37 = vector.broadcast %20 : vector<128x1xf32> to vector<128x128xf32>
    %38 = arith.cmpf olt, %37, %8 : vector<128x128xf32>
    %39 = vector.broadcast %22 : vector<1x128xf32> to vector<128x128xf32>
    %40 = arith.cmpf olt, %39, %8 : vector<128x128xf32>
    %41 = arith.ori %38, %40 : vector<128x128xi1>
    %c0_30 = arith.constant 0 : index
    %c0_31 = arith.constant 0 : index
    %42 = vector.load %arg14[%c0_30, %c0_31] : memref<128x128xf32, #tpu.memory_space<vmem>>, vector<128x128xf32>
    %cst_32 = arith.constant 0.000000e+00 : f32
    %43 = vector.broadcast %cst_32 : f32 to vector<128x128xf32>
    %44 = arith.cmpf ogt, %42, %43 : vector<128x128xf32>
    %45 = arith.ori %36, %44 : vector<128x128xi1>
    %46 = arith.andi %45, %31 : vector<128x128xi1>
    %47 = arith.andi %36, %31 : vector<128x128xi1>
    %cst_33 = arith.constant 1.000000e+00 : f32
    %cst_34 = arith.constant 0.000000e+00 : f32
    %48 = vector.broadcast %cst_33 : f32 to vector<128x128xf32>
    %49 = vector.broadcast %cst_34 : f32 to vector<128x128xf32>
    %50 = arith.select %47, %48, %49 : vector<128x128xi1>, vector<128x128xf32>
    %cst_35 = arith.constant dense<0xFF800000> : vector<128xf32>
    %51 = vector.multi_reduction <maximumf>, %50, %cst_35 [1] : vector<128x128xf32> to vector<128xf32>
    %52 = vector.shape_cast %51 : vector<128xf32> to vector<128x1xf32>
    %c0_36 = arith.constant 0 : index
    %c0_37 = arith.constant 0 : index
    %53 = vector.load %arg16[%c0_36, %c0_37] : memref<128x1xf32, #tpu.memory_space<vmem>>, vector<128x1xf32>
    %54 = arith.maximumf %53, %52 : vector<128x1xf32>
    %c0_38 = arith.constant 0 : index
    %c0_39 = arith.constant 0 : index
    %55 = vector.load %arg16[%c0_38, %c0_39] : memref<128x1xf32, #tpu.memory_space<vmem>>, vector<128x1xf32>
    tpu.vector_store %arg16[%c0_38, %c0_39], %54 {strides = array<i32>} : memref<128x1xf32, #tpu.memory_space<vmem>>, vector<128x1xf32>,
    %cst_40 = arith.constant 1.000000e+00 : f32
    %cst_41 = arith.constant 0.000000e+00 : f32
    %56 = vector.broadcast %cst_40 : f32 to vector<128x128xf32>
    %57 = vector.broadcast %cst_41 : f32 to vector<128x128xf32>
    %58 = arith.select %36, %56, %57 : vector<128x128xi1>, vector<128x128xf32>
    %cst_42 = arith.constant 5.000000e-01 : f32
    %cst_43 = arith.constant 0.000000e+00 : f32
    %59 = vector.broadcast %cst_42 : f32 to vector<128x128xf32>
    %60 = vector.broadcast %cst_43 : f32 to vector<128x128xf32>
    %61 = arith.select %41, %59, %60 : vector<128x128xi1>, vector<128x128xf32>
    %62 = arith.addf %58, %61 : vector<128x128xf32>
    %cst_44 = arith.constant 0.000000e+00 : f32
    %63 = vector.broadcast %cst_44 : f32 to vector<128x128xf32>
    %64 = arith.select %31, %62, %63 : vector<128x128xi1>, vector<128x128xf32>
    %c0_45 = arith.constant 0 : index
    %c0_46 = arith.constant 0 : index
    %65 = vector.load %arg17[%c0_45, %c0_46] : memref<128x1xf32, #tpu.memory_space<vmem>>, vector<128x1xf32>
    %cst_47 = arith.constant dense<0.000000e+00> : vector<128xf32>
    %66 = vector.multi_reduction <add>, %64, %cst_47 [1] : vector<128x128xf32> to vector<128xf32>
    %67 = vector.shape_cast %66 : vector<128xf32> to vector<128x1xf32>
    %68 = arith.addf %65, %67 : vector<128x1xf32>
    %c0_48 = arith.constant 0 : index
    %c0_49 = arith.constant 0 : index
    %69 = vector.load %arg17[%c0_48, %c0_49] : memref<128x1xf32, #tpu.memory_space<vmem>>, vector<128x1xf32>
    tpu.vector_store %arg17[%c0_48, %c0_49], %68 {strides = array<i32>} : memref<128x1xf32, #tpu.memory_space<vmem>>, vector<128x1xf32>,
    %c0_50 = arith.constant 0 : index
    %c0_51 = arith.constant 0 : index
    %70 = vector.load %arg18[%c0_50, %c0_51] : memref<128x1xf32, #tpu.memory_space<vmem>>, vector<128x1xf32>
    %71 = arith.addf %13, %18 : vector<128x128xf32>
    %72 = arith.mulf %64, %71 : vector<128x128xf32>
    %cst_52 = arith.constant dense<0.000000e+00> : vector<128xf32>
    %73 = vector.multi_reduction <add>, %72, %cst_52 [1] : vector<128x128xf32> to vector<128xf32>
    %74 = vector.shape_cast %73 : vector<128xf32> to vector<128x1xf32>
    %75 = arith.addf %70, %74 : vector<128x1xf32>
    %c0_53 = arith.constant 0 : index
    %c0_54 = arith.constant 0 : index
    %76 = vector.load %arg18[%c0_53, %c0_54] : memref<128x1xf32, #tpu.memory_space<vmem>>, vector<128x1xf32>
    tpu.vector_store %arg18[%c0_53, %c0_54], %75 {strides = array<i32>} : memref<128x1xf32, #tpu.memory_space<vmem>>, vector<128x1xf32>,
    %c0_55 = arith.constant 0 : index
    %c0_56 = arith.constant 0 : index
    %77 = vector.load %arg19[%c0_55, %c0_56] : memref<128x1xf32, #tpu.memory_space<vmem>>, vector<128x1xf32>
    %cst_57 = arith.constant dense<0xFF800000> : vector<128xf32>
    %78 = vector.multi_reduction <maximumf>, %13, %cst_57 [1] : vector<128x128xf32> to vector<128xf32>
    %79 = vector.shape_cast %78 : vector<128xf32> to vector<128x1xf32>
    %80 = arith.maximumf %77, %79 : vector<128x1xf32>
    %81 = vector.broadcast %80 : vector<128x1xf32> to vector<128x128xf32>
    %82 = arith.subf %13, %81 : vector<128x128xf32>
    %83 = math.exp %82 : vector<128x128xf32>
    %cst_58 = arith.constant 0.000000e+00 : f32
    %84 = vector.broadcast %cst_58 : f32 to vector<128x128xf32>
    %85 = arith.select %46, %83, %84 : vector<128x128xi1>, vector<128x128xf32>
    %c0_59 = arith.constant 0 : index
    %c0_60 = arith.constant 0 : index
    %86 = vector.load %arg20[%c0_59, %c0_60] : memref<128x1xf32, #tpu.memory_space<vmem>>, vector<128x1xf32>
    %c0_61 = arith.constant 0 : index
    %c0_62 = arith.constant 0 : index
    %87 = vector.load %arg19[%c0_61, %c0_62] : memref<128x1xf32, #tpu.memory_space<vmem>>, vector<128x1xf32>
    %88 = arith.subf %87, %80 : vector<128x1xf32>
    %89 = math.exp %88 : vector<128x1xf32>
    %90 = arith.mulf %86, %89 : vector<128x1xf32>
    %cst_63 = arith.constant dense<0.000000e+00> : vector<128xf32>
    %91 = vector.multi_reduction <add>, %85, %cst_63 [1] : vector<128x128xf32> to vector<128xf32>
    %92 = vector.shape_cast %91 : vector<128xf32> to vector<128x1xf32>
    %93 = arith.addf %90, %92 : vector<128x1xf32>
    %c0_64 = arith.constant 0 : index
    %c0_65 = arith.constant 0 : index
    %94 = vector.load %arg20[%c0_64, %c0_65] : memref<128x1xf32, #tpu.memory_space<vmem>>, vector<128x1xf32>
    tpu.vector_store %arg20[%c0_64, %c0_65], %93 {strides = array<i32>} : memref<128x1xf32, #tpu.memory_space<vmem>>, vector<128x1xf32>,
    %c0_66 = arith.constant 0 : index
    %c0_67 = arith.constant 0 : index
    %95 = vector.load %arg19[%c0_66, %c0_67] : memref<128x1xf32, #tpu.memory_space<vmem>>, vector<128x1xf32>
    tpu.vector_store %arg19[%c0_66, %c0_67], %80 {strides = array<i32>} : memref<128x1xf32, #tpu.memory_space<vmem>>, vector<128x1xf32>,
    %c0_68 = arith.constant 0 : index
    %c0_69 = arith.constant 0 : index
    %96 = vector.load %arg21[%c0_68, %c0_69] : memref<128x1xf32, #tpu.memory_space<vmem>>, vector<128x1xf32>
    %cst_70 = arith.constant dense<0xFF800000> : vector<128xf32>
    %97 = vector.multi_reduction <maximumf>, %18, %cst_70 [1] : vector<128x128xf32> to vector<128xf32>
    %98 = vector.shape_cast %97 : vector<128xf32> to vector<128x1xf32>
    %99 = arith.maximumf %96, %98 : vector<128x1xf32>
    %100 = vector.broadcast %99 : vector<128x1xf32> to vector<128x128xf32>
    %101 = arith.subf %18, %100 : vector<128x128xf32>
    %102 = math.exp %101 : vector<128x128xf32>
    %cst_71 = arith.constant 0.000000e+00 : f32
    %103 = vector.broadcast %cst_71 : f32 to vector<128x128xf32>
    %104 = arith.select %46, %102, %103 : vector<128x128xi1>, vector<128x128xf32>
    %c0_72 = arith.constant 0 : index
    %c0_73 = arith.constant 0 : index
    %105 = vector.load %arg22[%c0_72, %c0_73] : memref<128x1xf32, #tpu.memory_space<vmem>>, vector<128x1xf32>
    %c0_74 = arith.constant 0 : index
    %c0_75 = arith.constant 0 : index
    %106 = vector.load %arg21[%c0_74, %c0_75] : memref<128x1xf32, #tpu.memory_space<vmem>>, vector<128x1xf32>
    %107 = arith.subf %106, %99 : vector<128x1xf32>
    %108 = math.exp %107 : vector<128x1xf32>
    %109 = arith.mulf %105, %108 : vector<128x1xf32>
    %cst_76 = arith.constant dense<0.000000e+00> : vector<128xf32>
    %110 = vector.multi_reduction <add>, %104, %cst_76 [1] : vector<128x128xf32> to vector<128xf32>
    %111 = vector.shape_cast %110 : vector<128xf32> to vector<128x1xf32>
    %112 = arith.addf %109, %111 : vector<128x1xf32>
    %c0_77 = arith.constant 0 : index
    %c0_78 = arith.constant 0 : index
    %113 = vector.load %arg22[%c0_77, %c0_78] : memref<128x1xf32, #tpu.memory_space<vmem>>, vector<128x1xf32>
    tpu.vector_store %arg22[%c0_77, %c0_78], %112 {strides = array<i32>} : memref<128x1xf32, #tpu.memory_space<vmem>>, vector<128x1xf32>,
    %c0_79 = arith.constant 0 : index
    %c0_80 = arith.constant 0 : index
    %114 = vector.load %arg21[%c0_79, %c0_80] : memref<128x1xf32, #tpu.memory_space<vmem>>, vector<128x1xf32>
    tpu.vector_store %arg21[%c0_79, %c0_80], %99 {strides = array<i32>} : memref<128x1xf32, #tpu.memory_space<vmem>>, vector<128x1xf32>,
    %c1_i32 = arith.constant 1 : i32
    %115 = arith.cmpi eq, %arg1, %c1_i32 : i32
    %116 = arith.extui %115 : i1 to i32
    %c0_i32_81 = arith.constant 0 : i32
    %117 = arith.cmpi ne, %116, %c0_i32_81 : i32
    scf.if %117 {
      %c0_82 = arith.constant 0 : index
      %c0_83 = arith.constant 0 : index
      %118 = vector.load %arg16[%c0_82, %c0_83] : memref<128x1xf32, #tpu.memory_space<vmem>>, vector<128x1xf32>
      %c0_84 = arith.constant 0 : index
      %c0_85 = arith.constant 0 : index
      %119 = vector.load %arg17[%c0_84, %c0_85] : memref<128x1xf32, #tpu.memory_space<vmem>>, vector<128x1xf32>
      %c0_86 = arith.constant 0 : index
      %c0_87 = arith.constant 0 : index
      %120 = vector.load %arg20[%c0_86, %c0_87] : memref<128x1xf32, #tpu.memory_space<vmem>>, vector<128x1xf32>
      %cst_88 = arith.constant 0.000000e+00 : f32
      %121 = vector.broadcast %cst_88 : f32 to vector<128x1xf32>
      %122 = arith.cmpf ogt, %120, %121 : vector<128x1xf32>
      %c0_89 = arith.constant 0 : index
      %c0_90 = arith.constant 0 : index
      %123 = vector.load %arg20[%c0_89, %c0_90] : memref<128x1xf32, #tpu.memory_space<vmem>>, vector<128x1xf32>
      %cst_91 = arith.constant 1.000000e+00 : f32
      %124 = vector.broadcast %cst_91 : f32 to vector<128x1xf32>
      %125 = arith.select %122, %123, %124 : vector<128x1xi1>, vector<128x1xf32>
      %126 = math.log %125 : vector<128x1xf32>
      %c0_92 = arith.constant 0 : index
      %c0_93 = arith.constant 0 : index
      %127 = vector.load %arg22[%c0_92, %c0_93] : memref<128x1xf32, #tpu.memory_space<vmem>>, vector<128x1xf32>
      %cst_94 = arith.constant 0.000000e+00 : f32
      %128 = vector.broadcast %cst_94 : f32 to vector<128x1xf32>
      %129 = arith.cmpf ogt, %127, %128 : vector<128x1xf32>
      %c0_95 = arith.constant 0 : index
      %c0_96 = arith.constant 0 : index
      %130 = vector.load %arg22[%c0_95, %c0_96] : memref<128x1xf32, #tpu.memory_space<vmem>>, vector<128x1xf32>
      %cst_97 = arith.constant 1.000000e+00 : f32
      %131 = vector.broadcast %cst_97 : f32 to vector<128x1xf32>
      %132 = arith.select %129, %130, %131 : vector<128x1xi1>, vector<128x1xf32>
      %133 = math.log %132 : vector<128x1xf32>
      %134 = arith.addf %126, %133 : vector<128x1xf32>
      %c0_98 = arith.constant 0 : index
      %c0_99 = arith.constant 0 : index
      %135 = vector.load %arg18[%c0_98, %c0_99] : memref<128x1xf32, #tpu.memory_space<vmem>>, vector<128x1xf32>
      %c0_100 = arith.constant 0 : index
      %c0_101 = arith.constant 0 : index
      %136 = vector.load %arg19[%c0_100, %c0_101] : memref<128x1xf32, #tpu.memory_space<vmem>>, vector<128x1xf32>
      %c0_102 = arith.constant 0 : index
      %c0_103 = arith.constant 0 : index
      %137 = vector.load %arg21[%c0_102, %c0_103] : memref<128x1xf32, #tpu.memory_space<vmem>>, vector<128x1xf32>
      %138 = arith.addf %136, %137 : vector<128x1xf32>
      %139 = arith.addf %138, %134 : vector<128x1xf32>
      %140 = arith.mulf %119, %139 : vector<128x1xf32>
      %141 = arith.subf %135, %140 : vector<128x1xf32>
      %142 = arith.mulf %141, %118 : vector<128x1xf32>
      %143 = arith.mulf %119, %118 : vector<128x1xf32>
      %144 = vector.extract_strided_slice %143 {offsets = [0, 0], sizes = [16, 1], strides = [1, 1]} : vector<128x1xf32> to vector<16x1xf32>
      %145 = vector.shape_cast %144 : vector<16x1xf32> to vector<1x16x1xf32>
      %cst_104 = arith.constant dense<0.000000e+00> : vector<1xf32>
      %146 = vector.multi_reduction <add>, %145, %cst_104 [1, 2] : vector<1x16x1xf32> to vector<1xf32>
      %147 = vector.shape_cast %146 : vector<1xf32> to vector<1x1x1xf32>
      %148 = vector.extract %147[0, 0, 0] : f32 from vector<1x1x1xf32>
      %149 = vector.extract_strided_slice %142 {offsets = [0, 0], sizes = [16, 1], strides = [1, 1]} : vector<128x1xf32> to vector<16x1xf32>
      %150 = vector.shape_cast %149 : vector<16x1xf32> to vector<1x16x1xf32>
      %cst_105 = arith.constant dense<0.000000e+00> : vector<1xf32>
      %151 = vector.multi_reduction <add>, %150, %cst_105 [1, 2] : vector<1x16x1xf32> to vector<1xf32>
      %152 = vector.shape_cast %151 : vector<1xf32> to vector<1x1x1xf32>
      %153 = vector.extract %152[0, 0, 0] : f32 from vector<1x1x1xf32>
      %cst_106 = arith.constant 0.000000e+00 : f32
      %154 = arith.cmpf ogt, %148, %cst_106 : f32
      %cst_107 = arith.constant 0.000000e+00 : f32
      %155 = arith.cmpf ogt, %148, %cst_107 : f32
      %cst_108 = arith.constant 1.000000e+00 : f32
      %156 = arith.select %155, %148, %cst_108 : f32
      %157 = arith.divf %153, %156 : f32
      %cst_109 = arith.constant 0.000000e+00 : f32
      %158 = arith.select %154, %157, %cst_109 : f32
      %cst_110 = arith.constant 0.000000e+00 : f32
      %159 = arith.addf %cst_110, %158 : f32
      %160 = vector.extract_strided_slice %143 {offsets = [16, 0], sizes = [16, 1], strides = [1, 1]} : vector<128x1xf32> to vector<16x1xf32>
      %161 = vector.shape_cast %160 : vector<16x1xf32> to vector<1x16x1xf32>
      %cst_111 = arith.constant dense<0.000000e+00> : vector<1xf32>
      %162 = vector.multi_reduction <add>, %161, %cst_111 [1, 2] : vector<1x16x1xf32> to vector<1xf32>
      %163 = vector.shape_cast %162 : vector<1xf32> to vector<1x1x1xf32>
      %164 = vector.extract %163[0, 0, 0] : f32 from vector<1x1x1xf32>
      %165 = vector.extract_strided_slice %142 {offsets = [16, 0], sizes = [16, 1], strides = [1, 1]} : vector<128x1xf32> to vector<16x1xf32>
      %166 = vector.shape_cast %165 : vector<16x1xf32> to vector<1x16x1xf32>
      %cst_112 = arith.constant dense<0.000000e+00> : vector<1xf32>
      %167 = vector.multi_reduction <add>, %166, %cst_112 [1, 2] : vector<1x16x1xf32> to vector<1xf32>
      %168 = vector.shape_cast %167 : vector<1xf32> to vector<1x1x1xf32>
      %169 = vector.extract %168[0, 0, 0] : f32 from vector<1x1x1xf32>
      %cst_113 = arith.constant 0.000000e+00 : f32
      %170 = arith.cmpf ogt, %164, %cst_113 : f32
      %cst_114 = arith.constant 0.000000e+00 : f32
      %171 = arith.cmpf ogt, %164, %cst_114 : f32
      %cst_115 = arith.constant 1.000000e+00 : f32
      %172 = arith.select %171, %164, %cst_115 : f32
      %173 = arith.divf %169, %172 : f32
      %cst_116 = arith.constant 0.000000e+00 : f32
      %174 = arith.select %170, %173, %cst_116 : f32
      %175 = arith.addf %159, %174 : f32
      %176 = vector.extract_strided_slice %143 {offsets = [32, 0], sizes = [16, 1], strides = [1, 1]} : vector<128x1xf32> to vector<16x1xf32>
      %177 = vector.shape_cast %176 : vector<16x1xf32> to vector<1x16x1xf32>
      %cst_117 = arith.constant dense<0.000000e+00> : vector<1xf32>
      %178 = vector.multi_reduction <add>, %177, %cst_117 [1, 2] : vector<1x16x1xf32> to vector<1xf32>
      %179 = vector.shape_cast %178 : vector<1xf32> to vector<1x1x1xf32>
      %180 = vector.extract %179[0, 0, 0] : f32 from vector<1x1x1xf32>
      %181 = vector.extract_strided_slice %142 {offsets = [32, 0], sizes = [16, 1], strides = [1, 1]} : vector<128x1xf32> to vector<16x1xf32>
      %182 = vector.shape_cast %181 : vector<16x1xf32> to vector<1x16x1xf32>
      %cst_118 = arith.constant dense<0.000000e+00> : vector<1xf32>
      %183 = vector.multi_reduction <add>, %182, %cst_118 [1, 2] : vector<1x16x1xf32> to vector<1xf32>
      %184 = vector.shape_cast %183 : vector<1xf32> to vector<1x1x1xf32>
      %185 = vector.extract %184[0, 0, 0] : f32 from vector<1x1x1xf32>
      %cst_119 = arith.constant 0.000000e+00 : f32
      %186 = arith.cmpf ogt, %180, %cst_119 : f32
      %cst_120 = arith.constant 0.000000e+00 : f32
      %187 = arith.cmpf ogt, %180, %cst_120 : f32
      %cst_121 = arith.constant 1.000000e+00 : f32
      %188 = arith.select %187, %180, %cst_121 : f32
      %189 = arith.divf %185, %188 : f32
      %cst_122 = arith.constant 0.000000e+00 : f32
      %190 = arith.select %186, %189, %cst_122 : f32
      %191 = arith.addf %175, %190 : f32
      %192 = vector.extract_strided_slice %143 {offsets = [48, 0], sizes = [16, 1], strides = [1, 1]} : vector<128x1xf32> to vector<16x1xf32>
      %193 = vector.shape_cast %192 : vector<16x1xf32> to vector<1x16x1xf32>
      %cst_123 = arith.constant dense<0.000000e+00> : vector<1xf32>
      %194 = vector.multi_reduction <add>, %193, %cst_123 [1, 2] : vector<1x16x1xf32> to vector<1xf32>
      %195 = vector.shape_cast %194 : vector<1xf32> to vector<1x1x1xf32>
      %196 = vector.extract %195[0, 0, 0] : f32 from vector<1x1x1xf32>
      %197 = vector.extract_strided_slice %142 {offsets = [48, 0], sizes = [16, 1], strides = [1, 1]} : vector<128x1xf32> to vector<16x1xf32>
      %198 = vector.shape_cast %197 : vector<16x1xf32> to vector<1x16x1xf32>
      %cst_124 = arith.constant dense<0.000000e+00> : vector<1xf32>
      %199 = vector.multi_reduction <add>, %198, %cst_124 [1, 2] : vector<1x16x1xf32> to vector<1xf32>
      %200 = vector.shape_cast %199 : vector<1xf32> to vector<1x1x1xf32>
      %201 = vector.extract %200[0, 0, 0] : f32 from vector<1x1x1xf32>
      %cst_125 = arith.constant 0.000000e+00 : f32
      %202 = arith.cmpf ogt, %196, %cst_125 : f32
      %cst_126 = arith.constant 0.000000e+00 : f32
      %203 = arith.cmpf ogt, %196, %cst_126 : f32
      %cst_127 = arith.constant 1.000000e+00 : f32
      %204 = arith.select %203, %196, %cst_127 : f32
      %205 = arith.divf %201, %204 : f32
      %cst_128 = arith.constant 0.000000e+00 : f32
      %206 = arith.select %202, %205, %cst_128 : f32
      %207 = arith.addf %191, %206 : f32
      %208 = vector.extract_strided_slice %143 {offsets = [64, 0], sizes = [16, 1], strides = [1, 1]} : vector<128x1xf32> to vector<16x1xf32>
      %209 = vector.shape_cast %208 : vector<16x1xf32> to vector<1x16x1xf32>
      %cst_129 = arith.constant dense<0.000000e+00> : vector<1xf32>
      %210 = vector.multi_reduction <add>, %209, %cst_129 [1, 2] : vector<1x16x1xf32> to vector<1xf32>
      %211 = vector.shape_cast %210 : vector<1xf32> to vector<1x1x1xf32>
      %212 = vector.extract %211[0, 0, 0] : f32 from vector<1x1x1xf32>
      %213 = vector.extract_strided_slice %142 {offsets = [64, 0], sizes = [16, 1], strides = [1, 1]} : vector<128x1xf32> to vector<16x1xf32>
      %214 = vector.shape_cast %213 : vector<16x1xf32> to vector<1x16x1xf32>
      %cst_130 = arith.constant dense<0.000000e+00> : vector<1xf32>
      %215 = vector.multi_reduction <add>, %214, %cst_130 [1, 2] : vector<1x16x1xf32> to vector<1xf32>
      %216 = vector.shape_cast %215 : vector<1xf32> to vector<1x1x1xf32>
      %217 = vector.extract %216[0, 0, 0] : f32 from vector<1x1x1xf32>
      %cst_131 = arith.constant 0.000000e+00 : f32
      %218 = arith.cmpf ogt, %212, %cst_131 : f32
      %cst_132 = arith.constant 0.000000e+00 : f32
      %219 = arith.cmpf ogt, %212, %cst_132 : f32
      %cst_133 = arith.constant 1.000000e+00 : f32
      %220 = arith.select %219, %212, %cst_133 : f32
      %221 = arith.divf %217, %220 : f32
      %cst_134 = arith.constant 0.000000e+00 : f32
      %222 = arith.select %218, %221, %cst_134 : f32
      %223 = arith.addf %207, %222 : f32
      %224 = vector.extract_strided_slice %143 {offsets = [80, 0], sizes = [16, 1], strides = [1, 1]} : vector<128x1xf32> to vector<16x1xf32>
      %225 = vector.shape_cast %224 : vector<16x1xf32> to vector<1x16x1xf32>
      %cst_135 = arith.constant dense<0.000000e+00> : vector<1xf32>
      %226 = vector.multi_reduction <add>, %225, %cst_135 [1, 2] : vector<1x16x1xf32> to vector<1xf32>
      %227 = vector.shape_cast %226 : vector<1xf32> to vector<1x1x1xf32>
      %228 = vector.extract %227[0, 0, 0] : f32 from vector<1x1x1xf32>
      %229 = vector.extract_strided_slice %142 {offsets = [80, 0], sizes = [16, 1], strides = [1, 1]} : vector<128x1xf32> to vector<16x1xf32>
      %230 = vector.shape_cast %229 : vector<16x1xf32> to vector<1x16x1xf32>
      %cst_136 = arith.constant dense<0.000000e+00> : vector<1xf32>
      %231 = vector.multi_reduction <add>, %230, %cst_136 [1, 2] : vector<1x16x1xf32> to vector<1xf32>
      %232 = vector.shape_cast %231 : vector<1xf32> to vector<1x1x1xf32>
      %233 = vector.extract %232[0, 0, 0] : f32 from vector<1x1x1xf32>
      %cst_137 = arith.constant 0.000000e+00 : f32
      %234 = arith.cmpf ogt, %228, %cst_137 : f32
      %cst_138 = arith.constant 0.000000e+00 : f32
      %235 = arith.cmpf ogt, %228, %cst_138 : f32
      %cst_139 = arith.constant 1.000000e+00 : f32
      %236 = arith.select %235, %228, %cst_139 : f32
      %237 = arith.divf %233, %236 : f32
      %cst_140 = arith.constant 0.000000e+00 : f32
      %238 = arith.select %234, %237, %cst_140 : f32
      %239 = arith.addf %223, %238 : f32
      %240 = vector.extract_strided_slice %143 {offsets = [96, 0], sizes = [16, 1], strides = [1, 1]} : vector<128x1xf32> to vector<16x1xf32>
      %241 = vector.shape_cast %240 : vector<16x1xf32> to vector<1x16x1xf32>
      %cst_141 = arith.constant dense<0.000000e+00> : vector<1xf32>
      %242 = vector.multi_reduction <add>, %241, %cst_141 [1, 2] : vector<1x16x1xf32> to vector<1xf32>
      %243 = vector.shape_cast %242 : vector<1xf32> to vector<1x1x1xf32>
      %244 = vector.extract %243[0, 0, 0] : f32 from vector<1x1x1xf32>
      %245 = vector.extract_strided_slice %142 {offsets = [96, 0], sizes = [16, 1], strides = [1, 1]} : vector<128x1xf32> to vector<16x1xf32>
      %246 = vector.shape_cast %245 : vector<16x1xf32> to vector<1x16x1xf32>
      %cst_142 = arith.constant dense<0.000000e+00> : vector<1xf32>
      %247 = vector.multi_reduction <add>, %246, %cst_142 [1, 2] : vector<1x16x1xf32> to vector<1xf32>
      %248 = vector.shape_cast %247 : vector<1xf32> to vector<1x1x1xf32>
      %249 = vector.extract %248[0, 0, 0] : f32 from vector<1x1x1xf32>
      %cst_143 = arith.constant 0.000000e+00 : f32
      %250 = arith.cmpf ogt, %244, %cst_143 : f32
      %cst_144 = arith.constant 0.000000e+00 : f32
      %251 = arith.cmpf ogt, %244, %cst_144 : f32
      %cst_145 = arith.constant 1.000000e+00 : f32
      %252 = arith.select %251, %244, %cst_145 : f32
      %253 = arith.divf %249, %252 : f32
      %cst_146 = arith.constant 0.000000e+00 : f32
      %254 = arith.select %250, %253, %cst_146 : f32
      %255 = arith.addf %239, %254 : f32
      %256 = vector.extract_strided_slice %143 {offsets = [112, 0], sizes = [16, 1], strides = [1, 1]} : vector<128x1xf32> to vector<16x1xf32>
      %257 = vector.shape_cast %256 : vector<16x1xf32> to vector<1x16x1xf32>
      %cst_147 = arith.constant dense<0.000000e+00> : vector<1xf32>
      %258 = vector.multi_reduction <add>, %257, %cst_147 [1, 2] : vector<1x16x1xf32> to vector<1xf32>
      %259 = vector.shape_cast %258 : vector<1xf32> to vector<1x1x1xf32>
      %260 = vector.extract %259[0, 0, 0] : f32 from vector<1x1x1xf32>
      %261 = vector.extract_strided_slice %142 {offsets = [112, 0], sizes = [16, 1], strides = [1, 1]} : vector<128x1xf32> to vector<16x1xf32>
      %262 = vector.shape_cast %261 : vector<16x1xf32> to vector<1x16x1xf32>
      %cst_148 = arith.constant dense<0.000000e+00> : vector<1xf32>
      %263 = vector.multi_reduction <add>, %262, %cst_148 [1, 2] : vector<1x16x1xf32> to vector<1xf32>
      %264 = vector.shape_cast %263 : vector<1xf32> to vector<1x1x1xf32>
      %265 = vector.extract %264[0, 0, 0] : f32 from vector<1x1x1xf32>
      %cst_149 = arith.constant 0.000000e+00 : f32
      %266 = arith.cmpf ogt, %260, %cst_149 : f32
      %cst_150 = arith.constant 0.000000e+00 : f32
      %267 = arith.cmpf ogt, %260, %cst_150 : f32
      %cst_151 = arith.constant 1.000000e+00 : f32
      %268 = arith.select %267, %260, %cst_151 : f32
      %269 = arith.divf %265, %268 : f32
      %cst_152 = arith.constant 0.000000e+00 : f32
      %270 = arith.select %266, %269, %cst_152 : f32
      %271 = arith.addf %255, %270 : f32
      %cst_153 = arith.constant -1.000000e+00 : f32
      %272 = arith.mulf %cst_153, %271 : f32
      %273 = vector.broadcast %272 : f32 to vector<8x128xf32>
      %c0_154 = arith.constant 0 : index
      %c0_155 = arith.constant 0 : index
      %274 = vector.load %arg15[%c0_154, %c0_155] : memref<8x128xf32, #tpu.memory_space<vmem>>, vector<8x128xf32>
      tpu.vector_store %arg15[%c0_154, %c0_155], %273 {strides = array<i32>} : memref<8x128xf32, #tpu.memory_space<vmem>>, vector<8x128xf32>,
    } else {
    }
    return
  }
  func.func @transform_0(%arg0: i32, %arg1: i32) -> (i32, i32) {
    %c0_i32 = arith.constant 0 : i32
    %c0_i32_0 = arith.constant 0 : i32
    return %arg0, %c0_i32 : i32, i32
  }
  func.func @transform_1(%arg0: i32, %arg1: i32) -> (i32, i32) {
    %c0_i32 = arith.constant 0 : i32
    %c0_i32_0 = arith.constant 0 : i32
    return %arg0, %c0_i32 : i32, i32
  }
  func.func @transform_2(%arg0: i32, %arg1: i32) -> (i32, i32) {
    %c0_i32 = arith.constant 0 : i32
    %c0_i32_0 = arith.constant 0 : i32
    return %arg0, %c0_i32 : i32, i32
  }
  func.func @transform_3(%arg0: i32, %arg1: i32) -> (i32, i32) {
    %c0_i32 = arith.constant 0 : i32
    %c0_i32_0 = arith.constant 0 : i32
    return %arg0, %c0_i32 : i32, i32
  }
  func.func @transform_4(%arg0: i32, %arg1: i32) -> (i32, i32) {
    %c0_i32 = arith.constant 0 : i32
    %c0_i32_0 = arith.constant 0 : i32
    return %c0_i32, %arg1 : i32, i32
  }
  func.func @transform_5(%arg0: i32, %arg1: i32) -> (i32, i32) {
    %c0_i32 = arith.constant 0 : i32
    %c0_i32_0 = arith.constant 0 : i32
    return %c0_i32, %arg1 : i32, i32
  }
  func.func @transform_6(%arg0: i32, %arg1: i32) -> (i32, i32) {
    %c0_i32 = arith.constant 0 : i32
    %c0_i32_0 = arith.constant 0 : i32
    return %c0_i32, %arg1 : i32, i32
  }
  func.func @transform_7(%arg0: i32, %arg1: i32) -> (i32, i32) {
    %c0_i32 = arith.constant 0 : i32
    %c0_i32_0 = arith.constant 0 : i32
    return %c0_i32, %arg1 : i32, i32
  }
  func.func @transform_8(%arg0: i32, %arg1: i32) -> (i32, i32) {
    %c0_i32 = arith.constant 0 : i32
    %c0_i32_0 = arith.constant 0 : i32
    return %arg0, %c0_i32 : i32, i32
  }
  func.func @transform_9(%arg0: i32, %arg1: i32) -> (i32, i32) {
    %c0_i32 = arith.constant 0 : i32
    %c0_i32_0 = arith.constant 0 : i32
    return %arg0, %c0_i32 : i32, i32
  }
  func.func @transform_10(%arg0: i32, %arg1: i32) -> (i32, i32) {
    %c0_i32 = arith.constant 0 : i32
    %c0_i32_0 = arith.constant 0 : i32
    return %c0_i32, %arg1 : i32, i32
  }
  func.func @transform_11(%arg0: i32, %arg1: i32) -> (i32, i32) {
    %c0_i32 = arith.constant 0 : i32
    %c0_i32_0 = arith.constant 0 : i32
    return %c0_i32, %arg1 : i32, i32
  }
  func.func @transform_12(%arg0: i32, %arg1: i32) -> (i32, i32) {
    %c0_i32 = arith.constant 0 : i32
    %c0_i32_0 = arith.constant 0 : i32
    return %c0_i32, %arg1 : i32, i32
  }
  func.func @transform_13(%arg0: i32, %arg1: i32) -> (i32, i32) {
    %c0_i32 = arith.constant 0 : i32
    %c0_i32_0 = arith.constant 0 : i32
    return %arg0, %c0_i32 : i32, i32
  }
}

</mosaic_0001>

<bundles_post_ra>
// kernel: tpu_custom_call.1
= control target key start
LH: loop header
LB: loop body
LE: loop exit
PB: predicated region body
PF: predicated region fallthrough
CT: control target
= control target key end

     0   :  { %s7838_s0 = inlined_call_operand.vmem [shape: bf16[256,64], index: 0, kind: input, shape index: {}]   ;;  %s7839_s1 = inlined_call_operand.vmem [shape: bf16[256,64], index: 1, kind: input, shape index: {}]   ;;  %s7840_s2 = inlined_call_operand.vmem [shape: bf16[256,64], index: 2, kind: input, shape index: {}]   ;;  %s7841_s3 = inlined_call_operand.vmem [shape: bf16[256,64], index: 3, kind: input, shape index: {}]   ;;  %s7842_s4 = inlined_call_operand.vmem [shape: bf16[64,256], index: 4, kind: input, shape index: {}]   ;;  %s7843_s5 = inlined_call_operand.vmem [shape: bf16[64,256], index: 5, kind: input, shape index: {}]   ;;  %s7844_s6 = inlined_call_operand.vmem [shape: bf16[64,256], index: 6, kind: input, shape index: {}]   ;;  %s7845_s7 = inlined_call_operand.vmem [shape: bf16[64,256], index: 7, kind: input, shape index: {}]   ;;  %s7846_s8 = inlined_call_operand.vmem [shape: f32[256,1], index: 8, kind: input, shape index: {}]   ;;  %s7847_s9 = inlined_call_operand.vmem [shape: f32[256,1], index: 9, kind: input, shape index: {}]   ;;  %s7848_s10 = inlined_call_operand.vmem [shape: f32[1,256], index: 10, kind: input, shape index: {}]   ;;  %s7849_s11 = inlined_call_operand.vmem [shape: f32[1,256], index: 11, kind: input, shape index: {}]   ;;  %s7850_s12 = inlined_call_operand.vmem [shape: f32[128,256], index: 12, kind: input, shape index: {}]   ;;  %s7851_s13 = inlined_call_operand.hbm [shape: f32[16,128], index: 13, kind: output, shape index: {}]  }
   0x1   :  { %7969 = sst [smem:[#allocation90_spill]] %s7838_s0 }
   0x2   :  { %7970 = sst [smem:[#allocation91_spill]] %s7839_s1 }
   0x3   :  { %7971 = sst [smem:[#allocation92_spill]] %s7840_s2 }
   0x4   :  { %7972 = sst [smem:[#allocation93_spill]] %s7841_s3 }
   0x5   :  { %7973 = sst [smem:[#allocation94_spill]] %s7842_s4 }
   0x6   :  { %7974 = sst [smem:[#allocation95_spill]] %s7843_s5 }
   0x7   :  { %7975 = sst [smem:[#allocation96_spill]] %s7844_s6 }
   0x8   :  { %7976 = sst [smem:[#allocation97_spill]] %s7845_s7 }
   0x9   :  { %7977 = sst [smem:[#allocation98_spill]] %s7847_s9 }
   0xa   :  { %7978 = sst [smem:[#allocation99_spill]] %s7848_s10 }
   0xb   :  { %7979 = sst [smem:[#allocation100_spill]] %s7849_s11 }
   0xc   :  { %7980 = sst [smem:[#allocation101_spill]] %s7850_s12 }
   0xd   :  { %7981 = sst [smem:[#allocation102_spill]] %s7851_s13 }
   0xe   :  { %18 = vsyncpa [#allocation15], 0 }
   0xf   :  { %20 = vsyncpa [#allocation15 + $0x1], 0  ;;  %s5285_s25 = smov 0   ;;  %s5287_s26 = smov 0  }
  0x10   :  { %s5289_s27 = smov 0   ;;  %s5291_s28 = smov 0  }
  0x11   :  { %s5293_s29 = smov 0   ;;  %s5295_s30 = smov 0  }
  0x12   :  { %s5297_s14 = smov 0   ;;  %s5299_s15 = smov 0  }
  0x13   :  { %s5301_s16 = smov 0   ;;  %s5303_s17 = smov 0  }
  0x14 LB: > { %7982 = sst [smem:[#allocation17_spill]] %s5172_s25  ;;  %s4452_s18 = sadd.s32 4294967295, %s5208_s17   ;;  %s5208_s17 = sphi %s5303_s17, %s26_s17   ;;  %s5204_s16 = sphi %s5301_s16, %s8386_s16   ;;  %s5200_s15 = sphi %s5299_s15, %s8385_s15   ;;  %s5196_s14 = sphi %s5297_s14, %s8384_s14   ;;  %s5192_s30 = sphi %s5295_s30, %s8383_s30   ;;  %s5188_s29 = sphi %s5293_s29, %s8382_s29   ;;  %s5184_s28 = sphi %s5291_s28, %s8381_s28   ;;  %s5180_s27 = sphi %s5289_s27, %s8380_s27   ;;  %s5176_s26 = sphi %s5287_s26, %s8388_s26   ;;  %s5172_s25 = sphi %s5285_s25, %s8387_s25  }
  0x15   : > { %7983 = sst [smem:[#allocation18_spill]] %s5180_s27  ;;  %s4453_s19 = sadd.s32 4294967294, %s5208_s17  }
  0x16   : > { %7984 = sst [smem:[#allocation19_spill]] %s5188_s29  ;;  %s35_s20 = sadd.s32 1, %s5200_s15 }
  0x17   : > { %7985 = sst [smem:[#allocation20_spill]] %s5200_s15  ;;  %s38_s21 = sadd.s32 1, %s5204_s16 }
  0x18   : > { %7986 = sst [smem:[#allocation21_spill]] %s5204_s16  ;;  %p36_p0 = scmp.ge.s32.totalorder %s35_s20, 2 }
  0x19   : > { %7987 = sst [smem:[#allocation22_spill]] %s5208_s17  ;;  %s149_s22 = sadd.s32 1, %s5188_s29 }
  0x1a   : > { %p156_p1 = scmp.ne.s32.totalorder %s5188_s29, %s5184_s28  ;;  %p157_p2 = scmp.eq.s32.totalorder %s5208_s17, 0 }
  0x1b   : > { %s8390_s20 = smov (%p36_p0, %s35_s20), 0  ;;  %s8392_s21 = smov (!%p36_p0, %s38_s21), %s5204_s16 }
  0x1c   : > { %7988 = sst [smem:[#allocation23_spill]] %s8390_s20  ;;  %s146_s23 = ssub.s32 %s5200_s15, %s8390_s20 }
  0x1d   : > { %p5348_p3 = por %p157_p2, %p156_p1  ;;  %p40_p4 = scmp.ge.s32.totalorder %s8392_s21, 2 }
  0x1e   : > { %p147_p5 = scmp.eq.s32.totalorder %s146_s23, 0  ;;  %s383_s13 = sadd.s32 1, %s5180_s27 }
  0x1f   : > { %p393_p6 = scmp.ne.s32.totalorder %s5180_s27, %s5176_s26  ;;  %s8394_s21 = smov (%p40_p4, %s8392_s21), 0 }
  0x20   : > { %7990 = sst [smem:[#allocation24_spill]] %s8394_s21  ;;  %s380_s10 = ssub.s32 %s5204_s16, %s8394_s21 }
  0x21   : > { %s5358_s11 = scalar_select %p147_p5, %s5188_s29, %s149_s22  }
  0x22   : > { %p394_p7 = scmp.eq.s32.totalorder %s4452_s18, 3  ;;  %p381_p8 = scmp.eq.s32.totalorder %s380_s10, 0 }
  0x23   : > { %7991 = sst [smem:[#allocation25_spill]] %s5358_s11  ;;  %p399_p9 = scmp.ne.s32.totalorder %s5176_s26, %s5172_s25 }
  0x24   : > { %p5364_p10 = por %p394_p7, %p393_p6  ;;  %p400_p11 = scmp.eq.s32.totalorder %s4453_s19, 3 }
  0x25   : > { %s5369_s20 = scalar_select %p381_p8, %s5180_s27, %s383_s13  }
  0x26   : > { %s7992_s9 = scalar_select %p5364_p10, 1, 0 }
  0x27   : > { %7994 = sst [smem:[#allocation27_spill]] %s5369_s20  ;;  %p5371_p12 = por %p400_p11, %p399_p9 }
  0x28   : > { %7993 = sst [smem:[#allocation26_spill]] %s7992_s9  ;;  %p4455_p13 = scmp.ge.s32.totalorder %s5208_s17, 4 }
  0x29   : > { %s7995_s23 = scalar_select %p5371_p12, 1, 0 }
  0x2a   : > { %416 = sbr.rel (%p4455_p13) target bundleno = 125 (0x7d), region = 16 }
  0x2b   : > { %7996 = sst [smem:[#allocation28_spill]] %s7995_s23 }
  0x2f   : > { %455 = sbr.rel (!%p5348_p3) target bundleno = 62 (0x3e), region = 36  ;;  %s457_s10 = sand.u32 (%p5348_p3), 1, %s5188_s29  }
  0x30   : > { %s4457_s18 = sshll.u32 (%p5348_p3), %s5200_s15, 2  ;;  %s4456_s22 = sshll.u32 (%p5348_p3), %s457_s10, 5 }
  0x31   : > { %s7997_s4 = sld [smem:[#allocation94_spill]] (%p5348_p3)  ;;  %s459_s19 = scalar_lea.vmem (%p5348_p3), [#allocation9], %s4456_s22 }
  0x37   : > { %s461_s13 = scalar_lea.vmem %s7997_s4, %s4457_s18 }
  0x38   : > { %v478_v0 = vld [vmem:[%s461_s13] sm:$0xf]  ;;  %v480_v1 = vld [vmem:[%s461_s13 + $0x8] sm:$0xf]  ;;  %v482_v2 = vld [vmem:[%s461_s13 + $0x10] sm:$0xf] }
  0x39   : > { %479 = vst [vmem:[%s459_s19] sm:$0xf] %v478_v0  ;;  %481 = vst [vmem:[%s459_s19 + $0x4] sm:$0xf] %v480_v1  ;;  %v484_v3 = vld [vmem:[%s461_s13 + $0x18] sm:$0xf] }
  0x3a   : > { %v486_v4 = vld [vmem:[%s461_s13 + $0x20] sm:$0xf]  ;;  %483 = vst [vmem:[%s459_s19 + $0x8] sm:$0xf] %v482_v2  ;;  %485 = vst [vmem:[%s459_s19 + $0xc] sm:$0xf] %v484_v3 }
  0x3b   : > { %487 = vst [vmem:[%s459_s19 + $0x10] sm:$0xf] %v486_v4  ;;  %v488_v5 = vld [vmem:[%s461_s13 + $0x28] sm:$0xf]  ;;  %v490_v6 = vld [vmem:[%s461_s13 + $0x30] sm:$0xf] }
  0x3c   : > { %v492_v7 = vld [vmem:[%s461_s13 + $0x38] sm:$0xf]  ;;  %489 = vst [vmem:[%s459_s19 + $0x14] sm:$0xf] %v488_v5  ;;  %491 = vst [vmem:[%s459_s19 + $0x18] sm:$0xf] %v490_v6 }
  0x3d   : > { %493 = vst [vmem:[%s459_s19 + $0x1c] sm:$0xf] %v492_v7 }
  0x3e PF: > { %533 = sbr.rel (!%p5348_p3) target bundleno = 77 (0x4d), region = 77  ;;  %s535_s16 = sand.u32 (%p5348_p3), 1, %s5188_s29  }
  0x3f   : > { %s4459_s21 = sshll.u32 (%p5348_p3), %s5200_s15, 2  ;;  %s4458_s10 = sshll.u32 (%p5348_p3), %s535_s16, 5 }
  0x40   : > { %s7998_s5 = sld [smem:[#allocation95_spill]] (%p5348_p3)  ;;  %s537_s11 = scalar_lea.vmem (%p5348_p3), [#allocation10], %s4458_s10 }
  0x46   : > { %s539_s4 = scalar_lea.vmem %s7998_s5, %s4459_s21 }
  0x47   : > { %v556_v8 = vld [vmem:[%s539_s4] sm:$0xf]  ;;  %v558_v9 = vld [vmem:[%s539_s4 + $0x8] sm:$0xf]  ;;  %v560_v10 = vld [vmem:[%s539_s4 + $0x10] sm:$0xf] }
  0x48   : > { %557 = vst [vmem:[%s537_s11] sm:$0xf] %v556_v8  ;;  %559 = vst [vmem:[%s537_s11 + $0x4] sm:$0xf] %v558_v9  ;;  %v562_v11 = vld [vmem:[%s539_s4 + $0x18] sm:$0xf] }
  0x49   : > { %v564_v12 = vld [vmem:[%s539_s4 + $0x20] sm:$0xf]  ;;  %561 = vst [vmem:[%s537_s11 + $0x8] sm:$0xf] %v560_v10  ;;  %563 = vst [vmem:[%s537_s11 + $0xc] sm:$0xf] %v562_v11 }
  0x4a   : > { %565 = vst [vmem:[%s537_s11 + $0x10] sm:$0xf] %v564_v12  ;;  %v566_v13 = vld [vmem:[%s539_s4 + $0x28] sm:$0xf]  ;;  %v568_v14 = vld [vmem:[%s539_s4 + $0x30] sm:$0xf] }
  0x4b   : > { %v570_v15 = vld [vmem:[%s539_s4 + $0x38] sm:$0xf]  ;;  %567 = vst [vmem:[%s537_s11 + $0x14] sm:$0xf] %v566_v13  ;;  %569 = vst [vmem:[%s537_s11 + $0x18] sm:$0xf] %v568_v14 }
  0x4c   : > { %571 = vst [vmem:[%s537_s11 + $0x1c] sm:$0xf] %v570_v15 }
  0x4d PF: > { %611 = sbr.rel (!%p5348_p3) target bundleno = 92 (0x5c), region = 118  ;;  %s613_s13 = sand.u32 (%p5348_p3), 1, %s5188_s29  }
  0x4e   : > { %s4461_s19 = sshll.u32 (%p5348_p3), %s5200_s15, 2  ;;  %s4460_s16 = sshll.u32 (%p5348_p3), %s613_s13, 5 }
  0x4f   : > { %s7999_s6 = sld [smem:[#allocation96_spill]] (%p5348_p3)  ;;  %s615_s22 = scalar_lea.vmem (%p5348_p3), [#allocation11], %s4460_s16 }
  0x55   : > { %s617_s18 = scalar_lea.vmem %s7999_s6, %s4461_s19 }
  0x56   : > { %v634_v16 = vld [vmem:[%s617_s18] sm:$0xf]  ;;  %v636_v17 = vld [vmem:[%s617_s18 + $0x8] sm:$0xf]  ;;  %v638_v18 = vld [vmem:[%s617_s18 + $0x10] sm:$0xf] }
  0x57   : > { %635 = vst [vmem:[%s615_s22] sm:$0xf] %v634_v16  ;;  %637 = vst [vmem:[%s615_s22 + $0x4] sm:$0xf] %v636_v17  ;;  %v640_v19 = vld [vmem:[%s617_s18 + $0x18] sm:$0xf] }
  0x58   : > { %v642_v20 = vld [vmem:[%s617_s18 + $0x20] sm:$0xf]  ;;  %639 = vst [vmem:[%s615_s22 + $0x8] sm:$0xf] %v638_v18  ;;  %641 = vst [vmem:[%s615_s22 + $0xc] sm:$0xf] %v640_v19 }
  0x59   : > { %643 = vst [vmem:[%s615_s22 + $0x10] sm:$0xf] %v642_v20  ;;  %v644_v21 = vld [vmem:[%s617_s18 + $0x28] sm:$0xf]  ;;  %v646_v22 = vld [vmem:[%s617_s18 + $0x30] sm:$0xf] }
  0x5a   : > { %v648_v23 = vld [vmem:[%s617_s18 + $0x38] sm:$0xf]  ;;  %645 = vst [vmem:[%s615_s22 + $0x14] sm:$0xf] %v644_v21  ;;  %647 = vst [vmem:[%s615_s22 + $0x18] sm:$0xf] %v646_v22 }
  0x5b   : > { %649 = vst [vmem:[%s615_s22 + $0x1c] sm:$0xf] %v648_v23 }
  0x5c PF: > { %689 = sbr.rel (!%p5348_p3) target bundleno = 107 (0x6b), region = 159  ;;  %s691_s4 = sand.u32 (%p5348_p3), 1, %s5188_s29  }
  0x5d   : > { %s4463_s11 = sshll.u32 (%p5348_p3), %s5200_s15, 2  ;;  %s4462_s13 = sshll.u32 (%p5348_p3), %s691_s4, 5 }
  0x5e   : > { %s8000_s7 = sld [smem:[#allocation97_spill]] (%p5348_p3)  ;;  %s693_s10 = scalar_lea.vmem (%p5348_p3), [#allocation12], %s4462_s13 }
  0x64   : > { %s695_s21 = scalar_lea.vmem %s8000_s7, %s4463_s11 }
  0x65   : > { %v712_v24 = vld [vmem:[%s695_s21] sm:$0xf]  ;;  %v714_v25 = vld [vmem:[%s695_s21 + $0x8] sm:$0xf]  ;;  %v716_v26 = vld [vmem:[%s695_s21 + $0x10] sm:$0xf] }
  0x66   : > { %713 = vst [vmem:[%s693_s10] sm:$0xf] %v712_v24  ;;  %715 = vst [vmem:[%s693_s10 + $0x4] sm:$0xf] %v714_v25  ;;  %v718_v27 = vld [vmem:[%s695_s21 + $0x18] sm:$0xf] }
  0x67   : > { %v720_v28 = vld [vmem:[%s695_s21 + $0x20] sm:$0xf]  ;;  %717 = vst [vmem:[%s693_s10 + $0x8] sm:$0xf] %v716_v26  ;;  %719 = vst [vmem:[%s693_s10 + $0xc] sm:$0xf] %v718_v27 }
  0x68   : > { %721 = vst [vmem:[%s693_s10 + $0x10] sm:$0xf] %v720_v28  ;;  %v722_v29 = vld [vmem:[%s695_s21 + $0x28] sm:$0xf]  ;;  %v724_v30 = vld [vmem:[%s695_s21 + $0x30] sm:$0xf] }
  0x69   : > { %v726_v31 = vld [vmem:[%s695_s21 + $0x38] sm:$0xf]  ;;  %723 = vst [vmem:[%s693_s10 + $0x14] sm:$0xf] %v722_v29  ;;  %725 = vst [vmem:[%s693_s10 + $0x18] sm:$0xf] %v724_v30 }
  0x6a   : > { %727 = vst [vmem:[%s693_s10 + $0x1c] sm:$0xf] %v726_v31 }
  0x6b PF: > { %797 = sbr.rel (!%p5348_p3) target bundleno = 125 (0x7d), region = 216  ;;  %s799_s18 = sand.u32 (%p5348_p3), 1, %s5188_s29  }
  0x6c   : > { %s4465_s22 = sshll.u32 (%p5348_p3), %s5200_s15, 3  ;;  %s4464_s4 = sshll.u32 (%p5348_p3), %s799_s18, 7 }
  0x6d   : > { %s8001_s12 = sld [smem:[#allocation101_spill]] (%p5348_p3)  ;;  %s801_s24 = scalar_lea.vmem (%p5348_p3), [#allocation13], %s4464_s4 }
  0x73   : > { %s5411_s19 = scalar_lea.vmem %s8001_s12, %s4465_s22 }
  0x74   : > { %v862_v32 = vld [vmem:[%s5411_s19] sm:$0xff]  ;;  %v864_v33 = vld [vmem:[%s5411_s19 + $0x10] sm:$0xff] }
  0x75   : > { %v866_v34 = vld [vmem:[%s5411_s19 + $0x20] sm:$0xff]  ;;  %863 = vst [vmem:[%s801_s24] sm:$0xff] %v862_v32  ;;  %865 = vst [vmem:[%s801_s24 + $0x8] sm:$0xff] %v864_v33  ;;  %v868_v35 = vld [vmem:[%s5411_s19 + $0x30] sm:$0xff] }
  0x76   : > { %867 = vst [vmem:[%s801_s24 + $0x10] sm:$0xff] %v866_v34  ;;  %v870_v36 = vld [vmem:[%s5411_s19 + $0x40] sm:$0xff]  ;;  %v872_v37 = vld [vmem:[%s5411_s19 + $0x50] sm:$0xff]  ;;  %869 = vst [vmem:[%s801_s24 + $0x18] sm:$0xff] %v868_v35 }
  0x77   : > { %871 = vst [vmem:[%s801_s24 + $0x20] sm:$0xff] %v870_v36  ;;  %873 = vst [vmem:[%s801_s24 + $0x28] sm:$0xff] %v872_v37  ;;  %v874_v38 = vld [vmem:[%s5411_s19 + $0x60] sm:$0xff]  ;;  %v876_v39 = vld [vmem:[%s5411_s19 + $0x70] sm:$0xff] }
  0x78   : > { %v878_v40 = vld [vmem:[%s5411_s19 + $0x80] sm:$0xff]  ;;  %875 = vst [vmem:[%s801_s24 + $0x30] sm:$0xff] %v874_v38  ;;  %877 = vst [vmem:[%s801_s24 + $0x38] sm:$0xff] %v876_v39  ;;  %v880_v41 = vld [vmem:[%s5411_s19 + $0x90] sm:$0xff] }
  0x79   : > { %879 = vst [vmem:[%s801_s24 + $0x40] sm:$0xff] %v878_v40  ;;  %v882_v42 = vld [vmem:[%s5411_s19 + $0xa0] sm:$0xff]  ;;  %v884_v43 = vld [vmem:[%s5411_s19 + $0xb0] sm:$0xff]  ;;  %881 = vst [vmem:[%s801_s24 + $0x48] sm:$0xff] %v880_v41 }
  0x7a   : > { %883 = vst [vmem:[%s801_s24 + $0x50] sm:$0xff] %v882_v42  ;;  %885 = vst [vmem:[%s801_s24 + $0x58] sm:$0xff] %v884_v43  ;;  %v886_v44 = vld [vmem:[%s5411_s19 + $0xc0] sm:$0xff]  ;;  %v888_v45 = vld [vmem:[%s5411_s19 + $0xd0] sm:$0xff] }
  0x7b   : > { %v890_v46 = vld [vmem:[%s5411_s19 + $0xe0] sm:$0xff]  ;;  %887 = vst [vmem:[%s801_s24 + $0x60] sm:$0xff] %v886_v44  ;;  %889 = vst [vmem:[%s801_s24 + $0x68] sm:$0xff] %v888_v45  ;;  %v892_v47 = vld [vmem:[%s5411_s19 + $0xf0] sm:$0xff] }
  0x7c   : > { %891 = vst [vmem:[%s801_s24 + $0x70] sm:$0xff] %v890_v46  ;;  %893 = vst [vmem:[%s801_s24 + $0x78] sm:$0xff] %v892_v47 }
  0x7d PF: > { %p4466_p0 = scmp.ge.s32.totalorder %s5208_s17, 1  ;;  %p898_p1 = scmp.lt.s32.totalorder %s5208_s17, 5 }
  0x7f   : > { %p899_p2 = pnand %p4466_p0, %p898_p1 }
  0x81   : > { %902 = sbr.rel (%p899_p2) target bundleno = 1832 (0x728), region = 254 }
  0x86   : > { %s905_s16 = sand.u32 1, %s5184_s28   ;;  %s7856_s21 = sand.u32 1, %s5176_s26  }
  0x87   : > { %s4467_s10 = sshll.u32 %s905_s16, 5  ;;  %s4471_s18 = sshll.u32 %s905_s16, 7 }
  0x88   : > { %s5435_s22 = sshll.u32 %s7856_s21, 3  ;;  %s4473_s4 = sshll.u32 %s5196_s14, 4 }
  0x89   : > { %p1029_p3 = scmp.lt.s32.totalorder %s4473_s4, 31  ;;  %p1064_p4 = scmp.lt.s32.totalorder %s5192_s30, 1 }
  0x8a   : > { %s8002_s0 = sld [smem:[#allocation90_spill]]  ;;  %s5480_s20 = scalar_lea.vmem [#allocation9], %s4467_s10 }
  0x8b   : > { %s8396_s4 = smov (!%p1029_p3, %s4473_s4), 31  ;;  %s8003_s1 = sld [smem:[#allocation91_spill]] }
  0x8c   : > { %s5440_s11 = scalar_select %p1064_p4, %s5192_s30, 1 }
  0x8d   : > { %s4474_s13 = sshll.u32 %s8396_s4, 2  ;;  %s4482_s19 = sshll.u32 %s8396_s4, 3 }
  0x8e   : > { %s8004_s2 = sld [smem:[#allocation92_spill]]  ;;  %s5465_s5 = scalar_lea.vmem %s7846_s8, %s4482_s19 }
  0x8f   : > { %s8005_s3 = sld [smem:[#allocation93_spill]]  ;;  %s5484_s23 = scalar_lea.vmem [#allocation11], %s4467_s10 }
  0x90   : > { %s5445_s28 = scalar_lea.vmem %s8002_s0, %s4474_s13  ;;  %s8006_s6 = sld [smem:[#allocation98_spill]] }
  0x91   : > { %s5450_s21 = scalar_lea.vmem %s8003_s1, %s4474_s13  ;;  %s8007_s7 = sld [smem:[#allocation99_spill]] }
  0x92   : > { %s8008_s9 = sld [smem:[#allocation100_spill]]  ;;  %s5486_s4 = scalar_lea.vmem [#allocation12], %s4467_s10 }
  0x93   : > { %s1027_s0 = scalar_lea.vmem [#allocation14], %s5435_s22  ;;  %p4485_p5 = scmp.ne.s32.totalorder %s5192_s30, 0 }
  0x94   : > { %s5455_s15 = scalar_lea.vmem %s8004_s2, %s4474_s13 }
  0x95   : > { %s5460_s27 = scalar_lea.vmem %s8005_s3, %s4474_s13  ;;  %s5482_s13 = scalar_lea.vmem [#allocation10], %s4467_s10 }
  0x96   : > { %s5470_s16 = scalar_lea.vmem %s8006_s6, %s4482_s19  ;;  %s5488_s3 = scalar_lea.vmem [#allocation13], %s4471_s18 }
  0x97   : > { %s1066_s12 = scalar_lea.vmem %s8007_s7, %s5440_s11  ;;  %1075 = sbr.rel (%p4485_p5) target bundleno = 213 (0xd5), region = 278 }
  0x98   : > { %s1069_s29 = scalar_lea.vmem %s8008_s9, %s5440_s11 }
  0x9c   : > { %vm1076_vm0 = vcmask 7168   ;;  %v5210_v48 = vmov 0.0   ;;  %v5211_v49 = vmov -inf  }
  0x9d   : > { %1077 = vst.msk [vmem:[#allocation2] sm:$0xff] %vm1076_vm0, %v5210_v48  ;;  %1078 = vst.msk [vmem:[#allocation2 + $0x8] sm:$0xff] %vm1076_vm0, %v5210_v48 }
  0x9e   : > { %1079 = vst.msk [vmem:[#allocation2 + $0x10] sm:$0xff] %vm1076_vm0, %v5210_v48  ;;  %1080 = vst.msk [vmem:[#allocation2 + $0x18] sm:$0xff] %vm1076_vm0, %v5210_v48 }
  0x9f   : > { %1081 = vst.msk [vmem:[#allocation2 + $0x20] sm:$0xff] %vm1076_vm0, %v5210_v48  ;;  %1082 = vst.msk [vmem:[#allocation2 + $0x28] sm:$0xff] %vm1076_vm0, %v5210_v48 }
  0xa0   : > { %1083 = vst.msk [vmem:[#allocation2 + $0x30] sm:$0xff] %vm1076_vm0, %v5210_v48  ;;  %1084 = vst.msk [vmem:[#allocation2 + $0x38] sm:$0xff] %vm1076_vm0, %v5210_v48 }
  0xa1   : > { %1085 = vst.msk [vmem:[#allocation2 + $0x40] sm:$0xff] %vm1076_vm0, %v5210_v48  ;;  %1086 = vst.msk [vmem:[#allocation2 + $0x48] sm:$0xff] %vm1076_vm0, %v5210_v48 }
  0xa2   : > { %1087 = vst.msk [vmem:[#allocation2 + $0x50] sm:$0xff] %vm1076_vm0, %v5210_v48  ;;  %1088 = vst.msk [vmem:[#allocation2 + $0x58] sm:$0xff] %vm1076_vm0, %v5210_v48 }
  0xa3   : > { %1089 = vst.msk [vmem:[#allocation2 + $0x60] sm:$0xff] %vm1076_vm0, %v5210_v48  ;;  %1090 = vst.msk [vmem:[#allocation2 + $0x68] sm:$0xff] %vm1076_vm0, %v5210_v48 }
  0xa4   : > { %1091 = vst.msk [vmem:[#allocation2 + $0x70] sm:$0xff] %vm1076_vm0, %v5210_v48  ;;  %1092 = vst.msk [vmem:[#allocation2 + $0x78] sm:$0xff] %vm1076_vm0, %v5210_v48 }
  0xa5   : > { %1093 = vst.msk [vmem:[#allocation3] sm:$0xff] %vm1076_vm0, %v5210_v48  ;;  %1094 = vst.msk [vmem:[#allocation3 + $0x8] sm:$0xff] %vm1076_vm0, %v5210_v48 }
  0xa6   : > { %1095 = vst.msk [vmem:[#allocation3 + $0x10] sm:$0xff] %vm1076_vm0, %v5210_v48  ;;  %1096 = vst.msk [vmem:[#allocation3 + $0x18] sm:$0xff] %vm1076_vm0, %v5210_v48 }
  0xa7   : > { %1097 = vst.msk [vmem:[#allocation3 + $0x20] sm:$0xff] %vm1076_vm0, %v5210_v48  ;;  %1098 = vst.msk [vmem:[#allocation3 + $0x28] sm:$0xff] %vm1076_vm0, %v5210_v48 }
  0xa8   : > { %1099 = vst.msk [vmem:[#allocation3 + $0x30] sm:$0xff] %vm1076_vm0, %v5210_v48  ;;  %1100 = vst.msk [vmem:[#allocation3 + $0x38] sm:$0xff] %vm1076_vm0, %v5210_v48 }
  0xa9   : > { %1101 = vst.msk [vmem:[#allocation3 + $0x40] sm:$0xff] %vm1076_vm0, %v5210_v48  ;;  %1102 = vst.msk [vmem:[#allocation3 + $0x48] sm:$0xff] %vm1076_vm0, %v5210_v48 }
  0xaa   : > { %1103 = vst.msk [vmem:[#allocation3 + $0x50] sm:$0xff] %vm1076_vm0, %v5210_v48  ;;  %1104 = vst.msk [vmem:[#allocation3 + $0x58] sm:$0xff] %vm1076_vm0, %v5210_v48 }
  0xab   : > { %1105 = vst.msk [vmem:[#allocation3 + $0x60] sm:$0xff] %vm1076_vm0, %v5210_v48  ;;  %1106 = vst.msk [vmem:[#allocation3 + $0x68] sm:$0xff] %vm1076_vm0, %v5210_v48 }
  0xac   : > { %1107 = vst.msk [vmem:[#allocation3 + $0x70] sm:$0xff] %vm1076_vm0, %v5210_v48  ;;  %1108 = vst.msk [vmem:[#allocation3 + $0x78] sm:$0xff] %vm1076_vm0, %v5210_v48 }
  0xad   : > { %1109 = vst.msk [vmem:[#allocation4] sm:$0xff] %vm1076_vm0, %v5210_v48  ;;  %1110 = vst.msk [vmem:[#allocation4 + $0x8] sm:$0xff] %vm1076_vm0, %v5210_v48 }
  0xae   : > { %1111 = vst.msk [vmem:[#allocation4 + $0x10] sm:$0xff] %vm1076_vm0, %v5210_v48  ;;  %1112 = vst.msk [vmem:[#allocation4 + $0x18] sm:$0xff] %vm1076_vm0, %v5210_v48 }
  0xaf   : > { %1113 = vst.msk [vmem:[#allocation4 + $0x20] sm:$0xff] %vm1076_vm0, %v5210_v48  ;;  %1114 = vst.msk [vmem:[#allocation4 + $0x28] sm:$0xff] %vm1076_vm0, %v5210_v48 }
  0xb0   : > { %1115 = vst.msk [vmem:[#allocation4 + $0x30] sm:$0xff] %vm1076_vm0, %v5210_v48  ;;  %1116 = vst.msk [vmem:[#allocation4 + $0x38] sm:$0xff] %vm1076_vm0, %v5210_v48 }
  0xb1   : > { %1117 = vst.msk [vmem:[#allocation4 + $0x40] sm:$0xff] %vm1076_vm0, %v5210_v48  ;;  %1118 = vst.msk [vmem:[#allocation4 + $0x48] sm:$0xff] %vm1076_vm0, %v5210_v48 }
  0xb2   : > { %1119 = vst.msk [vmem:[#allocation4 + $0x50] sm:$0xff] %vm1076_vm0, %v5210_v48  ;;  %1120 = vst.msk [vmem:[#allocation4 + $0x58] sm:$0xff] %vm1076_vm0, %v5210_v48 }
  0xb3   : > { %1121 = vst.msk [vmem:[#allocation4 + $0x60] sm:$0xff] %vm1076_vm0, %v5210_v48  ;;  %1122 = vst.msk [vmem:[#allocation4 + $0x68] sm:$0xff] %vm1076_vm0, %v5210_v48 }
  0xb4   : > { %1123 = vst.msk [vmem:[#allocation4 + $0x70] sm:$0xff] %vm1076_vm0, %v5210_v48  ;;  %1124 = vst.msk [vmem:[#allocation4 + $0x78] sm:$0xff] %vm1076_vm0, %v5210_v48 }
  0xb5   : > { %1125 = vst.msk [vmem:[#allocation6] sm:$0xff] %vm1076_vm0, %v5210_v48  ;;  %1126 = vst.msk [vmem:[#allocation6 + $0x8] sm:$0xff] %vm1076_vm0, %v5210_v48 }
  0xb6   : > { %1127 = vst.msk [vmem:[#allocation6 + $0x10] sm:$0xff] %vm1076_vm0, %v5210_v48  ;;  %1128 = vst.msk [vmem:[#allocation6 + $0x18] sm:$0xff] %vm1076_vm0, %v5210_v48 }
  0xb7   : > { %1129 = vst.msk [vmem:[#allocation6 + $0x20] sm:$0xff] %vm1076_vm0, %v5210_v48  ;;  %1130 = vst.msk [vmem:[#allocation6 + $0x28] sm:$0xff] %vm1076_vm0, %v5210_v48 }
  0xb8   : > { %1131 = vst.msk [vmem:[#allocation6 + $0x30] sm:$0xff] %vm1076_vm0, %v5210_v48  ;;  %1132 = vst.msk [vmem:[#allocation6 + $0x38] sm:$0xff] %vm1076_vm0, %v5210_v48 }
  0xb9   : > { %1133 = vst.msk [vmem:[#allocation6 + $0x40] sm:$0xff] %vm1076_vm0, %v5210_v48  ;;  %1134 = vst.msk [vmem:[#allocation6 + $0x48] sm:$0xff] %vm1076_vm0, %v5210_v48 }
  0xba   : > { %1135 = vst.msk [vmem:[#allocation6 + $0x50] sm:$0xff] %vm1076_vm0, %v5210_v48  ;;  %1136 = vst.msk [vmem:[#allocation6 + $0x58] sm:$0xff] %vm1076_vm0, %v5210_v48 }
  0xbb   : > { %1137 = vst.msk [vmem:[#allocation6 + $0x60] sm:$0xff] %vm1076_vm0, %v5210_v48  ;;  %1138 = vst.msk [vmem:[#allocation6 + $0x68] sm:$0xff] %vm1076_vm0, %v5210_v48 }
  0xbc   : > { %1139 = vst.msk [vmem:[#allocation6 + $0x70] sm:$0xff] %vm1076_vm0, %v5210_v48  ;;  %1140 = vst.msk [vmem:[#allocation6 + $0x78] sm:$0xff] %vm1076_vm0, %v5210_v48 }
  0xbd   : > { %1141 = vst.msk [vmem:[#allocation8] sm:$0xff] %vm1076_vm0, %v5210_v48  ;;  %1142 = vst.msk [vmem:[#allocation8 + $0x8] sm:$0xff] %vm1076_vm0, %v5210_v48 }
  0xbe   : > { %1143 = vst.msk [vmem:[#allocation8 + $0x10] sm:$0xff] %vm1076_vm0, %v5210_v48  ;;  %1144 = vst.msk [vmem:[#allocation8 + $0x18] sm:$0xff] %vm1076_vm0, %v5210_v48 }
  0xbf   : > { %1145 = vst.msk [vmem:[#allocation8 + $0x20] sm:$0xff] %vm1076_vm0, %v5210_v48  ;;  %1146 = vst.msk [vmem:[#allocation8 + $0x28] sm:$0xff] %vm1076_vm0, %v5210_v48 }
  0xc0   : > { %1147 = vst.msk [vmem:[#allocation8 + $0x30] sm:$0xff] %vm1076_vm0, %v5210_v48  ;;  %1148 = vst.msk [vmem:[#allocation8 + $0x38] sm:$0xff] %vm1076_vm0, %v5210_v48 }
  0xc1   : > { %1149 = vst.msk [vmem:[#allocation8 + $0x40] sm:$0xff] %vm1076_vm0, %v5210_v48  ;;  %1150 = vst.msk [vmem:[#allocation8 + $0x48] sm:$0xff] %vm1076_vm0, %v5210_v48 }
  0xc2   : > { %1151 = vst.msk [vmem:[#allocation8 + $0x50] sm:$0xff] %vm1076_vm0, %v5210_v48  ;;  %1152 = vst.msk [vmem:[#allocation8 + $0x58] sm:$0xff] %vm1076_vm0, %v5210_v48 }
  0xc3   : > { %1153 = vst.msk [vmem:[#allocation8 + $0x60] sm:$0xff] %vm1076_vm0, %v5210_v48  ;;  %1154 = vst.msk [vmem:[#allocation8 + $0x68] sm:$0xff] %vm1076_vm0, %v5210_v48 }
  0xc4   : > { %1155 = vst.msk [vmem:[#allocation8 + $0x70] sm:$0xff] %vm1076_vm0, %v5210_v48  ;;  %1156 = vst.msk [vmem:[#allocation8 + $0x78] sm:$0xff] %vm1076_vm0, %v5210_v48 }
  0xc5   : > { %1157 = vst.msk [vmem:[#allocation5] sm:$0xff] %vm1076_vm0, %v5211_v49  ;;  %1158 = vst.msk [vmem:[#allocation5 + $0x8] sm:$0xff] %vm1076_vm0, %v5211_v49 }
  0xc6   : > { %1159 = vst.msk [vmem:[#allocation5 + $0x10] sm:$0xff] %vm1076_vm0, %v5211_v49  ;;  %1160 = vst.msk [vmem:[#allocation5 + $0x18] sm:$0xff] %vm1076_vm0, %v5211_v49 }
  0xc7   : > { %1161 = vst.msk [vmem:[#allocation5 + $0x20] sm:$0xff] %vm1076_vm0, %v5211_v49  ;;  %1162 = vst.msk [vmem:[#allocation5 + $0x28] sm:$0xff] %vm1076_vm0, %v5211_v49 }
  0xc8   : > { %1163 = vst.msk [vmem:[#allocation5 + $0x30] sm:$0xff] %vm1076_vm0, %v5211_v49  ;;  %1164 = vst.msk [vmem:[#allocation5 + $0x38] sm:$0xff] %vm1076_vm0, %v5211_v49 }
  0xc9   : > { %1165 = vst.msk [vmem:[#allocation5 + $0x40] sm:$0xff] %vm1076_vm0, %v5211_v49  ;;  %1166 = vst.msk [vmem:[#allocation5 + $0x48] sm:$0xff] %vm1076_vm0, %v5211_v49 }
  0xca   : > { %1167 = vst.msk [vmem:[#allocation5 + $0x50] sm:$0xff] %vm1076_vm0, %v5211_v49  ;;  %1168 = vst.msk [vmem:[#allocation5 + $0x58] sm:$0xff] %vm1076_vm0, %v5211_v49 }
  0xcb   : > { %1169 = vst.msk [vmem:[#allocation5 + $0x60] sm:$0xff] %vm1076_vm0, %v5211_v49  ;;  %1170 = vst.msk [vmem:[#allocation5 + $0x68] sm:$0xff] %vm1076_vm0, %v5211_v49 }
  0xcc   : > { %1171 = vst.msk [vmem:[#allocation5 + $0x70] sm:$0xff] %vm1076_vm0, %v5211_v49  ;;  %1172 = vst.msk [vmem:[#allocation5 + $0x78] sm:$0xff] %vm1076_vm0, %v5211_v49 }
  0xcd   : > { %1173 = vst.msk [vmem:[#allocation7] sm:$0xff] %vm1076_vm0, %v5211_v49  ;;  %1174 = vst.msk [vmem:[#allocation7 + $0x8] sm:$0xff] %vm1076_vm0, %v5211_v49 }
  0xce   : > { %1175 = vst.msk [vmem:[#allocation7 + $0x10] sm:$0xff] %vm1076_vm0, %v5211_v49  ;;  %1176 = vst.msk [vmem:[#allocation7 + $0x18] sm:$0xff] %vm1076_vm0, %v5211_v49 }
  0xcf   : > { %1177 = vst.msk [vmem:[#allocation7 + $0x20] sm:$0xff] %vm1076_vm0, %v5211_v49  ;;  %1178 = vst.msk [vmem:[#allocation7 + $0x28] sm:$0xff] %vm1076_vm0, %v5211_v49 }
  0xd0   : > { %1179 = vst.msk [vmem:[#allocation7 + $0x30] sm:$0xff] %vm1076_vm0, %v5211_v49  ;;  %1180 = vst.msk [vmem:[#allocation7 + $0x38] sm:$0xff] %vm1076_vm0, %v5211_v49 }
  0xd1   : > { %1181 = vst.msk [vmem:[#allocation7 + $0x40] sm:$0xff] %vm1076_vm0, %v5211_v49  ;;  %1182 = vst.msk [vmem:[#allocation7 + $0x48] sm:$0xff] %vm1076_vm0, %v5211_v49 }
  0xd2   : > { %1183 = vst.msk [vmem:[#allocation7 + $0x50] sm:$0xff] %vm1076_vm0, %v5211_v49  ;;  %1184 = vst.msk [vmem:[#allocation7 + $0x58] sm:$0xff] %vm1076_vm0, %v5211_v49 }
  0xd3   : > { %1185 = vst.msk [vmem:[#allocation7 + $0x60] sm:$0xff] %vm1076_vm0, %v5211_v49  ;;  %1186 = vst.msk [vmem:[#allocation7 + $0x68] sm:$0xff] %vm1076_vm0, %v5211_v49 }
  0xd4   : > { %1187 = vst.msk [vmem:[#allocation7 + $0x70] sm:$0xff] %vm1076_vm0, %v5211_v49  ;;  %1188 = vst.msk [vmem:[#allocation7 + $0x78] sm:$0xff] %vm1076_vm0, %v5211_v49 }
  0xd5 PF: > { %v2060_v50 = vld [vmem:[%s5465_s5 + $0x10] sm:$0xff]  ;;  %v2058_v51 = vld [vmem:[%s5465_s5] sm:$0xff]  ;;  %v5212_v52 = vmov 0   ;;  %v4860_v53 = vld [vmem:[%s5480_s20 + $0x18] sm:$0xff]   ;;  %vm1277_vm1 = vcmask 523264   ;;  %s4567_s1 = sshll.u32 %s5192_s30, 7 }
  0xd6   : > { %4859 = vset.pattern.permute.xlu1 %v5212_v52  ;;  %4858 = vset.pattern.permute.xlu0 %v5212_v52  ;;  %v4861_v54 = vld [vmem:[%s5482_s13 + $0x18] sm:$0xff]   ;;  %v2059_v56 = vld [vmem:[%s5465_s5 + $0x8] sm:$0xff]  ;;  %v4862_v57 = vld [vmem:[%s5480_s20 + $0x10] sm:$0xff]   ;;  %s4566_s2 = sshll.u32 %s5196_s14, 7  ;;  %p4570_p6 = scmp.ne.s32.totalorder %s5192_s30, 1 }
  0xd7   : > { %2160 = vperm.xlu1 %4859, %v2060_v50   ;;  %2150 = vperm.xlu0 %4858, %v2058_v51   ;;  %v2061_v55 = vld [vmem:[%s5465_s5 + $0x18] sm:$0xff]  ;;  %v4863_v58 = vld [vmem:[%s5482_s13 + $0x10] sm:$0xff]   ;;  %v2063_v59 = vld [vmem:[%s5465_s5 + $0x28] sm:$0xff] }
  0xd8   : > { %4623 = vmatprep.subr.bf16.mxu0 %v4860_v53  ;;  %4647 = vmatprep.subr.bf16.mxu1 %v4861_v54  ;;  %v2062_v60 = vld [vmem:[%s5465_s5 + $0x20] sm:$0xff]  ;;  %v4864_v61 = vld [vmem:[%s5480_s20 + $0x8] sm:$0xff]   ;;  %v2065_v0 = vld [vmem:[%s5465_s5 + $0x38] sm:$0xff] }
  0xd9   : > { %4624 = vmatpush3.bf16.msra.mxu0 %v4860_v53  ;;  %4648 = vmatpush3.bf16.msra.mxu1 %v4861_v54  ;;  %v4865_v62 = vld [vmem:[%s5482_s13 + $0x8] sm:$0xff]   ;;  %v4866_v63 = vld [vmem:[%s5480_s20] sm:$0xff]   ;;  %v2064_v1 = vld [vmem:[%s5465_s5 + $0x30] sm:$0xff] }
  0xda   : > { %4625 = vmatprep.subr.bf16.mxu0 %v4862_v57  ;;  %4649 = vmatprep.subr.bf16.mxu1 %v4863_v58  ;;  %v4867_v2 = vld [vmem:[%s5482_s13] sm:$0xff]   ;;  %v2067_v5 = vld [vmem:[%s5465_s5 + $0x48] sm:$0xff]  ;;  %v2069_v9 = vld [vmem:[%s5465_s5 + $0x58] sm:$0xff] }
  0xdb   : > { %2165 = vperm.xlu1 %4859, %v2061_v55   ;;  %2155 = vperm.xlu0 %4858, %v2059_v56   ;;  %v4868_v3 = vld [vmem:[%s5445_s28] sm:$0xff]   ;;  %v4870_v7 = vld [vmem:[%s5445_s28 + $0x8] sm:$0xff]   ;;  %v4872_v10 = vld [vmem:[%s5445_s28 + $0x10] sm:$0xff]  }
  0xdc   : > { %v4869_v4 = vld [vmem:[%s5450_s21] sm:$0xff]   ;;  %4631 = vmatprep.mubr.msk.bf16.mxu0 %vm1277_vm1, %v4868_v3  ;;  %v4871_v8 = vld [vmem:[%s5450_s21 + $0x8] sm:$0xff]   ;;  %v4873_v11 = vld [vmem:[%s5450_s21 + $0x10] sm:$0xff]  }
  0xdd   : > { %4626 = vmatpush3.bf16.msra.mxu0 %v4862_v57  ;;  %4650 = vmatpush3.bf16.msra.mxu1 %v4863_v58  ;;  %v2066_v6 = vld [vmem:[%s5465_s5 + $0x40] sm:$0xff]  ;;  %v2068_v12 = vld [vmem:[%s5465_s5 + $0x50] sm:$0xff]  ;;  %v2071_v13 = vld [vmem:[%s5465_s5 + $0x68] sm:$0xff] }
  0xde   : > { %4627 = vmatprep.subr.bf16.mxu0 %v4864_v61  ;;  %4651 = vmatprep.subr.bf16.mxu1 %v4865_v62  ;;  %v2070_v14 = vld [vmem:[%s5465_s5 + $0x60] sm:$0xff]  ;;  %v4874_v15 = vld [vmem:[%s5445_s28 + $0x18] sm:$0xff]   ;;  %v2072_v19 = vld [vmem:[%s5465_s5 + $0x70] sm:$0xff] }
  0xdf   : > { %2175 = vperm.xlu1 %4859, %v2063_v59   ;;  %2170 = vperm.xlu0 %4858, %v2062_v60   ;;  %v4875_v16 = vld [vmem:[%s5450_s21 + $0x18] sm:$0xff]   ;;  %v4876_v17 = vld [vmem:[%s5445_s28 + $0x20] sm:$0xff]   ;;  %v2075_v23 = vld [vmem:[%s5470_s16 + $0x8] sm:$0xff] }
  0xe0   : > { %4655 = vmatprep.mubr.msk.bf16.mxu1 %vm1277_vm1, %v4869_v4  ;;  %v2073_v18 = vld [vmem:[%s5465_s5 + $0x78] sm:$0xff]  ;;  %v4877_v20 = vld [vmem:[%s5450_s21 + $0x20] sm:$0xff]   ;;  %v4882_v24 = vld [vmem:[%s5484_s23 + $0x10] sm:$0xff]  }
  0xe1   : > { %4628 = vmatpush3.bf16.msra.mxu0 %v4864_v61  ;;  %4652 = vmatpush3.bf16.msra.mxu1 %v4865_v62  ;;  %v4880_v21 = vld [vmem:[%s5484_s23 + $0x18] sm:$0xff]   ;;  %v2074_v25 = vld [vmem:[%s5470_s16] sm:$0xff]  ;;  %v4883_v26 = vld [vmem:[%s5486_s4 + $0x10] sm:$0xff]  }
  0xe2   : > { %4629 = vmatprep.subr.bf16.mxu0 %v4866_v63  ;;  %4653 = vmatprep.subr.bf16.mxu1 %v4867_v2  ;;  %v4881_v22 = vld [vmem:[%s5486_s4 + $0x18] sm:$0xff]   ;;  %v4878_v27 = vld [vmem:[%s5445_s28 + $0x28] sm:$0xff]   ;;  %v4884_v30 = vld [vmem:[%s5445_s28 + $0x30] sm:$0xff]  }
  0xe3   : > { %2185 = vperm.xlu1 %4859, %v2065_v0   ;;  %2180 = vperm.xlu0 %4858, %v2064_v1   ;;  %v4879_v28 = vld [vmem:[%s5450_s21 + $0x28] sm:$0xff]   ;;  %v2077_v29 = vld [vmem:[%s5470_s16 + $0x18] sm:$0xff]  ;;  %v2076_v31 = vld [vmem:[%s5470_s16 + $0x10] sm:$0xff] }
  0xe4   : > { %v4885_v32 = vld [vmem:[%s5450_s21 + $0x30] sm:$0xff]   ;;  %v4888_v33 = vld [vmem:[%s5484_s23 + $0x8] sm:$0xff]   ;;  %v2078_v35 = vld [vmem:[%s5470_s16 + $0x20] sm:$0xff] }
  0xe5   : > { %4630 = vmatpush3.bf16.msra.mxu0 %v4866_v63  ;;  %4654 = vmatpush3.bf16.msra.mxu1 %v4867_v2  ;;  %v2079_v34 = vld [vmem:[%s5470_s16 + $0x28] sm:$0xff]  ;;  %v4886_v36 = vld [vmem:[%s5445_s28 + $0x38] sm:$0xff]   ;;  %v4890_v38 = vld [vmem:[%s5484_s23] sm:$0xff]  }
  0xe6   : > { %4671 = vmatprep.subr.bf16.mxu0 %v4880_v21  ;;  %4695 = vmatprep.subr.bf16.mxu1 %v4881_v22  ;;  %v4889_v37 = vld [vmem:[%s5486_s4 + $0x8] sm:$0xff]   ;;  %v4891_v39 = vld [vmem:[%s5486_s4] sm:$0xff]   ;;  %v4887_v40 = vld [vmem:[%s5450_s21 + $0x38] sm:$0xff]  }
  0xe7   : > { %2195 = vperm.xlu1 %4859, %v2067_v5   ;;  %2190 = vperm.xlu0 %4858, %v2066_v6   ;;  %v1608_v41 = vld [vmem:[%s5455_s15] sm:$0xf]  ;;  %v2081_v42 = vld [vmem:[%s5470_s16 + $0x38] sm:$0xff]  ;;  %v2080_v43 = vld [vmem:[%s5470_s16 + $0x30] sm:$0xff] }
  0xe8   : > { %4632 = vmatmul.mubr.msk.bf16.vlgmr.msra.gmra.mxu0 %vm1277_vm1, %v4870_v7  ;;  %4656 = vmatmul.mubr.msk.bf16.vlgmr.msra.gmra.mxu1 %vm1277_vm1, %v4871_v8  ;;  %v1609_v44 = vld [vmem:[%s5455_s15 + $0x4] sm:$0xf]  ;;  %v1624_v45 = vmul.bf16 1097154917, %v1608_v41  ;;  %v1833_v46 = vld [vmem:[%s5460_s27] sm:$0xf] }
  0xe9   : > { %4635 = vmatprep.mubr.msk.bf16.mxu0 %vm1277_vm1, %v4872_v10  ;;  %4659 = vmatprep.mubr.msk.bf16.mxu1 %vm1277_vm1, %v4873_v11  ;;  %v1625_v47 = vmul.bf16 1097154917, %v1609_v44  ;;  %v1834_v48 = vld [vmem:[%s5460_s27 + $0x4] sm:$0xf]  ;;  %v1849_v49 = vmul.bf16 1097154917, %v1833_v46 }
  0xea   : > { %4672 = vmatpush3.bf16.msra.mxu0 %v4880_v21  ;;  %4696 = vmatpush3.bf16.msra.mxu1 %v4881_v22  ;;  %v1850_v50 = vmul.bf16 1097154917, %v1834_v48  ;;  %v1610_v51 = vld [vmem:[%s5455_s15 + $0x8] sm:$0xf]  ;;  %v1611_v52 = vld [vmem:[%s5455_s15 + $0xc] sm:$0xf] }
  0xeb   : > { %2205 = vperm.xlu1 %4859, %v2069_v9   ;;  %2200 = vperm.xlu0 %4858, %v2068_v12   ;;  %v4526_v53 = vcombine.low %v1624_v45, %v1625_v47  ;;  %v1626_v54 = vmul.bf16 1097154917, %v1610_v51  ;;  %v1627_v55 = vmul.bf16 1097154917, %v1611_v52  ;;  %v1835_v56 = vld [vmem:[%s5460_s27 + $0x8] sm:$0xf] }
  0xec   : > { %4673 = vmatprep.subr.bf16.mxu0 %v4882_v24  ;;  %4697 = vmatprep.subr.bf16.mxu1 %v4883_v26  ;;  %v4546_v57 = vcombine.low %v1849_v49, %v1850_v50  ;;  %v1836_v58 = vld [vmem:[%s5460_s27 + $0xc] sm:$0xf]  ;;  %v1851_v59 = vmul.bf16 1097154917, %v1835_v56  ;;  %v2082_v61 = vld [vmem:[%s5470_s16 + $0x40] sm:$0xff]  ;;  %v2085_v11 = vld [vmem:[%s5470_s16 + $0x58] sm:$0xff] }
  0xed   : > { %v2083_v60 = vld [vmem:[%s5470_s16 + $0x48] sm:$0xff]  ;;  %v1852_v62 = vmul.bf16 1097154917, %v1836_v58  ;;  %v1612_v63 = vld [vmem:[%s5455_s15 + $0x10] sm:$0xf]  ;;  %v4527_v0 = vcombine.low %v1626_v54, %v1627_v55 }
  0xee   : > { %4674 = vmatpush3.bf16.msra.mxu0 %v4882_v24  ;;  %4698 = vmatpush3.bf16.msra.mxu1 %v4883_v26  ;;  %v1613_v1 = vld [vmem:[%s5455_s15 + $0x14] sm:$0xf]  ;;  %v1628_v2 = vmul.bf16 1097154917, %v1612_v63  ;;  %v1837_v3 = vld [vmem:[%s5460_s27 + $0x10] sm:$0xf] }
  0xef   : > { %2215 = vperm.xlu1 %4859, %v2071_v13   ;;  %2210 = vperm.xlu0 %4858, %v2070_v14   ;;  %v4547_v4 = vcombine.low %v1851_v59, %v1852_v62  ;;  %v1629_v5 = vmul.bf16 1097154917, %v1613_v1  ;;  %v1838_v6 = vld [vmem:[%s5460_s27 + $0x14] sm:$0xf]  ;;  %v1853_v7 = vmul.bf16 1097154917, %v1837_v3  ;;  %v2092_v3 = vlaneseq }
  0xf0   : > { %4636 = vmatmul.mubr.msk.bf16.gmra.mxu0 %vm1277_vm1, %v4874_v15  ;;  %4660 = vmatmul.mubr.msk.bf16.gmra.mxu1 %vm1277_vm1, %v4875_v16  ;;  %v1854_v8 = vmul.bf16 1097154917, %v1838_v6  ;;  %v1614_v9 = vld [vmem:[%s5455_s15 + $0x18] sm:$0xf]  ;;  %v1615_v10 = vld [vmem:[%s5455_s15 + $0x1c] sm:$0xf]  ;;  %v2130_v6 = vstv %s4567_s1 }
  0xf1   : > { %4639 = vmatprep.mubr.msk.bf16.mxu0 %vm1277_vm1, %v4876_v17  ;;  %4663 = vmatprep.mubr.msk.bf16.mxu1 %vm1277_vm1, %v4877_v20  ;;  %v2084_v12 = vld [vmem:[%s5470_s16 + $0x50] sm:$0xff]  ;;  %v4528_v13 = vcombine.low %v1628_v2, %v1629_v5  ;;  %v1630_v14 = vmul.bf16 1097154917, %v1614_v9  ;;  %v1839_v15 = vld [vmem:[%s5460_s27 + $0x18] sm:$0xf]  ;;  %v2128_v5 = vand.u32 127, %v2092_v3 }
  0xf2   : > { %4675 = vmatprep.subr.bf16.mxu0 %v4888_v33  ;;  %4699 = vmatprep.subr.bf16.mxu1 %v4889_v37  ;;  %v4548_v16 = vcombine.low %v1853_v7, %v1854_v8  ;;  %v1631_v17 = vmul.bf16 1097154917, %v1615_v10  ;;  %v1616_v21 = vld [vmem:[%s5455_s15 + $0x20] sm:$0xf]  ;;  %v1617_v22 = vld [vmem:[%s5455_s15 + $0x24] sm:$0xf]  ;;  %v5819_v8 = vstv %s4566_s2 }
  0xf3   : > { %2225 = vperm.xlu1 %4859, %v2073_v18   ;;  %2220 = vperm.xlu0 %4858, %v2072_v19   ;;  %v1840_v18 = vld [vmem:[%s5460_s27 + $0x1c] sm:$0xf]  ;;  %v1855_v19 = vmul.bf16 1097154917, %v1839_v15  ;;  %v1633_v24 = vmul.bf16 1097154917, %v1617_v22  ;;  %v5821_v9 = vadd.s32 %v2130_v6, %v2128_v5 }
  0xf4   : > { %4676 = vmatpush3.bf16.msra.mxu0 %v4888_v33  ;;  %4700 = vmatpush3.bf16.msra.mxu1 %v4889_v37  ;;  %v1856_v20 = vmul.bf16 1097154917, %v1840_v18  ;;  %v1842_v26 = vld [vmem:[%s5460_s27 + $0x24] sm:$0xf]  ;;  %v2089_v37 = vld [vmem:[%s5470_s16 + $0x78] sm:$0xff] }
  0xf5   : > { %4677 = vmatprep.subr.bf16.mxu0 %v4890_v38  ;;  %4701 = vmatprep.subr.bf16.mxu1 %v4891_v39  ;;  %v1620_v41 = vld [vmem:[%s5455_s15 + $0x30] sm:$0xf]  ;;  %v1846_v47 = vld [vmem:[%s5460_s27 + $0x34] sm:$0xf]  ;;  %v1622_v56 = vld [vmem:[%s5455_s15 + $0x38] sm:$0xf] }
  0xf6   : > { %v4549_v33 = vcombine.low %v1855_v19, %v1856_v20  ;;  %v1845_v44 = vld [vmem:[%s5460_s27 + $0x30] sm:$0xf]  ;;  %v1636_v49 = vmul.bf16 1097154917, %v1620_v41  ;;  %v1862_v52 = vmul.bf16 1097154917, %v1846_v47 }
  0xf7   : > { %2289 = vperm.xlu1 %4859, %v2075_v23   ;;  %2284 = vperm.xlu0 %4858, %v2074_v25   ;;  %v1632_v23 = vmul.bf16 1097154917, %v1616_v21  ;;  %v1841_v25 = vld [vmem:[%s5460_s27 + $0x20] sm:$0xf]  ;;  %v1861_v51 = vmul.bf16 1097154917, %v1845_v44 }
  0xf8   : > { %4640 = vmatmul.mubr.msk.bf16.gmra.mxu0 %vm1277_vm1, %v4878_v27  ;;  %4664 = vmatmul.mubr.msk.bf16.gmra.mxu1 %vm1277_vm1, %v4879_v28  ;;  %v1857_v27 = vmul.bf16 1097154917, %v1841_v25  ;;  %v2087_v28 = vld [vmem:[%s5470_s16 + $0x68] sm:$0xff]  ;;  %v1847_v59 = vld [vmem:[%s5460_s27 + $0x38] sm:$0xf] }
  0xf9   : > { %4643 = vmatprep.mubr.msk.bf16.mxu0 %vm1277_vm1, %v4884_v30  ;;  %4667 = vmatprep.mubr.msk.bf16.mxu1 %vm1277_vm1, %v4885_v32  ;;  %v4529_v30 = vcombine.low %v1630_v14, %v1631_v17  ;;  %v1618_v32 = vld [vmem:[%s5455_s15 + $0x28] sm:$0xf]  ;;  %v4552_v58 = vcombine.low %v1861_v51, %v1862_v52  ;;  %v1863_v63 = vmul.bf16 1097154917, %v1847_v59 }
  0xfa   : > { %4678 = vmatpush3.bf16.msra.mxu0 %v4890_v38  ;;  %4702 = vmatpush3.bf16.msra.mxu1 %v4891_v39  ;;  %v2088_v38 = vld [vmem:[%s5470_s16 + $0x70] sm:$0xff] }
  0xfb   : > { %2299 = vperm.xlu1 %4859, %v2077_v29   ;;  %2294 = vperm.xlu0 %4858, %v2076_v31   ;;  %v2086_v29 = vld [vmem:[%s5470_s16 + $0x60] sm:$0xff]  ;;  %v1858_v31 = vmul.bf16 1097154917, %v1842_v26 }
  0xfd   : > { %v4550_v39 = vcombine.low %v1857_v27, %v1858_v31  ;;  %v5864_v31 = vld [vmem:[%s1066_s12] ss:$0 sm:$0xff] }
  0xff   : > { %2309 = vperm.xlu1 %4859, %v2079_v34   ;;  %2304 = vperm.xlu0 %4858, %v2078_v35   ;;  %v4530_v34 = vcombine.low %v1632_v23, %v1633_v24  ;;  %v1619_v35 = vld [vmem:[%s5455_s15 + $0x2c] sm:$0xf] }
 0x100   : > { %4644 = vmatmul.mubr.msk.bf16.gmra.mxu0 %vm1277_vm1, %v4886_v36  ;;  %4668 = vmatmul.mubr.msk.bf16.gmra.mxu1 %vm1277_vm1, %v4887_v40  ;;  %v1843_v36 = vld [vmem:[%s5460_s27 + $0x28] sm:$0xf]  ;;  %v1844_v40 = vld [vmem:[%s5460_s27 + $0x2c] sm:$0xf]  ;;  %v1635_v45 = vmul.bf16 1097154917, %v1619_v35 }
 0x101   : > { %4679 = vmatprep.mubr.msk.bf16.mxu0 %vm1277_vm1, %v4526_v53  ;;  %4703 = vmatprep.mubr.msk.bf16.mxu1 %vm1277_vm1, %v4546_v57  ;;  %v1859_v46 = vmul.bf16 1097154917, %v1843_v36  ;;  %v1860_v48 = vmul.bf16 1097154917, %v1844_v40  ;;  %v1623_v57 = vld [vmem:[%s5455_s15 + $0x3c] sm:$0xf] }
 0x102   : > { %v1639_v62 = vmul.bf16 1097154917, %v1623_v57  ;;  %v7868_v40 = vmov 0.0  }
 0x103   : > { %2319 = vperm.xlu1 %4859, %v2081_v42   ;;  %2314 = vperm.xlu0 %4858, %v2080_v43   ;;  %v1634_v42 = vmul.bf16 1097154917, %v1618_v32  ;;  %v1621_v43 = vld [vmem:[%s5455_s15 + $0x34] sm:$0xf]  ;;  %v4551_v54 = vcombine.low %v1859_v46, %v1860_v48  ;;  %v5871_v32 = vld [vmem:[%s1069_s29] ss:$0 sm:$0xff] }
 0x104   : > { %v1637_v50 = vmul.bf16 1097154917, %v1621_v43  ;;  %v8013_v43 = vmov 0 }
 0x105   : > { %v4531_v53 = vcombine.low %v1634_v42, %v1635_v45 }
 0x106   : > { %v4532_v55 = vcombine.low %v1636_v49, %v1637_v50 }
 0x107   : > { %2329 = vperm.xlu1 %4859, %v2083_v60   ;;  %2324 = vperm.xlu0 %4858, %v2082_v61   ;;  %v1848_v60 = vld [vmem:[%s5460_s27 + $0x3c] sm:$0xf]  ;;  %v1638_v61 = vmul.bf16 1097154917, %v1622_v56 }
 0x108   : > { %4680 = vmatmul.mubr.msk.bf16.vlgmr.msra.gmra.mxu0 %vm1277_vm1, %v4527_v0  ;;  %4704 = vmatmul.mubr.msk.bf16.vlgmr.msra.gmra.mxu1 %vm1277_vm1, %v4547_v4  ;;  %v1864_v0 = vmul.bf16 1097154917, %v1848_v60  ;;  %v5813_v4 = vshrl.u32 %v2092_v3, 7 }
 0x109   : > { %4683 = vmatprep.mubr.msk.bf16.mxu0 %vm1277_vm1, %v4528_v13  ;;  %4707 = vmatprep.mubr.msk.bf16.mxu1 %vm1277_vm1, %v4548_v16  ;;  %v4533_v1 = vcombine.low %v1638_v61, %v1639_v62 }
 0x10a   : > { %v4553_v2 = vcombine.low %v1863_v63, %v1864_v0  ;;  %v2106_v7 = vadd.s32 104, %v5813_v4  ;;  %v5901_v50 = vadd.s32 %v5819_v8, %v5813_v4  ;;  %v2094_v62 = vadd.s32 8, %v5813_v4 }
 0x10b   : > { %2339 = vperm.xlu1 %4859, %v2085_v11   ;;  %2334 = vperm.xlu0 %4858, %v2084_v12   ;;  %v8016_v63 = vmov 0  ;;  %v2099_v3 = vadd.s32 48, %v5813_v4 }
 0x10c   : > { %v5824_v10 = vadd.s32 %v5819_v8, %v2106_v7 }
 0x10f   : > { %2349 = vperm.xlu1 %4859, %v2087_v28   ;;  %2344 = vperm.xlu0 %4858, %v2086_v29   ;;  %v2095_v29 = vadd.s32 16, %v5813_v4 }
 0x110   : > { %4684 = vmatmul.mubr.msk.bf16.gmra.mxu0 %vm1277_vm1, %v4529_v30  ;;  %4708 = vmatmul.mubr.msk.bf16.gmra.mxu1 %vm1277_vm1, %v4549_v33 }
 0x111   : > { %4687 = vmatprep.mubr.msk.bf16.mxu0 %vm1277_vm1, %v4530_v34  ;;  %4711 = vmatprep.mubr.msk.bf16.mxu1 %vm1277_vm1, %v4550_v39  ;;  %v5875_v36 = vadd.s32 %v5819_v8, %v2095_v29 }
 0x113   : > { %2359 = vperm.xlu1 %4859, %v2089_v37   ;;  %2354 = vperm.xlu0 %4858, %v2088_v38   ;;  %v8011_v37 = vmov 0  ;;  %vm7867_vm15 = vcmp.ne.s32.totalorder %v5875_v36, %v5821_v9 }
 0x118   : > { %4688 = vmatmul.mubr.msk.bf16.gmra.mxu0 %vm1277_vm1, %v4531_v53  ;;  %4712 = vmatmul.mubr.msk.bf16.gmra.mxu1 %vm1277_vm1, %v4551_v54 }
 0x119   : > { %4691 = vmatprep.mubr.msk.bf16.mxu0 %vm1277_vm1, %v4532_v55  ;;  %4715 = vmatprep.mubr.msk.bf16.mxu1 %vm1277_vm1, %v4552_v58  ;;  %v2096_v55 = vadd.s32 24, %v5813_v4 }
 0x120   : > { %4692 = vmatmul.mubr.msk.bf16.gmra.mxu0 %vm1277_vm1, %v4533_v1  ;;  %4716 = vmatmul.mubr.msk.bf16.gmra.mxu1 %vm1277_vm1, %v4553_v2  ;;  %v5945_v2 = vadd.s32 %v5819_v8, %v2096_v55 }
 0x152   : > { %v2161_v11 = vpop.permute.xlu1 %2160  ;;  %v2151_v12 = vpop.permute.xlu0 %2150 }
 0x156   : > { %v5828_v13 = vpop.permute.xlu1 %2165  ;;  %v5830_v14 = vpop.permute.xlu0 %2155 }
 0x15a   : > { %v5832_v15 = vpop.permute.xlu1 %2175  ;;  %v5834_v16 = vpop.permute.xlu0 %2170 }
 0x15e   : > { %v5836_v17 = vpop.permute.xlu1 %2185  ;;  %v5838_v18 = vpop.permute.xlu0 %2180 }
 0x162   : > { %v5840_v19 = vpop.permute.xlu1 %2195  ;;  %v5842_v20 = vpop.permute.xlu0 %2190 }
 0x166   : > { %v5844_v21 = vpop.permute.xlu1 %2205  ;;  %v5846_v22 = vpop.permute.xlu0 %2200 }
 0x16a   : > { %v5848_v23 = vpop.permute.xlu1 %2215  ;;  %v5850_v24 = vpop.permute.xlu0 %2210 }
 0x16e   : > { %v5852_v25 = vpop.permute.xlu1 %2225  ;;  %v5854_v26 = vpop.permute.xlu0 %2220 }
 0x172   : > { %v5856_v27 = vpop.permute.xlu1 %2289  ;;  %v2285_v28 = vpop.permute.xlu0 %2284 }
 0x176   : > { %v2300_v30 = vpop.permute.xlu1 %2299  ;;  %v2295_v34 = vpop.permute.xlu0 %2294 }
 0x17a   : > { %v5886_v42 = vpop.permute.xlu1 %2309  ;;  %v5910_v56 = vpop.permute.xlu0 %2304 }
 0x17e   : > { %v5926_v60 = vpop.permute.xlu1 %2319 }
 0x1a8   : > { %v4633_v33 = vpop.f32.mrf.mxu0  ;;  %v4657_v35 = vpop.f32.mrf.mxu1 }
 0x1a9   : > { %vm2230_vm3 = vcmp.lt.f32.partialorder %v2161_v11, %v4633_v33  ;;  %vm2252_vm4 = vcmp.lt.f32.partialorder %v5864_v31, %v4633_v33  ;;  %vm2364_vm6 = vcmp.lt.f32.partialorder %v2295_v34, %v4657_v35  ;;  %vm2386_vm7 = vcmp.lt.f32.partialorder %v5871_v32, %v4657_v35  ;;  %v2315_v11 = vpop.permute.xlu0 %2314  ;;  %v5979_v33 = vpop.permute.xlu1 %2329 }
 0x1aa   : > { %vm5877_vm5 = vmor %vm2230_vm3, %vm2252_vm4  ;;  %v1336_v38 = vpop.f32.mrf.mxu0  ;;  %v1545_v39 = vpop.f32.mrf.mxu1 }
 0x1ab   : > { %v8012_v37 = vsel %vm5877_vm5, 4294967295, %v8011_v37  ;;  %vm2402_vm8 = vmor %vm2364_vm6, %vm2386_vm7  ;;  %vm2228_vm9 = vcmp.lt.f32.partialorder %v2151_v12, %v1336_v38  ;;  %vm2250_vm10 = vcmp.lt.f32.partialorder %v5864_v31, %v1336_v38  ;;  %v2595_v41 = vsel %vm5877_vm5, 1.0, %v7868_v40 }
 0x1ac   : > { %vm5888_vm11 = vmor %vm2228_vm9, %vm2250_vm10  ;;  %vm2362_vm12 = vcmp.lt.f32.partialorder %v2285_v28, %v1545_v39  ;;  %vm2384_vm13 = vcmp.lt.f32.partialorder %v5871_v32, %v1545_v39  ;;  %v4634_v44 = vpop.f32.mrf.mxu0  ;;  %v2611_v45 = vsel %vm2402_vm8, 0.5, %v7868_v40  ;;  %v4658_v46 = vpop.f32.mrf.mxu1  ;;  %vm7866_vm7 = vcmp.ne.s32.totalorder %v5901_v50, %v5821_v9 }
 0x1ad   : > { %v8014_v43 = vsel %vm5888_vm11, 4294967295, %v8013_v43  ;;  %vm2400_vm14 = vmor %vm2362_vm12, %vm2384_vm13  ;;  %v2627_v47 = vadd.f32 %v2611_v45, %v2595_v41  ;;  %v2593_v48 = vsel %vm5888_vm11, 1.0, %v7868_v40  ;;  %vm2231_vm0 = vcmp.lt.f32.partialorder %v5828_v13, %v4634_v44  ;;  %v6048_v5 = vpop.permute.xlu1 %2339 }
 0x1ae   : > { %v1339_v49 = vpop.f32.mrf.mxu0  ;;  %v2609_v51 = vsel %vm2400_vm14, 0.5, %v7868_v40  ;;  %v1548_v52 = vpop.f32.mrf.mxu1  ;;  %vm2253_vm1 = vcmp.lt.f32.partialorder %v5864_v31, %v4634_v44  ;;  %vm2482_vm3 = vmand %vm5877_vm5, %vm7867_vm15  ;;  %vm2365_vm4 = vcmp.lt.f32.partialorder %v2300_v30, %v4658_v46  ;;  %vm2387_vm6 = vcmp.lt.f32.partialorder %v5871_v32, %v4658_v46 }
 0x1af   : > { %v5907_v53 = vsel %vm7867_vm15, %v2627_v47, 0.0  ;;  %v2625_v54 = vadd.f32 %v2609_v51, %v2593_v48  ;;  %v2498_v58 = vsel %vm2482_vm3, 1.0, %v7868_v40  ;;  %vm5933_vm8 = vmor %vm2231_vm0, %vm2253_vm1  ;;  %vm2229_vm10 = vcmp.lt.f32.partialorder %v5830_v14, %v1339_v49  ;;  %v6018_v51 = vpop.permute.xlu0 %2324 }
 0x1b0   : > { %8015 = vst [vmem:[#allocation29_spill] sm:$0xff] %v5907_v53  ;;  %2677 = vadd.xlane.f32.xlu1 %v5907_v53  ;;  %v5920_v57 = vpop.f32.mrf.mxu0  ;;  %v5924_v59 = vpop.f32.mrf.mxu1  ;;  %2516 = vmax.xlane.f32.xlu0 %v2498_v58  ;;  %v8017_v63 = vsel %vm5933_vm8, 4294967295, %v8016_v63  ;;  %vm5948_vm9 = vmor %vm2365_vm4, %vm2387_vm6  ;;  %vm2251_vm12 = vcmp.lt.f32.partialorder %v5864_v31, %v1339_v49  ;;  %vm2363_vm14 = vcmp.lt.f32.partialorder %v5856_v27, %v1548_v52  ;;  %v8022_v27 = vmov 0 }
 0x1b1   : > { %v5942_v1 = vsel %vm7866_vm7, %v2625_v54, 0.0  ;;  %vm2480_vm13 = vmand %vm5888_vm11, %vm7866_vm7  ;;  %vm2385_vm0 = vcmp.lt.f32.partialorder %v5871_v32, %v1548_v52  ;;  %v5970_v28 = vadd.s32 %v5819_v8, %v2094_v62  ;;  %vm7871_vm1 = vcmp.ne.s32.totalorder %v5945_v2, %v5821_v9 }
 0x1b2   : > { %v5930_v61 = vpop.f32.mrf.mxu0  ;;  %v5937_v0 = vpop.f32.mrf.mxu1  ;;  %8018 = vst [vmem:[#allocation30_spill] sm:$0xff] %v5942_v1  ;;  %v2496_v12 = vsel %vm2480_vm13, 1.0, %v7868_v40  ;;  %v5977_v30 = vadd.s32 %v5819_v8, %v2099_v3  ;;  %vm5983_vm3 = vmor %vm2229_vm10, %vm2251_vm12  ;;  %v2596_v35 = vsel %vm5933_vm8, 1.0, %v7868_v40  ;;  %v2612_v38 = vsel %vm5948_vm9, 0.5, %v7868_v40 }
 0x1b3   : > { %8021 = vst [vmem:[#allocation31_spill] sm:$0xff] %v5970_v28  ;;  %v8023_v27 = vsel %vm5983_vm3, 4294967295, %v8022_v27  ;;  %vm5995_vm4 = vmor %vm2363_vm14, %vm2385_vm0  ;;  %v2097_v14 = vadd.s32 32, %v5813_v4  ;;  %v2100_v44 = vadd.s32 56, %v5813_v4  ;;  %vm7872_vm10 = vcmp.ne.s32.totalorder %v5970_v28, %v5821_v9 }
 0x1b4   : > { %2673 = vadd.xlane.f32.xlu1 %v5942_v1  ;;  %v5953_v6 = vpop.f32.mrf.mxu0  ;;  %v5962_v7 = vpop.f32.mrf.mxu1  ;;  %2512 = vmax.xlane.f32.xlu0 %v2496_v12  ;;  %8024 = vst [vmem:[#allocation32_spill] sm:$0xff] %v8023_v27  ;;  %vm2483_vm6 = vmand %vm5933_vm8, %vm7871_vm1  ;;  %v2628_v47 = vadd.f32 %v2612_v38, %v2596_v35  ;;  %vm7873_vm9 = vcmp.ne.s32.totalorder %v5977_v30, %v5821_v9  ;;  %v2098_v49 = vadd.s32 40, %v5813_v4  ;;  %v2594_v54 = vsel %vm5983_vm3, 1.0, %v7868_v40 }
 0x1b5   : > { %v2499_v46 = vsel %vm2483_vm6, 1.0, %v7868_v40  ;;  %vm2234_vm12 = vcmp.lt.f32.partialorder %v5838_v18, %v5920_v57  ;;  %vm2256_vm13 = vcmp.lt.f32.partialorder %v5864_v31, %v5920_v57  ;;  %v2610_v55 = vsel %vm5995_vm4, 0.5, %v7868_v40  ;;  %vm2481_vm6 = vmand %vm5983_vm3, %vm7872_vm10  ;;  %v6149_v27 = vpop.permute.xlu1 %2349 }
 0x1b6   : > { %v5967_v13 = vpop.f32.mrf.mxu0  ;;  %v5974_v29 = vpop.f32.mrf.mxu1  ;;  %vm2368_vm14 = vcmp.lt.f32.partialorder %v2315_v11, %v5924_v59  ;;  %vm2390_vm0 = vcmp.lt.f32.partialorder %v5871_v32, %v5924_v59  ;;  %v6043_v62 = vadd.s32 %v5819_v8, %v2097_v14  ;;  %v6046_v3 = vadd.s32 %v5819_v8, %v2100_v44  ;;  %vm6064_vm15 = vmor %vm2234_vm12, %vm2256_vm13 }
 0x1b7   : > { %vm2232_vm4 = vcmp.lt.f32.partialorder %v5834_v16, %v5930_v61  ;;  %vm2254_vm7 = vcmp.lt.f32.partialorder %v5864_v31, %v5930_v61  ;;  %v2497_v12 = vsel %vm2481_vm6, 1.0, %v7868_v40  ;;  %v2103_v38 = vadd.s32 80, %v5813_v4  ;;  %vm6084_vm12 = vmor %vm2368_vm14, %vm2390_vm0 }
 0x1b8   : > { %v5987_v34 = vpop.f32.mrf.mxu0  ;;  %v5999_v41 = vpop.f32.mrf.mxu1  ;;  %2518 = vmax.xlane.f32.xlu0 %v2499_v46  ;;  %v8027_v39 = vmov 0  ;;  %2514 = vmax.xlane.f32.xlu1 %v2497_v12  ;;  %v6071_v14 = vsel %vm7871_vm1, %v2628_v47, 0.0  ;;  %v2626_v44 = vadd.f32 %v2610_v55, %v2594_v54  ;;  %v6076_v40 = vadd.s32 %v5819_v8, %v2098_v49  ;;  %vm6103_vm14 = vmor %vm2232_vm4, %vm2254_vm7 }
 0x1b9   : > { %v8028_v39 = vsel %vm6064_vm15, 4294967295, %v8027_v39  ;;  %8029 = vst [vmem:[#allocation33_spill] sm:$0xff] %v6071_v14  ;;  %v2101_v1 = vadd.s32 64, %v5813_v4  ;;  %vm2366_vm13 = vcmp.lt.f32.partialorder %v5910_v56, %v5937_v0  ;;  %vm2388_vm6 = vcmp.lt.f32.partialorder %v5871_v32, %v5937_v0  ;;  %v2335_v54 = vpop.permute.xlu0 %2334  ;;  %vm2486_vm4 = vmand %vm6064_vm15, %vm7873_vm9 }
 0x1ba   : > { %v6010_v45 = vpop.f32.mrf.mxu0  ;;  %v6013_v48 = vpop.f32.mrf.mxu1  ;;  %v2104_v47 = vadd.s32 88, %v5813_v4  ;;  %v2102_v49 = vadd.s32 72, %v5813_v4  ;;  %v8032_v59 = vmov 0  ;;  %vm2257_vm1 = vcmp.lt.f32.partialorder %v5864_v31, %v5953_v6  ;;  %vm6135_vm2 = vmor %vm2366_vm13, %vm2388_vm6 }
 0x1bb   : > { %v8033_v59 = vsel %vm6103_vm14, 4294967295, %v8032_v59  ;;  %vm2391_vm7 = vcmp.lt.f32.partialorder %v5871_v32, %v5962_v7  ;;  %v6127_v61 = vadd.s32 %v5819_v8, %v2103_v38  ;;  %vm2233_vm9 = vcmp.lt.f32.partialorder %v5832_v15, %v5967_v13 }
 0x1bc   : > { %v6024_v52 = vpop.f32.mrf.mxu0  ;;  %v6040_v58 = vpop.f32.mrf.mxu1  ;;  %2679 = vadd.xlane.f32.xlu0 %v6071_v14  ;;  %vm2255_vm0 = vcmp.lt.f32.partialorder %v5864_v31, %v5967_v13  ;;  %v8036_v12 = vmov 0.0   ;;  %vm8037_vm10 = vcmp.ne.s32.totalorder %v5970_v28, %v5821_v9  ;;  %vm8039_vm13 = vcmp.lt.f32.partialorder %v5836_v17, %v5953_v6 }
 0x1bd   : > { %v2502_v14 = vsel %vm2486_vm4, 1.0, %v8036_v12  ;;  %v6147_v38 = vsel %vm8037_vm10, %v2626_v44, 0.0  ;;  %vm6157_vm6 = vmor %vm8039_vm13, %vm2257_vm1  ;;  %v8040_v56 = vmov 0  ;;  %v6165_v0 = vadd.s32 %v5819_v8, %v2101_v1  ;;  %v2345_v13 = vpop.permute.xlu0 %2344 }
 0x1be   : > { %v6055_v35 = vpop.f32.mrf.mxu0  ;;  %v6073_v46 = vpop.f32.mrf.mxu1  ;;  %8038 = vst [vmem:[#allocation34_spill] sm:$0xff] %v6147_v38  ;;  %v8041_v56 = vsel %vm6157_vm6, 4294967295, %v8040_v56  ;;  %2524 = vmax.xlane.f32.xlu1 %v2502_v14  ;;  %v6168_v44 = vadd.s32 %v5819_v8, %v2104_v47  ;;  %v6171_v28 = vadd.s32 %v5819_v8, %v2102_v49  ;;  %vm8042_vm1 = vcmp.lt.f32.partialorder %v5926_v60, %v5962_v7 }
 0x1bf   : > { %vm6179_vm4 = vmor %vm8042_vm1, %vm2391_vm7  ;;  %v2599_v1 = vsel %vm6064_vm15, 1.0, %v8036_v12  ;;  %v2615_v6 = vsel %vm6084_vm12, 0.5, %v8036_v12  ;;  %v8045_v60 = vmov 0  ;;  %v2597_v14 = vsel %vm6103_vm14, 1.0, %v8036_v12 }
 0x1c0   : > { %v6093_v57 = vpop.f32.mrf.mxu0  ;;  %v6113_v11 = vpop.f32.mrf.mxu1  ;;  %2675 = vadd.xlane.f32.xlu0 %v6147_v38  ;;  %vm6199_vm7 = vmor %vm2233_vm9, %vm2255_vm0  ;;  %v2613_v18 = vsel %vm6135_vm2, 0.5, %v8036_v12  ;;  %vm8047_vm13 = vcmp.ne.s32.totalorder %v6043_v62, %v5821_v9  ;;  %vm8048_vm9 = vcmp.lt.f32.partialorder %v5871_v32, %v5974_v29  ;;  %vm8049_vm0 = vcmp.lt.f32.partialorder %v5886_v42, %v5974_v29 }
 0x1c1   : > { %v8046_v60 = vsel %vm6199_vm7, 4294967295, %v8045_v60  ;;  %vm2484_vm10 = vmand %vm6103_vm14, %vm8047_vm13  ;;  %v2631_v55 = vadd.f32 %v2615_v6, %v2599_v1  ;;  %vm8052_vm2 = vcmp.lt.f32.partialorder %v5864_v31, %v5987_v34  ;;  %vm8053_vm14 = vcmp.lt.f32.partialorder %v5846_v22, %v5987_v34  ;;  %v2360_v42 = vpop.permute.xlu1 %2359 }
 0x1c2   : > { %v1384_v16 = vpop.f32.mrf.mxu0  ;;  %v1593_v53 = vpop.f32.mrf.mxu1  ;;  %vm6233_vm12 = vmor %vm8049_vm0, %vm8048_vm9  ;;  %v2500_v49 = vsel %vm2484_vm10, 1.0, %v8036_v12  ;;  %v8054_v38 = vmov 0  ;;  %vm8056_vm13 = vcmp.lt.f32.partialorder %v5871_v32, %v5999_v41  ;;  %vm8057_vm3 = vcmp.lt.f32.partialorder %v2335_v54, %v5999_v41 }
 0x1c3   : > { %vm6246_vm15 = vmor %vm8053_vm14, %vm8052_vm2  ;;  %2520 = vmax.xlane.f32.xlu1 %v2500_v49  ;;  %vm8060_vm2 = vcmp.lt.f32.partialorder %v5864_v31, %v6010_v45  ;;  %vm8061_vm9 = vcmp.lt.f32.partialorder %v5842_v20, %v6010_v45  ;;  %v8062_v29 = vmov 0  ;;  %vm8064_vm1 = vcmp.ne.s32.totalorder %v6046_v3, %v5821_v9 }
 0x1c4   : > { %v4646_v7 = vpop.f32.mrf.mxu0  ;;  %v4670_v15 = vpop.f32.mrf.mxu1  ;;  %v8055_v38 = vsel %vm6246_vm15, 4294967295, %v8054_v38  ;;  %vm6260_vm14 = vmor %vm8057_vm3, %vm8056_vm13  ;;  %v2629_v41 = vadd.f32 %v2613_v18, %v2597_v14  ;;  %vm8065_vm0 = vcmp.lt.f32.partialorder %v5864_v31, %v1384_v16  ;;  %vm8066_vm11 = vcmp.lt.f32.partialorder %v5850_v24, %v1384_v16 }
 0x1c5   : > { %vm6270_vm10 = vmor %vm8061_vm9, %vm8060_vm2  ;;  %v8067_v45 = vmov 0  ;;  %vm8069_vm9 = vcmp.lt.f32.partialorder %v5864_v31, %v6024_v52  ;;  %vm8070_vm2 = vcmp.lt.f32.partialorder %v5844_v21, %v6024_v52  ;;  %v8071_v1 = vmov 0 }
 0x1c6   : > { %v8063_v29 = vsel %vm6270_vm10, 4294967295, %v8062_v29  ;;  %vm2487_vm3 = vmand %vm6157_vm6, %vm8064_vm1  ;;  %v1387_v34 = vpop.f32.mrf.mxu0  ;;  %v1596_v54 = vpop.f32.mrf.mxu1  ;;  %vm8075_vm1 = vcmp.ne.s32.totalorder %v5977_v30, %v5821_v9  ;;  %v2600_v16 = vsel %vm6157_vm6, 1.0, %v8036_v12  ;;  %v2616_v21 = vsel %vm6179_vm4, 0.5, %v8036_v12 }
 0x1c7   : > { %v2503_v20 = vsel %vm2487_vm3, 1.0, %v8036_v12  ;;  %vm6292_vm5 = vmor %vm8066_vm11, %vm8065_vm0  ;;  %vm8073_vm11 = vcmp.lt.f32.partialorder %v5871_v32, %v1593_v53  ;;  %vm8074_vm0 = vcmp.lt.f32.partialorder %v2345_v13, %v1593_v53  ;;  %v6313_v24 = vsel %vm8075_vm1, %v2631_v55, 0.0 }
 0x1c8   : > { %v8068_v45 = vsel %vm6292_vm5, 4294967295, %v8067_v45  ;;  %vm6303_vm8 = vmor %vm8070_vm2, %vm8069_vm9  ;;  %2526 = vmax.xlane.f32.xlu0 %v2503_v20  ;;  %v2605_v52 = vsel %vm6292_vm5, 1.0, %v8036_v12  ;;  %2685 = vadd.xlane.f32.xlu1 %v6313_v24  ;;  %vm8076_vm9 = vcmp.lt.f32.partialorder %v5864_v31, %v4646_v7  ;;  %vm8077_vm2 = vcmp.lt.f32.partialorder %v5852_v25, %v4646_v7 }
 0x1c9   : > { %v8072_v1 = vsel %vm6303_vm8, 4294967295, %v8071_v1  ;;  %vm2412_vm3 = vmor %vm8074_vm0, %vm8073_vm11  ;;  %v8078_v53 = vmov 0  ;;  %v2107_v17 = vadd.s32 112, %v5813_v4  ;;  %vm8080_vm4 = vcmp.lt.f32.partialorder %v5871_v32, %v6013_v48 }
 0x1ca   : > { %vm6329_vm1 = vmor %vm8077_vm2, %vm8076_vm9  ;;  %v2621_v6 = vsel %vm2412_vm3, 0.5, %v8036_v12  ;;  %vm8081_vm13 = vcmp.lt.f32.partialorder %v6018_v51, %v6013_v48  ;;  %vm8084_vm9 = vcmp.lt.f32.partialorder %v5871_v32, %v4670_v15  ;;  %vm8085_vm2 = vcmp.lt.f32.partialorder %v2360_v42, %v4670_v15 }
 0x1cb   : > { %v8079_v53 = vsel %vm6329_vm1, 4294967295, %v8078_v53  ;;  %vm6343_vm6 = vmor %vm8081_vm13, %vm8080_vm4  ;;  %vm2397_vm5 = vcmp.lt.f32.partialorder %v5871_v32, %v1596_v54  ;;  %v6352_v7 = vadd.f32 %v2621_v6, %v2605_v52  ;;  %v2608_v14 = vsel %vm6329_vm1, 1.0, %v8036_v12  ;;  %v2355_v6 = vpop.permute.xlu0 %2354 }
 0x1cc   : > { %vm2415_vm11 = vmor %vm8085_vm2, %vm8084_vm9  ;;  %vm8086_vm13 = vcmp.ne.s32.totalorder %v6076_v40, %v5821_v9  ;;  %vm8087_vm4 = vcmp.ne.s32.totalorder %v6043_v62, %v5821_v9  ;;  %v2632_v51 = vadd.f32 %v2616_v21, %v2600_v16  ;;  %v2598_v18 = vsel %vm6199_vm7, 1.0, %v8036_v12  ;;  %v2418_v21 = vld [vmem:[%s5488_s3 + $0x10] sm:$0xff] }
 0x1cd   : > { %vm2485_vm3 = vmand %vm6199_vm7, %vm8086_vm13  ;;  %v6365_v48 = vsel %vm8087_vm4, %v2629_v41, 0.0  ;;  %v2624_v15 = vsel %vm2415_vm11, 0.5, %v8036_v12  ;;  %vm8088_vm13 = vcmp.lt.f32.partialorder %v5864_v31, %v1387_v34  ;;  %vm8089_vm4 = vcmp.lt.f32.partialorder %v5848_v23, %v1387_v34  ;;  %v2420_v41 = vld [vmem:[%s5488_s3 + $0x20] sm:$0xff] }
 0x1ce   : > { %v2501_v13 = vsel %vm2485_vm3, 1.0, %v8036_v12  ;;  %vm6380_vm0 = vmor %vm8089_vm4, %vm8088_vm13  ;;  %v8090_v49 = vmov 0  ;;  %v6384_v55 = vadd.f32 %v2624_v15, %v2608_v14  ;;  %vm8092_vm3 = vcmp.lt.f32.partialorder %v6149_v27, %v1596_v54  ;;  %2681 = vadd.xlane.f32.xlu1 %v6365_v48  ;;  %v2419_v15 = vld [vmem:[%s5488_s3 + $0x18] sm:$0xff]  ;;  %v2421_v14 = vld [vmem:[%s5488_s3 + $0x28] sm:$0xff] }
 0x1cf   : > { %v8091_v49 = vsel %vm6380_vm0, 4294967295, %v8090_v49  ;;  %2522 = vmax.xlane.f32.xlu0 %v2501_v13  ;;  %vm2413_vm2 = vmor %vm8092_vm3, %vm2397_vm5  ;;  %v2614_v23 = vsel %vm6233_vm12, 0.5, %v8036_v12  ;;  %v2606_v42 = vsel %vm6380_vm0, 1.0, %v8036_v12  ;;  %vm8093_vm4 = vcmp.ne.s32.totalorder %v6127_v61, %v5821_v9 }
 0x1d0   : > { %vm2490_vm5 = vmand %vm6246_vm15, %vm8093_vm4  ;;  %v6409_v27 = vadd.s32 %v5819_v8, %v2107_v17  ;;  %v2105_v47 = vadd.s32 96, %v5813_v4  ;;  %v2622_v34 = vsel %vm2413_vm2, 0.5, %v8036_v12  ;;  %vm8094_vm12 = vcmp.lt.f32.partialorder %v5871_v32, %v6040_v58 }
 0x1d1   : > { %vm8095_vm3 = vcmp.lt.f32.partialorder %v6048_v5, %v6040_v58  ;;  %vm2393_vm4 = vcmp.lt.f32.partialorder %v5871_v32, %v6073_v46  ;;  %vm2264_vm9 = vcmp.lt.f32.partialorder %v5864_v31, %v6093_v57  ;;  %v2638_v20 = vadd.f32 %v2622_v34, %v2606_v42 }
 0x1d2   : > { %vm6419_vm13 = vmor %vm8095_vm3, %vm8094_vm12  ;;  %vm8098_vm2 = vcmp.lt.f32.partialorder %v5864_v31, %v6055_v35  ;;  %vm8099_vm7 = vcmp.lt.f32.partialorder %v5840_v19, %v6055_v35  ;;  %vm8102_vm3 = vcmp.ne.s32.totalorder %v6046_v3, %v5821_v9  ;;  %v2506_v54 = vsel %vm2490_vm5, 1.0, %v8036_v12 }
 0x1d3   : > { %vm6435_vm12 = vmor %vm8099_vm7, %vm8098_vm2  ;;  %v6442_v5 = vsel %vm8102_vm3, %v2632_v51, 0.0  ;;  %v2630_v16 = vadd.f32 %v2614_v23, %v2598_v18  ;;  %2532 = vmax.xlane.f32.xlu1 %v2506_v54  ;;  %vm8103_vm7 = vcmp.ne.s32.totalorder %v6165_v0, %v5821_v9  ;;  %v2603_v35 = vsel %vm6246_vm15, 1.0, %v8036_v12 }
 0x1d4   : > { %2687 = vadd.xlane.f32.xlu0 %v6442_v5  ;;  %vm6454_vm2 = vmand %vm6270_vm10, %vm8103_vm7  ;;  %v2619_v52 = vsel %vm6260_vm14, 0.5, %v8036_v12  ;;  %vm8106_vm3 = vcmp.ne.s32.totalorder %v5824_v10, %v5821_v9  ;;  %vm8107_vm7 = vcmp.lt.f32.partialorder %v5979_v33, %v6073_v46  ;;  %vm8110_vm14 = vcmp.lt.f32.partialorder %v5854_v26, %v6093_v57  ;;  %v2416_v46 = vld [vmem:[%s5488_s3] sm:$0xff] }
 0x1d5   : > { %v6469_v17 = vsel %vm8106_vm3, %v2638_v20, 0.0  ;;  %vm6477_vm11 = vmor %vm8107_vm7, %vm2393_vm4  ;;  %v8111_v22 = vmov 0  ;;  %v6494_v51 = vadd.s32 %v5819_v8, %v2105_v47  ;;  %v2108_v33 = vadd.s32 120, %v5813_v4  ;;  %v8152_v26 = vld [vmem:[#allocation31_spill] sm:$0xff] }
 0x1d6   : > { %vm6487_vm3 = vmor %vm8110_vm14, %vm2264_vm9  ;;  %vm8113_vm9 = vcmp.ne.s32.totalorder %v6168_v44, %v5821_v9  ;;  %vm8116_vm15 = vcmp.ne.s32.totalorder %v6076_v40, %v5821_v9  ;;  %v2504_v31 = vsel %vm6454_vm2, 1.0, %v8036_v12  ;;  %v2635_v57 = vadd.f32 %v2619_v52, %v2603_v35  ;;  %v8147_v52 = vld [vmem:[#allocation32_spill] sm:$0xff] }
 0x1d7   : > { %v8112_v22 = vsel %vm6487_vm3, 4294967295, %v8111_v22  ;;  %vm6506_vm14 = vmand %vm6303_vm8, %vm8113_vm9  ;;  %v6513_v4 = vsel %vm8116_vm15, %v2630_v16, 0.0  ;;  %vm8117_vm4 = vcmp.ne.s32.totalorder %v6171_v28, %v5821_v9  ;;  %2528 = vmax.xlane.f32.xlu1 %v2504_v31  ;;  %v2601_v13 = vsel %vm6270_vm10, 1.0, %v8036_v12 }
 0x1d8   : > { %vm6523_vm9 = vmand %vm6435_vm12, %vm8117_vm4  ;;  %2683 = vadd.xlane.f32.xlu0 %v6513_v4  ;;  %v2617_v23 = vsel %vm6343_vm6, 0.5, %v8036_v12  ;;  %vm8120_vm15 = vcmp.ne.s32.totalorder %v6409_v27, %v5821_v9  ;;  %vm8123_vm4 = vcmp.ne.s32.totalorder %v5824_v10, %v5821_v9  ;;  %vm2432_vm7 = vcmp.gt.f32.partialorder %v2416_v46, 0.0 }
 0x1d9   : > { %vm6540_vm2 = vmand %vm6487_vm3, %vm8120_vm15  ;;  %vm8124_vm6 = vcmp.lt.f32.partialorder %v5871_v32, %v6113_v11  ;;  %vm8125_vm10 = vcmp.lt.f32.partialorder %v2355_v6, %v6113_v11  ;;  %v6561_v47 = vadd.s32 %v5819_v8, %v2108_v33  ;;  %v2417_v32 = vld [vmem:[%s5488_s3 + $0x8] sm:$0xff]  ;;  %v8131_v11 = vmov 0 }
 0x1da   : > { %vm2493_vm5 = vmand %vm6380_vm0, %vm8123_vm4  ;;  %vm8128_vm4 = vcmp.gt.f32.partialorder %v2418_v21, 0.0  ;;  %vm8129_vm0 = vnez %v8012_v37  ;;  %vm2435_vm15 = vcmp.gt.f32.partialorder %v2419_v15, 0.0  ;;  %v2507_v8 = vsel %vm6506_vm14, 1.0, %v8036_v12 }
 0x1db   : > { %vm6554_vm1 = vmor %vm8125_vm10, %vm8124_vm6  ;;  %v6564_v34 = vsel %vm2493_vm5, 1.0, %v8036_v12  ;;  %vm8130_vm10 = vcmp.ne.s32.totalorder %v5875_v36, %v5821_v9  ;;  %vm8133_vm5 = vcmp.ne.s32.totalorder %v6127_v61, %v5821_v9  ;;  %v2633_v37 = vadd.f32 %v2617_v23, %v2601_v13  ;;  %v2422_v36 = vld [vmem:[%s5488_s3 + $0x30] sm:$0xff] }
 0x1dc   : > { %vm2450_vm3 = vmor %vm8129_vm0, %vm8128_vm4  ;;  %v6583_v20 = vsel %vm8133_vm5, %v2635_v57, 0.0  ;;  %vm8134_vm0 = vnez %v8014_v43  ;;  %2534 = vmax.xlane.f32.xlu0 %v2507_v8  ;;  %v2604_v54 = vsel %vm6303_vm8, 1.0, %v8036_v12  ;;  %v2620_v16 = vsel %vm6419_vm13, 0.5, %v8036_v12 }
 0x1dd   : > { %vm6573_vm6 = vmand %vm2450_vm3, %vm8130_vm10  ;;  %2693 = vadd.xlane.f32.xlu1 %v6583_v20  ;;  %vm8135_vm3 = vcmp.ne.s32.totalorder %v6494_v51, %v5821_v9  ;;  %vm8136_vm14 = vnez %v8068_v45  ;;  %v8140_v21 = vmov 0  ;;  %vm7899_vm13 = vcmp.ne.s32.totalorder %v6561_v47, %v5821_v9 }
 0x1de   : > { %v8132_v11 = vsel %vm6573_vm6, 4294967295, %v8131_v11  ;;  %vm2448_vm4 = vmor %vm8134_vm0, %vm2432_vm7  ;;  %vm8139_vm7 = vcmp.ne.s32.totalorder %v5901_v50, %v5821_v9  ;;  %vm2433_vm0 = vcmp.gt.f32.partialorder %v2417_v32, 0.0  ;;  %vm8142_vm6 = vnez %v8017_v63 }
 0x1df   : > { %vm6600_vm10 = vmand %vm8136_vm14, %vm8135_vm3  ;;  %vm8143_vm3 = vcmp.ne.s32.totalorder %v5945_v2, %v5821_v9  ;;  %v8144_v19 = vmov 0  ;;  %v2505_v50 = vsel %vm6523_vm9, 1.0, %v8036_v12  ;;  %v2636_v63 = vadd.f32 %v2620_v16, %v2604_v54  ;;  %v2423_v2 = vld [vmem:[%s5488_s3 + $0x38] sm:$0xff]  ;;  %v6760_v54 = vpop.f32.mrf.mxu1  ;;  %v6790_v16 = vpop.f32.mrf.mxu0 }
 0x1e0   : > { %vm6607_vm5 = vmand %vm2448_vm4, %vm8139_vm7  ;;  %vm2438_vm4 = vcmp.gt.f32.partialorder %v2422_v36, 0.0  ;;  %vm8146_vm7 = vcmp.ne.s32.totalorder %v6165_v0, %v5821_v9  ;;  %2530 = vmax.xlane.f32.xlu0 %v2505_v50  ;;  %v2602_v6 = vsel %vm6435_vm12, 1.0, %v8036_v12  ;;  %v2618_v33 = vsel %vm6477_vm11, 0.5, %v8036_v12 }
 0x1e1   : > { %v8141_v21 = vsel %vm6607_vm5, 4294967295, %v8140_v21  ;;  %vm2451_vm8 = vmor %vm8142_vm6, %vm2435_vm15  ;;  %v6629_v35 = vsel %vm8146_vm7, %v2633_v37, 0.0  ;;  %vm8148_vm15 = vnez %v8147_v52  ;;  %vm2436_vm7 = vcmp.gt.f32.partialorder %v2420_v41, 0.0  ;;  %v2425_v37 = vld [vmem:[%s5488_s3 + $0x48] sm:$0xff]  ;;  %v8210_v41 = vld [vmem:[#allocation30_spill] sm:$0xff] }
 0x1e2   : > { %vm6619_vm14 = vmand %vm2451_vm8, %vm8143_vm3  ;;  %2689 = vadd.xlane.f32.xlu1 %v6629_v35  ;;  %vm8149_vm8 = vnez %v8079_v53  ;;  %v8158_v57 = vmov 0  ;;  %vm2439_vm5 = vcmp.gt.f32.partialorder %v2423_v2, 0.0  ;;  %v2634_v15 = vadd.f32 %v2618_v33, %v2602_v6  ;;  %v8211_v2 = vld [vmem:[#allocation33_spill] sm:$0xff] }
 0x1e3   : > { %v8145_v19 = vsel %vm6619_vm14, 4294967295, %v8144_v19  ;;  %vm2449_vm6 = vmor %vm8148_vm15, %vm2433_vm0  ;;  %vm8153_vm0 = vcmp.ne.s32.totalorder %v8152_v26, %v5821_v9  ;;  %vm8156_vm15 = vnez %v8028_v39  ;;  %vm8157_vm14 = vcmp.ne.s32.totalorder %v5977_v30, %v5821_v9  ;;  %v2426_v30 = vld [vmem:[%s5488_s3 + $0x50] sm:$0xff] }
 0x1e4   : > { %vm6646_vm9 = vmand %vm8149_vm8, %vm7899_vm13  ;;  %v2510_v39 = vsel %vm6540_vm2, 1.0, %v8036_v12  ;;  %v2623_v23 = vsel %vm6554_vm1, 0.5, %v8036_v12  ;;  %vm8163_vm2 = vcmp.ne.s32.totalorder %v6043_v62, %v5821_v9  ;;  %v8168_v32 = vmov 0 }
 0x1e5   : > { %vm6653_vm3 = vmand %vm2449_vm6, %vm8153_vm0  ;;  %vm8160_vm6 = vcmp.ne.s32.totalorder %v6168_v44, %v5821_v9  ;;  %vm2442_vm1 = vcmp.gt.f32.partialorder %v2426_v30, 0.0  ;;  %v8193_v58 = vmov 0  ;;  %v8206_v53 = vmov 0 }
 0x1e6   : > { %vm2454_vm11 = vmor %vm8156_vm15, %vm2438_vm4  ;;  %v6670_v18 = vsel %vm8160_vm6, %v2636_v63, 0.0  ;;  %vm8161_vm4 = vnez %v8033_v59  ;;  %2540 = vmax.xlane.f32.xlu1 %v2510_v39  ;;  %v2424_v59 = vld [vmem:[%s5488_s3 + $0x40] sm:$0xff] }
 0x1e7   : > { %vm6663_vm13 = vmand %vm2454_vm11, %vm8157_vm14  ;;  %2695 = vadd.xlane.f32.xlu0 %v6670_v18  ;;  %vm8162_vm14 = vnez %v8112_v22  ;;  %vm8166_vm11 = vnez %v8041_v56  ;;  %v2508_v56 = vsel %vm6600_vm10, 1.0, %v8036_v12 }
 0x1e8   : > { %v8159_v57 = vsel %vm6663_vm13, 4294967295, %v8158_v57  ;;  %vm2452_vm0 = vmor %vm8161_vm4, %vm2436_vm7  ;;  %v2607_v13 = vsel %vm8162_vm14, 1.0, %v8036_v12  ;;  %vm2437_vm7 = vcmp.gt.f32.partialorder %v2421_v14, 0.0  ;;  %vm8167_vm4 = vcmp.ne.s32.totalorder %v6046_v3, %v5821_v9  ;;  %v2427_v3 = vld [vmem:[%s5488_s3 + $0x58] sm:$0xff] }
 0x1e9   : > { %vm6688_vm15 = vmand %vm2452_vm0, %vm8163_vm2  ;;  %vm8170_vm0 = vcmp.ne.s32.totalorder %v6171_v28, %v5821_v9  ;;  %v2639_v25 = vadd.f32 %v2623_v23, %v2607_v13 }
 0x1ea   : > { %vm2455_vm6 = vmor %vm8166_vm11, %vm2439_vm5  ;;  %v6705_v62 = vsel %vm8170_vm0, %v2634_v15, 0.0  ;;  %vm8171_vm5 = vnez %v8046_v60  ;;  %2536 = vmax.xlane.f32.xlu1 %v2508_v56  ;;  %vm8172_vm11 = vcmp.ne.s32.totalorder %v6076_v40, %v5821_v9  ;;  %vm8175_vm0 = vnez %v8055_v38  ;;  %v2430_v38 = vld [vmem:[%s5488_s3 + $0x70] sm:$0xff]  ;;  %v8212_v15 = vld [vmem:[#allocation34_spill] sm:$0xff] }
 0x1eb   : > { %vm6698_vm13 = vmand %vm2455_vm6, %vm8167_vm4  ;;  %2691 = vadd.xlane.f32.xlu0 %v6705_v62  ;;  %vm2440_vm4 = vcmp.gt.f32.partialorder %v2424_v59, 0.0  ;;  %v8177_v60 = vmov 0  ;;  %v2511_v40 = vsel %vm6646_vm9, 1.0, %v8036_v12  ;;  %vm2441_vm9 = vcmp.gt.f32.partialorder %v2425_v37, 0.0  ;;  %v2428_v12 = vld [vmem:[%s5488_s3 + $0x60] sm:$0xff] }
 0x1ec   : > { %v8169_v32 = vsel %vm6698_vm13, 4294967295, %v8168_v32  ;;  %vm2453_vm2 = vmor %vm8171_vm5, %vm2437_vm7  ;;  %vm8176_vm7 = vcmp.ne.s32.totalorder %v6127_v61, %v5821_v9  ;;  %vm2443_vm13 = vcmp.gt.f32.partialorder %v2427_v3, 0.0 }
 0x1ed   : > { %vm6717_vm6 = vmand %vm2453_vm2, %vm8172_vm11  ;;  %vm8179_vm2 = vcmp.ne.s32.totalorder %v6409_v27, %v5821_v9 }
 0x1ee   : > { %vm2458_vm10 = vmor %vm8175_vm0, %vm2442_vm1  ;;  %v6737_v36 = vsel %vm8179_vm2, %v2639_v25, 0.0  ;;  %vm8180_vm1 = vnez %v8063_v29  ;;  %vm8181_vm0 = vcmp.ne.s32.totalorder %v6165_v0, %v5821_v9 }
 0x1ef   : > { %vm6727_vm5 = vmand %vm2458_vm10, %vm8176_vm7  ;;  %2542 = vmax.xlane.f32.xlu0 %v2511_v40  ;;  %2701 = vadd.xlane.f32.xlu1 %v6737_v36  ;;  %vm8184_vm7 = vnez %v8072_v1  ;;  %v2431_v1 = vld [vmem:[%s5488_s3 + $0x78] sm:$0xff] }
 0x1f0   : > { %v8178_v60 = vsel %vm6727_vm5, 4294967295, %v8177_v60  ;;  %vm2456_vm11 = vmor %vm8180_vm1, %vm2440_vm4  ;;  %vm8185_vm4 = vcmp.ne.s32.totalorder %v6168_v44, %v5821_v9  ;;  %vm2446_vm5 = vcmp.gt.f32.partialorder %v2430_v38, 0.0  ;;  %v8190_v44 = vmov 0 }
 0x1f1   : > { %vm6746_vm10 = vmand %vm2456_vm11, %vm8181_vm0  ;;  %vm8188_vm11 = vcmp.ne.s32.totalorder %v6494_v51, %v5821_v9  ;;  %vm8189_vm0 = vcmp.ne.s32.totalorder %v6171_v28, %v5821_v9 }
 0x1f2   : > { %vm2459_vm2 = vmor %vm8184_vm7, %vm2443_vm13  ;;  %v6766_v0 = vsel %vm8188_vm11, %v6352_v7, 0.0  ;;  %v2429_v7 = vld [vmem:[%s5488_s3 + $0x68] sm:$0xff]  ;;  %vm2447_vm11 = vcmp.gt.f32.partialorder %v2431_v1, 0.0 }
 0x1f3   : > { %vm6756_vm1 = vmand %vm2459_vm2, %vm8185_vm4  ;;  %3237 = vmax.xlane.f32.xlu0 %v6760_v54  ;;  %2697 = vadd.xlane.f32.xlu1 %v6766_v0  ;;  %vm2444_vm2 = vcmp.gt.f32.partialorder %v2428_v12, 0.0 }
 0x1f4   : > { %vm2457_vm13 = vmor %vm6435_vm12, %vm2441_vm9  ;;  %vm8192_vm12 = vcmp.ne.s32.totalorder %v6409_v27, %v5821_v9  ;;  %v6812_v27 = vpop.f32.mrf.mxu0 }
 0x1f5   : > { %vm6776_vm7 = vmand %vm2457_vm13, %vm8189_vm0  ;;  %vm8195_vm13 = vnez %v8068_v45  ;;  %v8200_v45 = vmov 0 }
 0x1f6   : > { %v8191_v44 = vsel %vm6776_vm7, 4294967295, %v8190_v44  ;;  %vm2462_vm4 = vmor %vm8162_vm14, %vm2446_vm5  ;;  %vm8196_vm14 = vcmp.ne.s32.totalorder %v6494_v51, %v5821_v9  ;;  %v2755_v51 = vadd.f32 %v6760_v54, %v6790_v16 }
 0x1f7   : > { %vm6786_vm9 = vmand %vm2462_vm4, %vm8192_vm12  ;;  %2538 = vmax.xlane.f32.xlu0 %v6564_v34  ;;  %2869 = vmax.xlane.f32.xlu1 %v6790_v16  ;;  %vm2445_vm4 = vcmp.gt.f32.partialorder %v2429_v7, 0.0  ;;  %v6838_v34 = vpop.f32.mrf.mxu0 }
 0x1f8   : > { %v8194_v58 = vsel %vm6786_vm9, 4294967295, %v8193_v58  ;;  %vm2460_vm0 = vmor %vm8195_vm13, %vm2444_vm2  ;;  %vm8199_vm9 = vcmp.ne.s32.totalorder %v6561_v47, %v5821_v9  ;;  %vm8204_vm13 = vnez %v8091_v49  ;;  %v6833_v47 = vpop.f32.mrf.mxu1  ;;  %v8209_v49 = vld [vmem:[#allocation29_spill] sm:$0xff] }
 0x1f9   : > { %vm6799_vm5 = vmand %vm2460_vm0, %vm8196_vm14  ;;  %v6845_v43 = vpop.f32.mrf.mxu0  ;;  %vm8272_vm14 = vnez %v8132_v11 }
 0x1fa   : > { %vm2463_vm12 = vmor %vm8149_vm8, %vm2447_vm11  ;;  %vm8205_vm8 = vcmp.ne.s32.totalorder %v5824_v10, %v5821_v9  ;;  %v2753_v9 = vadd.f32 %v6833_v47, %v6812_v27  ;;  %v6843_v10 = vpop.f32.mrf.mxu1  ;;  %vm2576_vm11 = vcmask 7168  }
 0x1fb   : > { %vm6808_vm7 = vmand %vm2463_vm12, %vm8199_vm9  ;;  %2865 = vmax.xlane.f32.xlu1 %v6812_v27  ;;  %v2756_v63 = vadd.f32 %v6843_v10, %v6838_v34  ;;  %v6856_v33 = vpop.f32.mrf.mxu0  ;;  %vm8274_vm12 = vnez %v8145_v19 }
 0x1fc   : > { %v8201_v45 = vsel %vm6808_vm7, 4294967295, %v8200_v45  ;;  %vm8203_vm2 = vmmov %vm8199_vm9  ;;  %v2769_v50 = vmul.f32 %v2753_v9, %v8210_v41  ;;  %v6852_v52 = vpop.f32.mrf.mxu1 }
 0x1fd   : > { %8202 = vst [vmem:[#allocation32_spill] sm:$0xff] %v8201_v45  ;;  %v6818_v22 = vsel %vm8203_vm2, %v6384_v55, 0.0  ;;  %vm2461_vm0 = vmor %vm8204_vm13, %vm2445_vm4  ;;  %v2771_v55 = vmul.f32 %v2755_v51, %v8209_v49  ;;  %v2772_v6 = vmul.f32 %v2756_v63, %v8211_v2  ;;  %v2754_v26 = vadd.f32 %v6852_v52, %v6845_v43  ;;  %v6865_v39 = vpop.f32.mrf.mxu0  ;;  %v2659_v2 = vld [vmem:[#allocation3 + $0x10] sm:$0xff]  ;;  %v2664_v45 = vld [vmem:[#allocation3 + $0x38] sm:$0xff] }
 0x1fe   : > { %2703 = vadd.xlane.f32.xlu0 %v6818_v22  ;;  %vm6827_vm9 = vmand %vm2461_vm0, %vm8205_vm8  ;;  %v6858_v46 = vpop.f32.mrf.mxu1  ;;  %vm8273_vm4 = vnez %v8141_v21  ;;  %vm8275_vm2 = vnez %v8159_v57 }
 0x1ff   : > { %v8207_v53 = vsel %vm6827_vm9, 4294967295, %v8206_v53  ;;  %3233 = vmax.xlane.f32.xlu1 %v6833_v47  ;;  %v2759_v14 = vadd.f32 %v6858_v46, %v6856_v33  ;;  %v2770_v30 = vmul.f32 %v2754_v26, %v8212_v15  ;;  %v6880_v3 = vpop.f32.mrf.mxu0  ;;  %v2546_v26 = vld [vmem:[#allocation2 + $0x10] sm:$0xff] }
 0x200   : > { %8208 = vst [vmem:[#allocation31_spill] sm:$0xff] %v8207_v53  ;;  %v6871_v23 = vpop.f32.mrf.mxu1  ;;  %v2661_v53 = vld [vmem:[#allocation3 + $0x20] sm:$0xff] }
 0x201   : > { %v2775_v13 = vmul.f32 %v2759_v14, %v6313_v24  ;;  %v2757_v59 = vadd.f32 %v6871_v23, %v6865_v39  ;;  %v6885_v37 = vpop.f32.mrf.mxu0 }
 0x202   : > { %2699 = vadd.xlane.f32.xlu0 %v6469_v17  ;;  %v6875_v56 = vpop.f32.mrf.mxu1 }
 0x203   : > { %2789 = vadd.xlane.f32.xlu1 %v2771_v55  ;;  %v2773_v25 = vmul.f32 %v2757_v59, %v6365_v48  ;;  %v2760_v24 = vadd.f32 %v6875_v56, %v6880_v3  ;;  %v6892_v12 = vpop.f32.mrf.mxu0 }
 0x204   : > { %v6887_v40 = vpop.f32.mrf.mxu1 }
 0x205   : > { %v2776_v38 = vmul.f32 %v2760_v24, %v6442_v5  ;;  %v2758_v1 = vadd.f32 %v6887_v40, %v6885_v37  ;;  %v6901_v51 = vpop.f32.mrf.mxu0 }
 0x206   : > { %2871 = vmax.xlane.f32.xlu0 %v6838_v34  ;;  %v6894_v48 = vpop.f32.mrf.mxu1 }
 0x207   : > { %3239 = vmax.xlane.f32.xlu1 %v6843_v10  ;;  %v2763_v7 = vadd.f32 %v6894_v48, %v6892_v12  ;;  %v2774_v5 = vmul.f32 %v2758_v1, %v6513_v4 }
 0x208   : > { %v6907_v55 = vpop.f32.mrf.mxu1 }
 0x209   : > { %v2779_v49 = vmul.f32 %v2763_v7, %v6583_v20  ;;  %v2761_v9 = vadd.f32 %v6907_v55, %v6901_v51  ;;  %v2544_v7 = vld [vmem:[#allocation2] sm:$0xff] }
 0x20a   : > { %2867 = vmax.xlane.f32.xlu0 %v6845_v43  ;;  %v6911_v41 = vpop.f32.mrf.mxu1 }
 0x20b   : > { %2785 = vadd.xlane.f32.xlu1 %v2769_v50  ;;  %v6915_v50 = vpop.f32.mrf.mxu0  ;;  %v2777_v63 = vmul.f32 %v2761_v9, %v6629_v35 }
 0x20c   : > { %v2764_v4 = vadd.f32 %v6911_v41, %v6915_v50 }
 0x20d   : > { %v6921_v20 = vpop.f32.mrf.mxu0 }
 0x20e   : > { %3235 = vmax.xlane.f32.xlu0 %v6852_v52 }
 0x20f   : > { %2877 = vmax.xlane.f32.xlu1 %v6856_v33 }
 0x212   : > { %2791 = vadd.xlane.f32.xlu0 %v2772_v6  ;;  %v6923_v6 = vpop.f32.mrf.mxu1 }
 0x213   : > { %2873 = vmax.xlane.f32.xlu1 %v6865_v39  ;;  %v2762_v35 = vadd.f32 %v6923_v6, %v6921_v20 }
 0x214   : > { %v6932_v24 = vpop.f32.mrf.mxu1 }
 0x215   : > { %v2778_v9 = vmul.f32 %v2762_v35, %v6705_v62 }
 0x216   : > { %3245 = vmax.xlane.f32.xlu0 %v6858_v46 }
 0x217   : > { %2797 = vadd.xlane.f32.xlu1 %v2775_v13  ;;  %v2780_v13 = vmul.f32 %v2764_v4, %v6670_v18 }
 0x21a   : > { %2787 = vadd.xlane.f32.xlu0 %v2770_v30  ;;  %v6929_v30 = vpop.f32.mrf.mxu0 }
 0x21b   : > { %3247 = vmax.xlane.f32.xlu1 %v6875_v56  ;;  %v2767_v18 = vadd.f32 %v6932_v24, %v6929_v30 }
 0x21e   : > { %3241 = vmax.xlane.f32.xlu0 %v6871_v23 }
 0x21f   : > { %2793 = vadd.xlane.f32.xlu1 %v2773_v25  ;;  %v2657_v25 = vld [vmem:[#allocation3] sm:$0xff] }
 0x222   : > { %2879 = vmax.xlane.f32.xlu0 %v6880_v3 }
 0x223   : > { %3243 = vmax.xlane.f32.xlu1 %v6887_v40 }
 0x226   : > { %2875 = vmax.xlane.f32.xlu0 %v6885_v37 }
 0x227   : > { %2885 = vmax.xlane.f32.xlu1 %v6892_v12 }
 0x22a   : > { %2799 = vadd.xlane.f32.xlu0 %v2776_v38 }
 0x22b   : > { %2881 = vmax.xlane.f32.xlu1 %v6901_v51 }
 0x22e   : > { %3253 = vmax.xlane.f32.xlu0 %v6894_v48 }
 0x22f   : > { %2805 = vadd.xlane.f32.xlu1 %v2779_v49  ;;  %v6937_v49 = vpop.f32.mrf.mxu0 }
 0x232   : > { %2795 = vadd.xlane.f32.xlu0 %v2774_v5 }
 0x233   : > { %3255 = vmax.xlane.f32.xlu1 %v6911_v41 }
 0x236   : > { %3249 = vmax.xlane.f32.xlu0 %v6907_v55 }
 0x237   : > { %2801 = vadd.xlane.f32.xlu1 %v2777_v63  ;;  %v6942_v63 = vpop.f32.mrf.mxu1 }
 0x239   : > { %v2678_v14 = vpop.xlane.xlu1 %2677  ;;  %v2517_v59 = vpop.xlane.xlu0 %2516 }
 0x23a   : > { %2887 = vmax.xlane.f32.xlu0 %v6915_v50  ;;  %v2707_v15 = vadd.f32 %v2678_v14, %v2659_v2  ;;  %v2562_v38 = vmax.f32 %v2546_v26, %v2517_v59  ;;  %v2783_v26 = vmul.f32 %v2767_v18, %v6737_v36  ;;  %v2765_v14 = vadd.f32 %v6942_v63, %v6937_v49  ;;  %v6951_v59 = vpop.f32.mrf.mxu0 }
 0x23b   : > { %3251 = vmax.xlane.f32.xlu1 %v6923_v6 }
 0x23c   : > { %2723 = vst.msk [vmem:[#allocation3 + $0x10] sm:$0xff] %vm2576_vm11, %v2707_v15  ;;  %2579 = vst.msk [vmem:[#allocation2 + $0x10] sm:$0xff] %vm2576_vm11, %v2562_v38  ;;  %v2547_v15 = vld [vmem:[#allocation2 + $0x18] sm:$0xff] }
 0x23d   : > { %v2674_v1 = vpop.xlane.xlu1 %2673  ;;  %v2513_v4 = vpop.xlane.xlu0 %2512  ;;  %v2660_v38 = vld [vmem:[#allocation3 + $0x18] sm:$0xff] }
 0x23e   : > { %2883 = vmax.xlane.f32.xlu0 %v6921_v20  ;;  %v2705_v5 = vadd.f32 %v2674_v1, %v2657_v25  ;;  %v2560_v2 = vmax.f32 %v2544_v7, %v2513_v4  ;;  %v2781_v25 = vmul.f32 %v2765_v14, %v6766_v0  ;;  %v6954_v1 = vpop.f32.mrf.mxu1  ;;  %v2658_v4 = vld [vmem:[#allocation3 + $0x8] sm:$0xff] }
 0x23f   : > { %2893 = vmax.xlane.f32.xlu1 %v6929_v30 }
 0x240   : > { %2721 = vst.msk [vmem:[#allocation3] sm:$0xff] %vm2576_vm11, %v2705_v5  ;;  %2577 = vst.msk [vmem:[#allocation2] sm:$0xff] %vm2576_vm11, %v2560_v2  ;;  %v6959_v2 = vpop.f32.mrf.mxu0 }
 0x241   : > { %v2519_v62 = vpop.xlane.xlu0 %2518  ;;  %v2515_v36 = vpop.xlane.xlu1 %2514 }
 0x242   : > { %2807 = vadd.xlane.f32.xlu0 %v2780_v13  ;;  %v2563_v35 = vmax.f32 %v2547_v15, %v2519_v62  ;;  %v2545_v13 = vld [vmem:[#allocation2 + $0x8] sm:$0xff] }
 0x243   : > { %2889 = vmax.xlane.f32.xlu1 %v6937_v49  ;;  %v2561_v7 = vmax.f32 %v2545_v13, %v2515_v36  ;;  %v2548_v13 = vld [vmem:[#allocation2 + $0x20] sm:$0xff] }
 0x244   : > { %2580 = vst.msk [vmem:[#allocation2 + $0x18] sm:$0xff] %vm2576_vm11, %v2563_v35  ;;  %v2768_v35 = vadd.f32 %v6954_v1, %v6951_v59 }
 0x245   : > { %v2680_v5 = vpop.xlane.xlu0 %2679  ;;  %2578 = vst.msk [vmem:[#allocation2 + $0x8] sm:$0xff] %vm2576_vm11, %v2561_v7 }
 0x246   : > { %2803 = vadd.xlane.f32.xlu0 %v2778_v9  ;;  %v2708_v18 = vadd.f32 %v2680_v5, %v2660_v38  ;;  %v2550_v9 = vld [vmem:[#allocation2 + $0x30] sm:$0xff]  ;;  %v2784_v36 = vmul.f32 %v2768_v35, %v6818_v22  ;;  %v2551_v5 = vld [vmem:[#allocation2 + $0x38] sm:$0xff] }
 0x247   : > { %2813 = vadd.xlane.f32.xlu1 %v2783_v26  ;;  %v6961_v26 = vpop.f32.mrf.mxu1  ;;  %v2525_v0 = vpop.xlane.xlu1 %2524 }
 0x248   : > { %2724 = vst.msk [vmem:[#allocation3 + $0x18] sm:$0xff] %vm2576_vm11, %v2708_v18  ;;  %v2566_v15 = vmax.f32 %v2550_v9, %v2525_v0  ;;  %v2766_v38 = vadd.f32 %v6961_v26, %v6959_v2  ;;  %v2663_v18 = vld [vmem:[#allocation3 + $0x30] sm:$0xff] }
 0x249   : > { %v2676_v14 = vpop.xlane.xlu0 %2675 }
 0x24a   : > { %3257 = vmax.xlane.f32.xlu0 %v6942_v63  ;;  %v2706_v62 = vadd.f32 %v2676_v14, %v2658_v4  ;;  %2583 = vst.msk [vmem:[#allocation2 + $0x30] sm:$0xff] %vm2576_vm11, %v2566_v15  ;;  %v2782_v14 = vmul.f32 %v2766_v38, %v6469_v17 }
 0x24b   : > { %2809 = vadd.xlane.f32.xlu1 %v2781_v25 }
 0x24c   : > { %2722 = vst.msk [vmem:[#allocation3 + $0x8] sm:$0xff] %vm2576_vm11, %v2706_v62  ;;  %v2521_v25 = vpop.xlane.xlu1 %2520  ;;  %v2549_v62 = vld [vmem:[#allocation2 + $0x28] sm:$0xff] }
 0x24d   : > { %v2564_v7 = vmax.f32 %v2548_v13, %v2521_v25 }
 0x24e   : > { %2895 = vmax.xlane.f32.xlu0 %v6951_v59 }
 0x24f   : > { %3259 = vmax.xlane.f32.xlu1 %v6961_v26  ;;  %2581 = vst.msk [vmem:[#allocation2 + $0x20] sm:$0xff] %vm2576_vm11, %v2564_v7  ;;  %v2554_v7 = vld [vmem:[#allocation2 + $0x50] sm:$0xff] }
 0x251   : > { %v2527_v9 = vpop.xlane.xlu0 %2526  ;;  %v2686_v0 = vpop.xlane.xlu1 %2685 }
 0x252   : > { %2891 = vmax.xlane.f32.xlu0 %v6959_v2  ;;  %v2567_v4 = vmax.f32 %v2551_v5, %v2527_v9  ;;  %v2711_v15 = vadd.f32 %v2686_v0, %v2663_v18  ;;  %v2662_v18 = vld [vmem:[#allocation3 + $0x28] sm:$0xff]  ;;  %v2552_v9 = vld [vmem:[#allocation2 + $0x40] sm:$0xff] }
 0x253   : > { %3263 = vmax.xlane.f32.xlu1 %v6954_v1 }
 0x254   : > { %2584 = vst.msk [vmem:[#allocation2 + $0x38] sm:$0xff] %vm2576_vm11, %v2567_v4  ;;  %2727 = vst.msk [vmem:[#allocation3 + $0x30] sm:$0xff] %vm2576_vm11, %v2711_v15  ;;  %v2555_v15 = vld [vmem:[#allocation2 + $0x58] sm:$0xff] }
 0x256   : > { %3261 = vmax.xlane.f32.xlu0 %v6932_v24 }
 0x257   : > { %v2682_v35 = vpop.xlane.xlu1 %2681 }
 0x258   : > { %v2523_v22 = vpop.xlane.xlu0 %2522  ;;  %v2709_v25 = vadd.f32 %v2682_v35, %v2661_v53 }
 0x259   : > { %v2565_v13 = vmax.f32 %v2549_v62, %v2523_v22  ;;  %v2667_v62 = vld [vmem:[#allocation3 + $0x50] sm:$0xff] }
 0x25a   : > { %2815 = vadd.xlane.f32.xlu0 %v2784_v36  ;;  %2725 = vst.msk [vmem:[#allocation3 + $0x20] sm:$0xff] %vm2576_vm11, %v2709_v25  ;;  %v2553_v25 = vld [vmem:[#allocation2 + $0x48] sm:$0xff] }
 0x25b   : > { %2582 = vst.msk [vmem:[#allocation2 + $0x28] sm:$0xff] %vm2576_vm11, %v2565_v13 }
 0x25c   : > { %v2533_v17 = vpop.xlane.xlu1 %2532 }
 0x25d   : > { %v2688_v36 = vpop.xlane.xlu0 %2687  ;;  %v2570_v5 = vmax.f32 %v2554_v7, %v2533_v17  ;;  %v2665_v7 = vld [vmem:[#allocation3 + $0x40] sm:$0xff] }
 0x25e   : > { %2811 = vadd.xlane.f32.xlu0 %v2782_v14  ;;  %v2712_v38 = vadd.f32 %v2688_v36, %v2664_v45 }
 0x25f   : > { %2587 = vst.msk [vmem:[#allocation2 + $0x50] sm:$0xff] %vm2576_vm11, %v2570_v5 }
 0x260   : > { %2728 = vst.msk [vmem:[#allocation3 + $0x38] sm:$0xff] %vm2576_vm11, %v2712_v38  ;;  %v2529_v0 = vpop.xlane.xlu1 %2528 }
 0x261   : > { %v2684_v4 = vpop.xlane.xlu0 %2683  ;;  %v2568_v53 = vmax.f32 %v2552_v9, %v2529_v0  ;;  %v2558_v9 = vld [vmem:[#allocation2 + $0x70] sm:$0xff] }
 0x262   : > { %v2710_v14 = vadd.f32 %v2684_v4, %v2662_v18  ;;  %v2668_v18 = vld [vmem:[#allocation3 + $0x58] sm:$0xff] }
 0x263   : > { %2585 = vst.msk [vmem:[#allocation2 + $0x40] sm:$0xff] %vm2576_vm11, %v2568_v53 }
 0x264   : > { %2726 = vst.msk [vmem:[#allocation3 + $0x28] sm:$0xff] %vm2576_vm11, %v2710_v14 }
 0x265   : > { %v2535_v22 = vpop.xlane.xlu0 %2534 }
 0x266   : > { %v2694_v35 = vpop.xlane.xlu1 %2693  ;;  %v2571_v45 = vmax.f32 %v2555_v15, %v2535_v22  ;;  %v2666_v15 = vld [vmem:[#allocation3 + $0x48] sm:$0xff] }
 0x267   : > { %v2715_v13 = vadd.f32 %v2694_v35, %v2667_v62  ;;  %v2556_v62 = vld [vmem:[#allocation2 + $0x60] sm:$0xff] }
 0x268   : > { %2588 = vst.msk [vmem:[#allocation2 + $0x58] sm:$0xff] %vm2576_vm11, %v2571_v45 }
 0x269   : > { %2731 = vst.msk [vmem:[#allocation3 + $0x50] sm:$0xff] %vm2576_vm11, %v2715_v13  ;;  %v2531_v36 = vpop.xlane.xlu0 %2530 }
 0x26a   : > { %v2569_v38 = vmax.f32 %v2553_v25, %v2531_v36  ;;  %v2559_v25 = vld [vmem:[#allocation2 + $0x78] sm:$0xff] }
 0x26b   : > { %v2690_v17 = vpop.xlane.xlu1 %2689 }
 0x26c   : > { %v2713_v5 = vadd.f32 %v2690_v17, %v2665_v7  ;;  %2586 = vst.msk [vmem:[#allocation2 + $0x48] sm:$0xff] %vm2576_vm11, %v2569_v38  ;;  %v2671_v7 = vld [vmem:[#allocation3 + $0x70] sm:$0xff] }
 0x26e   : > { %2729 = vst.msk [vmem:[#allocation3 + $0x40] sm:$0xff] %vm2576_vm11, %v2713_v5 }
 0x26f   : > { %v2541_v0 = vpop.xlane.xlu1 %2540 }
 0x270   : > { %v2696_v4 = vpop.xlane.xlu0 %2695  ;;  %v2574_v53 = vmax.f32 %v2558_v9, %v2541_v0  ;;  %v2669_v9 = vld [vmem:[#allocation3 + $0x60] sm:$0xff] }
 0x271   : > { %v2716_v14 = vadd.f32 %v2696_v4, %v2668_v18  ;;  %v6993_v18 = vld [vmem:[#allocation7 + $0x10] sm:$0xff] }
 0x272   : > { %2591 = vst.msk [vmem:[#allocation2 + $0x70] sm:$0xff] %vm2576_vm11, %v2574_v53 }
 0x273   : > { %2732 = vst.msk [vmem:[#allocation3 + $0x58] sm:$0xff] %vm2576_vm11, %v2716_v14  ;;  %v2537_v35 = vpop.xlane.xlu1 %2536 }
 0x274   : > { %v2692_v22 = vpop.xlane.xlu0 %2691  ;;  %v2572_v13 = vmax.f32 %v2556_v62, %v2537_v35  ;;  %v7000_v62 = vld [vmem:[#allocation5 + $0x10] sm:$0xff] }
 0x275   : > { %v2714_v45 = vadd.f32 %v2692_v22, %v2666_v15  ;;  %v2557_v15 = vld [vmem:[#allocation2 + $0x68] sm:$0xff]  ;;  %v7046_v22 = vld [vmem:[#allocation7 + $0x18] sm:$0xff] }
 0x276   : > { %2589 = vst.msk [vmem:[#allocation2 + $0x60] sm:$0xff] %vm2576_vm11, %v2572_v13  ;;  %8220 = vst [vmem:[#allocation38_spill] sm:$0xff] %v7046_v22 }
 0x277   : > { %2730 = vst.msk [vmem:[#allocation3 + $0x48] sm:$0xff] %vm2576_vm11, %v2714_v45 }
 0x278   : > { %v2543_v36 = vpop.xlane.xlu0 %2542  ;;  %v2702_v17 = vpop.xlane.xlu1 %2701 }
 0x279   : > { %v2575_v38 = vmax.f32 %v2559_v25, %v2543_v36  ;;  %v2719_v5 = vadd.f32 %v2702_v17, %v2671_v7  ;;  %v2672_v7 = vld [vmem:[#allocation3 + $0x78] sm:$0xff]  ;;  %v7011_v36 = vld [vmem:[#allocation5] sm:$0xff] }
 0x27a   : > { %8213 = vst [vmem:[#allocation29_spill] sm:$0xff] %v7011_v36 }
 0x27b   : > { %2592 = vst.msk [vmem:[#allocation2 + $0x78] sm:$0xff] %vm2576_vm11, %v2575_v38  ;;  %2735 = vst.msk [vmem:[#allocation3 + $0x70] sm:$0xff] %vm2576_vm11, %v2719_v5 }
 0x27c   : > { %v3238_v4 = vpop.xlane.xlu0 %3237  ;;  %v2698_v0 = vpop.xlane.xlu1 %2697 }
 0x27d   : > { %v6998_v14 = vmax.f32 %v6993_v18, %v3238_v4  ;;  %v2717_v53 = vadd.f32 %v2698_v0, %v2669_v9  ;;  %v2670_v0 = vld [vmem:[#allocation3 + $0x68] sm:$0xff] }
 0x27f   : > { %3571 = vst.msk [vmem:[#allocation7 + $0x10] sm:$0xff] %vm2576_vm11, %v6998_v14  ;;  %2733 = vst.msk [vmem:[#allocation3 + $0x60] sm:$0xff] %vm2576_vm11, %v2717_v53  ;;  %3293 = vperm.xlu0 %4858, %v6998_v14   ;;  %v7022_v53 = vld [vmem:[#allocation7] sm:$0xff] }
 0x280   : > { %v2539_v35 = vpop.xlane.xlu0 %2538  ;;  %v2870_v45 = vpop.xlane.xlu1 %2869  ;;  %8215 = vst [vmem:[#allocation33_spill] sm:$0xff] %v7022_v53 }
 0x281   : > { %v2573_v13 = vmax.f32 %v2557_v15, %v2539_v35  ;;  %v7009_v25 = vmax.f32 %v7000_v62, %v2870_v45 }
 0x283   : > { %2590 = vst.msk [vmem:[#allocation2 + $0x68] sm:$0xff] %vm2576_vm11, %v2573_v13  ;;  %3203 = vst.msk [vmem:[#allocation5 + $0x10] sm:$0xff] %vm2576_vm11, %v7009_v25  ;;  %2925 = vperm.xlu1 %4859, %v7009_v25  }
 0x284   : > { %v2866_v5 = vpop.xlane.xlu1 %2865 }
 0x285   : > { %v7020_v4 = vmax.f32 %v7011_v36, %v2866_v5  ;;  %v2739_v5 = vld [vmem:[#allocation4 + $0x10] sm:$0xff]  ;;  %v7113_v36 = vld [vmem:[#allocation7 + $0x38] sm:$0xff] }
 0x286   : > { %8232 = vst [vmem:[#allocation50_spill] sm:$0xff] %v7113_v36 }
 0x287   : > { %v2704_v38 = vpop.xlane.xlu0 %2703  ;;  %8214 = vst [vmem:[#allocation30_spill] sm:$0xff] %v7020_v4  ;;  %3201 = vst.msk [vmem:[#allocation5] sm:$0xff] %vm2576_vm11, %v7020_v4  ;;  %2915 = vperm.xlu1 %4859, %v7020_v4  }
 0x288   : > { %v2720_v9 = vadd.f32 %v2704_v38, %v2672_v7  ;;  %v3234_v45 = vpop.xlane.xlu1 %3233  ;;  %v7033_v38 = vld [vmem:[#allocation5 + $0x18] sm:$0xff] }
 0x289   : > { %v7031_v7 = vmax.f32 %v7022_v53, %v3234_v45  ;;  %8217 = vst [vmem:[#allocation35_spill] sm:$0xff] %v7033_v38  ;;  %v7044_v45 = vld [vmem:[#allocation5 + $0x8] sm:$0xff]  ;;  %v2737_v53 = vld [vmem:[#allocation4] sm:$0xff] }
 0x28a   : > { %2736 = vst.msk [vmem:[#allocation3 + $0x78] sm:$0xff] %vm2576_vm11, %v2720_v9  ;;  %8219 = vst [vmem:[#allocation37_spill] sm:$0xff] %v7044_v45 }
 0x28b   : > { %v2700_v35 = vpop.xlane.xlu0 %2699  ;;  %8216 = vst [vmem:[#allocation34_spill] sm:$0xff] %v7031_v7  ;;  %3569 = vst.msk [vmem:[#allocation7] sm:$0xff] %vm2576_vm11, %v7031_v7  ;;  %3283 = vperm.xlu0 %4858, %v7031_v7  }
 0x28c   : > { %v2718_v13 = vadd.f32 %v2700_v35, %v2670_v0  ;;  %v2790_v17 = vpop.xlane.xlu1 %2789 }
 0x28d   : > { %v2819_v35 = vadd.f32 %v2790_v17, %v2739_v5  ;;  %v7060_v5 = vld [vmem:[#allocation7 + $0x8] sm:$0xff] }
 0x28e   : > { %2734 = vst.msk [vmem:[#allocation3 + $0x68] sm:$0xff] %vm2576_vm11, %v2718_v13  ;;  %8223 = vst [vmem:[#allocation41_spill] sm:$0xff] %v7060_v5  ;;  %v2740_v13 = vld [vmem:[#allocation4 + $0x18] sm:$0xff] }
 0x28f   : > { %v2872_v15 = vpop.xlane.xlu0 %2871  ;;  %2835 = vst.msk [vmem:[#allocation4 + $0x10] sm:$0xff] %vm2576_vm11, %v2819_v35 }
 0x290   : > { %v7042_v0 = vmax.f32 %v7033_v38, %v2872_v15  ;;  %v3240_v7 = vpop.xlane.xlu1 %3239 }
 0x291   : > { %v7058_v17 = vmax.f32 %v7046_v22, %v3240_v7 }
 0x292   : > { %8218 = vst [vmem:[#allocation36_spill] sm:$0xff] %v7042_v0  ;;  %3204 = vst.msk [vmem:[#allocation5 + $0x18] sm:$0xff] %vm2576_vm11, %v7042_v0  ;;  %2930 = vperm.xlu1 %4859, %v7042_v0  }
 0x293   : > { %v2868_v9 = vpop.xlane.xlu0 %2867  ;;  %8222 = vst [vmem:[#allocation40_spill] sm:$0xff] %v7058_v17  ;;  %3572 = vst.msk [vmem:[#allocation7 + $0x18] sm:$0xff] %vm2576_vm11, %v7058_v17 }
 0x294   : > { %v7055_v15 = vmax.f32 %v7044_v45, %v2868_v9  ;;  %v2786_v9 = vpop.xlane.xlu1 %2785  ;;  %v7075_v45 = vld [vmem:[#allocation5 + $0x30] sm:$0xff] }
 0x295   : > { %v2817_v38 = vadd.f32 %v2786_v9, %v2737_v53  ;;  %8225 = vst [vmem:[#allocation43_spill] sm:$0xff] %v7075_v45  ;;  %v7086_v53 = vld [vmem:[#allocation7 + $0x30] sm:$0xff]  ;;  %v7088_v9 = vld [vmem:[#allocation5 + $0x20] sm:$0xff] }
 0x296   : > { %8221 = vst [vmem:[#allocation39_spill] sm:$0xff] %v7055_v15  ;;  %3202 = vst.msk [vmem:[#allocation5 + $0x8] sm:$0xff] %vm2576_vm11, %v7055_v15  ;;  %2920 = vperm.xlu0 %4858, %v7055_v15   ;;  %3298 = vperm.xlu1 %4859, %v7058_v17   ;;  %v7111_v15 = vld [vmem:[#allocation7 + $0x20] sm:$0xff] }
 0x297   : > { %v3236_v7 = vpop.xlane.xlu0 %3235  ;;  %2833 = vst.msk [vmem:[#allocation4] sm:$0xff] %vm2576_vm11, %v2817_v38  ;;  %8227 = vst [vmem:[#allocation45_spill] sm:$0xff] %v7086_v53 }
 0x298   : > { %v7073_v0 = vmax.f32 %v7060_v5, %v3236_v7  ;;  %v2878_v17 = vpop.xlane.xlu1 %2877  ;;  %8228 = vst [vmem:[#allocation46_spill] sm:$0xff] %v7088_v9  ;;  %v2743_v5 = vld [vmem:[#allocation4 + $0x30] sm:$0xff]  ;;  %8231 = vst [vmem:[#allocation49_spill] sm:$0xff] %v7111_v15 }
 0x299   : > { %v7084_v7 = vmax.f32 %v7075_v45, %v2878_v17 }
 0x29a   : > { %8224 = vst [vmem:[#allocation42_spill] sm:$0xff] %v7073_v0  ;;  %3570 = vst.msk [vmem:[#allocation7 + $0x8] sm:$0xff] %vm2576_vm11, %v7073_v0  ;;  %3288 = vperm.xlu1 %4859, %v7073_v0  }
 0x29b   : > { %v2792_v35 = vpop.xlane.xlu0 %2791  ;;  %8226 = vst [vmem:[#allocation44_spill] sm:$0xff] %v7084_v7  ;;  %3207 = vst.msk [vmem:[#allocation5 + $0x30] sm:$0xff] %vm2576_vm11, %v7084_v7  ;;  %2945 = vperm.xlu0 %4858, %v7084_v7  }
 0x29c   : > { %v2820_v22 = vadd.f32 %v2792_v35, %v2740_v13  ;;  %v2874_v0 = vpop.xlane.xlu1 %2873  ;;  %v2738_v35 = vld [vmem:[#allocation4 + $0x8] sm:$0xff] }
 0x29d   : > { %v7100_v17 = vmax.f32 %v7088_v9, %v2874_v0 }
 0x29e   : > { %2836 = vst.msk [vmem:[#allocation4 + $0x18] sm:$0xff] %vm2576_vm11, %v2820_v22 }
 0x29f   : > { %v3246_v38 = vpop.xlane.xlu0 %3245  ;;  %8230 = vst [vmem:[#allocation48_spill] sm:$0xff] %v7100_v17  ;;  %3205 = vst.msk [vmem:[#allocation5 + $0x20] sm:$0xff] %vm2576_vm11, %v7100_v17 }
 0x2a0   : > { %v7097_v13 = vmax.f32 %v7086_v53, %v3246_v38  ;;  %v2798_v7 = vpop.xlane.xlu1 %2797  ;;  %v7168_v53 = vld [vmem:[#allocation7 + $0x50] sm:$0xff] }
 0x2a1   : > { %v2823_v45 = vadd.f32 %v2798_v7, %v2743_v5  ;;  %v2741_v5 = vld [vmem:[#allocation4 + $0x20] sm:$0xff]  ;;  %v7140_v7 = vld [vmem:[#allocation7 + $0x28] sm:$0xff]  ;;  %8243 = vst [vmem:[#allocation61_spill] sm:$0xff] %v7168_v53 }
 0x2a2   : > { %8229 = vst [vmem:[#allocation47_spill] sm:$0xff] %v7097_v13  ;;  %3575 = vst.msk [vmem:[#allocation7 + $0x30] sm:$0xff] %vm2576_vm11, %v7097_v13  ;;  %3313 = vperm.xlu0 %4858, %v7097_v13  }
 0x2a3   : > { %v2788_v38 = vpop.xlane.xlu0 %2787  ;;  %2839 = vst.msk [vmem:[#allocation4 + $0x30] sm:$0xff] %vm2576_vm11, %v2823_v45  ;;  %8238 = vst [vmem:[#allocation56_spill] sm:$0xff] %v7140_v7 }
 0x2a4   : > { %v2818_v0 = vadd.f32 %v2788_v38, %v2738_v35  ;;  %v3248_v22 = vpop.xlane.xlu1 %3247  ;;  %v7124_v35 = vld [vmem:[#allocation5 + $0x38] sm:$0xff] }
 0x2a5   : > { %v7122_v13 = vmax.f32 %v7113_v36, %v3248_v22  ;;  %8235 = vst [vmem:[#allocation53_spill] sm:$0xff] %v7124_v35 }
 0x2a6   : > { %2834 = vst.msk [vmem:[#allocation4 + $0x8] sm:$0xff] %vm2576_vm11, %v2818_v0  ;;  %2935 = vperm.xlu0 %4858, %v7100_v17   ;;  %v7138_v17 = vld [vmem:[#allocation5 + $0x28] sm:$0xff] }
 0x2a7   : > { %v3242_v4 = vpop.xlane.xlu0 %3241  ;;  %8234 = vst [vmem:[#allocation52_spill] sm:$0xff] %v7122_v13  ;;  %3576 = vst.msk [vmem:[#allocation7 + $0x38] sm:$0xff] %vm2576_vm11, %v7122_v13 }
 0x2a8   : > { %v7119_v9 = vmax.f32 %v7111_v15, %v3242_v4  ;;  %v2794_v22 = vpop.xlane.xlu1 %2793  ;;  %8237 = vst [vmem:[#allocation55_spill] sm:$0xff] %v7138_v17  ;;  %v7170_v15 = vld [vmem:[#allocation5 + $0x40] sm:$0xff] }
 0x2a9   : > { %v2821_v0 = vadd.f32 %v2794_v22, %v2741_v5  ;;  %v2744_v22 = vld [vmem:[#allocation4 + $0x38] sm:$0xff]  ;;  %8244 = vst [vmem:[#allocation62_spill] sm:$0xff] %v7170_v15 }
 0x2aa   : > { %8233 = vst [vmem:[#allocation51_spill] sm:$0xff] %v7119_v9  ;;  %3573 = vst.msk [vmem:[#allocation7 + $0x20] sm:$0xff] %vm2576_vm11, %v7119_v9  ;;  %3303 = vperm.xlu0 %4858, %v7119_v9   ;;  %v7154_v9 = vld [vmem:[#allocation5 + $0x50] sm:$0xff] }
 0x2ab   : > { %v2880_v4 = vpop.xlane.xlu0 %2879  ;;  %2837 = vst.msk [vmem:[#allocation4 + $0x20] sm:$0xff] %vm2576_vm11, %v2821_v0  ;;  %8241 = vst [vmem:[#allocation59_spill] sm:$0xff] %v7154_v9  ;;  %v7197_v0 = vld [vmem:[#allocation7 + $0x58] sm:$0xff] }
 0x2ac   : > { %v7136_v38 = vmax.f32 %v7124_v35, %v2880_v4  ;;  %v3244_v36 = vpop.xlane.xlu1 %3243  ;;  %8248 = vst [vmem:[#allocation66_spill] sm:$0xff] %v7197_v0 }
 0x2ad   : > { %v7152_v5 = vmax.f32 %v7140_v7, %v3244_v36 }
 0x2ae   : > { %8236 = vst [vmem:[#allocation54_spill] sm:$0xff] %v7136_v38  ;;  %3208 = vst.msk [vmem:[#allocation5 + $0x38] sm:$0xff] %vm2576_vm11, %v7136_v38  ;;  %2950 = vperm.xlu1 %4859, %v7136_v38  }
 0x2af   : > { %v2876_v45 = vpop.xlane.xlu0 %2875  ;;  %8240 = vst [vmem:[#allocation58_spill] sm:$0xff] %v7152_v5  ;;  %3574 = vst.msk [vmem:[#allocation7 + $0x28] sm:$0xff] %vm2576_vm11, %v7152_v5 }
 0x2b0   : > { %v7149_v4 = vmax.f32 %v7138_v17, %v2876_v45  ;;  %v2886_v36 = vpop.xlane.xlu1 %2885  ;;  %v2742_v17 = vld [vmem:[#allocation4 + $0x28] sm:$0xff] }
 0x2b1   : > { %v7166_v35 = vmax.f32 %v7154_v9, %v2886_v36 }
 0x2b2   : > { %8239 = vst [vmem:[#allocation57_spill] sm:$0xff] %v7149_v4  ;;  %3206 = vst.msk [vmem:[#allocation5 + $0x28] sm:$0xff] %vm2576_vm11, %v7149_v4  ;;  %3318 = vperm.xlu1 %4859, %v7122_v13   ;;  %v7195_v13 = vld [vmem:[#allocation7 + $0x40] sm:$0xff] }
 0x2b3   : > { %v2800_v45 = vpop.xlane.xlu0 %2799  ;;  %8242 = vst [vmem:[#allocation60_spill] sm:$0xff] %v7166_v35  ;;  %3211 = vst.msk [vmem:[#allocation5 + $0x50] sm:$0xff] %vm2576_vm11, %v7166_v35  ;;  %2965 = vperm.xlu0 %4858, %v7166_v35  }
 0x2b4   : > { %v2824_v38 = vadd.f32 %v2800_v45, %v2744_v22  ;;  %v2882_v45 = vpop.xlane.xlu1 %2881  ;;  %8247 = vst [vmem:[#allocation65_spill] sm:$0xff] %v7195_v13 }
 0x2b5   : > { %v7183_v7 = vmax.f32 %v7170_v15, %v2882_v45 }
 0x2b6   : > { %2840 = vst.msk [vmem:[#allocation4 + $0x38] sm:$0xff] %vm2576_vm11, %v2824_v38  ;;  %2940 = vperm.xlu1 %4859, %v7149_v4   ;;  %v2747_v38 = vld [vmem:[#allocation4 + $0x50] sm:$0xff] }
 0x2b7   : > { %v3254_v22 = vpop.xlane.xlu0 %3253  ;;  %8246 = vst [vmem:[#allocation64_spill] sm:$0xff] %v7183_v7  ;;  %3209 = vst.msk [vmem:[#allocation5 + $0x40] sm:$0xff] %vm2576_vm11, %v7183_v7 }
 0x2b8   : > { %v7180_v36 = vmax.f32 %v7168_v53, %v3254_v22  ;;  %v2806_v45 = vpop.xlane.xlu1 %2805 }
 0x2b9   : > { %v2827_v4 = vadd.f32 %v2806_v45, %v2747_v38  ;;  %v2745_v38 = vld [vmem:[#allocation4 + $0x40] sm:$0xff] }
 0x2ba   : > { %8245 = vst [vmem:[#allocation63_spill] sm:$0xff] %v7180_v36  ;;  %3579 = vst.msk [vmem:[#allocation7 + $0x50] sm:$0xff] %vm2576_vm11, %v7180_v36  ;;  %3308 = vperm.xlu1 %4859, %v7152_v5   ;;  %3333 = vperm.xlu0 %4858, %v7180_v36   ;;  %v7253_v5 = vld [vmem:[#allocation5 + $0x60] sm:$0xff] }
 0x2bb   : > { %v2796_v22 = vpop.xlane.xlu0 %2795  ;;  %2843 = vst.msk [vmem:[#allocation4 + $0x50] sm:$0xff] %vm2576_vm11, %v2827_v4  ;;  %8259 = vst [vmem:[#allocation77_spill] sm:$0xff] %v7253_v5 }
 0x2bc   : > { %v2822_v35 = vadd.f32 %v2796_v22, %v2742_v17  ;;  %v3256_v15 = vpop.xlane.xlu1 %3255  ;;  %v7208_v17 = vld [vmem:[#allocation5 + $0x58] sm:$0xff]  ;;  %v7223_v22 = vld [vmem:[#allocation5 + $0x48] sm:$0xff] }
 0x2bd   : > { %v7206_v36 = vmax.f32 %v7197_v0, %v3256_v15  ;;  %8251 = vst [vmem:[#allocation69_spill] sm:$0xff] %v7208_v17  ;;  %8253 = vst [vmem:[#allocation71_spill] sm:$0xff] %v7223_v22 }
 0x2be   : > { %2838 = vst.msk [vmem:[#allocation4 + $0x28] sm:$0xff] %vm2576_vm11, %v2822_v35  ;;  %2955 = vperm.xlu0 %4858, %v7183_v7   ;;  %v2746_v7 = vld [vmem:[#allocation4 + $0x48] sm:$0xff] }
 0x2bf   : > { %v3250_v9 = vpop.xlane.xlu0 %3249  ;;  %8250 = vst [vmem:[#allocation68_spill] sm:$0xff] %v7206_v36  ;;  %3580 = vst.msk [vmem:[#allocation7 + $0x58] sm:$0xff] %vm2576_vm11, %v7206_v36  ;;  %3338 = vperm.xlu1 %4859, %v7206_v36  }
 0x2c0   : > { %v7203_v53 = vmax.f32 %v7195_v13, %v3250_v9  ;;  %v2802_v9 = vpop.xlane.xlu1 %2801  ;;  %v7225_v13 = vld [vmem:[#allocation7 + $0x48] sm:$0xff] }
 0x2c1   : > { %v2825_v45 = vadd.f32 %v2802_v9, %v2745_v38  ;;  %8254 = vst [vmem:[#allocation72_spill] sm:$0xff] %v7225_v13  ;;  %v2748_v9 = vld [vmem:[#allocation4 + $0x58] sm:$0xff] }
 0x2c2   : > { %8249 = vst [vmem:[#allocation67_spill] sm:$0xff] %v7203_v53  ;;  %3577 = vst.msk [vmem:[#allocation7 + $0x40] sm:$0xff] %vm2576_vm11, %v7203_v53  ;;  %3323 = vperm.xlu0 %4858, %v7203_v53   ;;  %v7239_v53 = vld [vmem:[#allocation5 + $0x70] sm:$0xff] }
 0x2c3   : > { %v2888_v15 = vpop.xlane.xlu0 %2887  ;;  %2841 = vst.msk [vmem:[#allocation4 + $0x40] sm:$0xff] %vm2576_vm11, %v2825_v45  ;;  %8257 = vst [vmem:[#allocation75_spill] sm:$0xff] %v7239_v53 }
 0x2c4   : > { %v7221_v4 = vmax.f32 %v7208_v17, %v2888_v15  ;;  %v3252_v0 = vpop.xlane.xlu1 %3251 }
 0x2c5   : > { %v7237_v38 = vmax.f32 %v7225_v13, %v3252_v0  ;;  %v7265_v13 = vld [vmem:[#allocation7 + $0x60] sm:$0xff] }
 0x2c6   : > { %8252 = vst [vmem:[#allocation70_spill] sm:$0xff] %v7221_v4  ;;  %3212 = vst.msk [vmem:[#allocation5 + $0x58] sm:$0xff] %vm2576_vm11, %v7221_v4  ;;  %2970 = vperm.xlu0 %4858, %v7221_v4  }
 0x2c7   : > { %v2884_v36 = vpop.xlane.xlu0 %2883  ;;  %8256 = vst [vmem:[#allocation74_spill] sm:$0xff] %v7237_v38  ;;  %3578 = vst.msk [vmem:[#allocation7 + $0x48] sm:$0xff] %vm2576_vm11, %v7237_v38 }
 0x2c8   : > { %v7234_v15 = vmax.f32 %v7223_v22, %v2884_v36  ;;  %v2894_v0 = vpop.xlane.xlu1 %2893  ;;  %8261 = vst [vmem:[#allocation79_spill] sm:$0xff] %v7265_v13 }
 0x2c9   : > { %v7251_v17 = vmax.f32 %v7239_v53, %v2894_v0 }
 0x2ca   : > { %8255 = vst [vmem:[#allocation73_spill] sm:$0xff] %v7234_v15  ;;  %3210 = vst.msk [vmem:[#allocation5 + $0x48] sm:$0xff] %vm2576_vm11, %v7234_v15  ;;  %2960 = vperm.xlu1 %4859, %v7234_v15   ;;  %v2751_v15 = vld [vmem:[#allocation4 + $0x70] sm:$0xff] }
 0x2cb   : > { %v2808_v36 = vpop.xlane.xlu0 %2807  ;;  %8258 = vst [vmem:[#allocation76_spill] sm:$0xff] %v7251_v17  ;;  %3215 = vst.msk [vmem:[#allocation5 + $0x70] sm:$0xff] %vm2576_vm11, %v7251_v17  ;;  %2985 = vperm.xlu0 %4858, %v7251_v17   ;;  %v2749_v17 = vld [vmem:[#allocation4 + $0x60] sm:$0xff] }
 0x2cc   : > { %v2828_v4 = vadd.f32 %v2808_v36, %v2748_v9  ;;  %v2890_v9 = vpop.xlane.xlu1 %2889 }
 0x2cd   : > { %v7263_v0 = vmax.f32 %v7253_v5, %v2890_v9  ;;  %v7276_v9 = vld [vmem:[#allocation5 + $0x78] sm:$0xff] }
 0x2ce   : > { %2844 = vst.msk [vmem:[#allocation4 + $0x58] sm:$0xff] %vm2576_vm11, %v2828_v4  ;;  %3328 = vperm.xlu1 %4859, %v7237_v38   ;;  %8262 = vst [vmem:[#allocation80_spill] sm:$0xff] %v7276_v9 }
 0x2cf   : > { %v2804_v45 = vpop.xlane.xlu0 %2803  ;;  %8260 = vst [vmem:[#allocation78_spill] sm:$0xff] %v7263_v0  ;;  %3213 = vst.msk [vmem:[#allocation5 + $0x60] sm:$0xff] %vm2576_vm11, %v7263_v0 }
 0x2d0   : > { %v2826_v36 = vadd.f32 %v2804_v45, %v2746_v7  ;;  %v2814_v38 = vpop.xlane.xlu1 %2813 }
 0x2d1   : > { %v2831_v45 = vadd.f32 %v2814_v38, %v2751_v15  ;;  %v7288_v15 = vld [vmem:[#allocation7 + $0x68] sm:$0xff]  ;;  %v2752_v38 = vld [vmem:[#allocation4 + $0x78] sm:$0xff] }
 0x2d2   : > { %2842 = vst.msk [vmem:[#allocation4 + $0x48] sm:$0xff] %vm2576_vm11, %v2826_v36  ;;  %2975 = vperm.xlu1 %4859, %v7263_v0   ;;  %8265 = vst [vmem:[#allocation83_spill] sm:$0xff] %v7288_v15 }
 0x2d3   : > { %v3258_v35 = vpop.xlane.xlu0 %3257  ;;  %2847 = vst.msk [vmem:[#allocation4 + $0x70] sm:$0xff] %vm2576_vm11, %v2831_v45 }
 0x2d4   : > { %v7274_v7 = vmax.f32 %v7265_v13, %v3258_v35  ;;  %v2810_v5 = vpop.xlane.xlu1 %2809  ;;  %v7286_v35 = vld [vmem:[#allocation5 + $0x68] sm:$0xff]  ;;  %v7304_v13 = vld [vmem:[#allocation7 + $0x78] sm:$0xff] }
 0x2d5   : > { %v2829_v53 = vadd.f32 %v2810_v5, %v2749_v17  ;;  %8264 = vst [vmem:[#allocation82_spill] sm:$0xff] %v7286_v35  ;;  %v7302_v17 = vld [vmem:[#allocation7 + $0x70] sm:$0xff]  ;;  %8269 = vst [vmem:[#allocation87_spill] sm:$0xff] %v7304_v13 }
 0x2d6   : > { %3581 = vst.msk [vmem:[#allocation7 + $0x60] sm:$0xff] %vm2576_vm11, %v7274_v7  ;;  %8268 = vst [vmem:[#allocation86_spill] sm:$0xff] %v7302_v17 }
 0x2d7   : > { %v2896_v4 = vpop.xlane.xlu0 %2895  ;;  %2845 = vst.msk [vmem:[#allocation4 + $0x60] sm:$0xff] %vm2576_vm11, %v2829_v53 }
 0x2d8   : > { %v7284_v0 = vmax.f32 %v7276_v9, %v2896_v4  ;;  %v3260_v36 = vpop.xlane.xlu1 %3259 }
 0x2d9   : > { %v7300_v5 = vmax.f32 %v7288_v15, %v3260_v36  ;;  %v2750_v15 = vld [vmem:[#allocation4 + $0x68] sm:$0xff] }
 0x2da   : > { %8263 = vst [vmem:[#allocation81_spill] sm:$0xff] %v7284_v0  ;;  %3216 = vst.msk [vmem:[#allocation5 + $0x78] sm:$0xff] %vm2576_vm11, %v7284_v0  ;;  %2990 = vperm.xlu1 %4859, %v7284_v0  }
 0x2db   : > { %v2892_v45 = vpop.xlane.xlu0 %2891  ;;  %8267 = vst [vmem:[#allocation85_spill] sm:$0xff] %v7300_v5  ;;  %3582 = vst.msk [vmem:[#allocation7 + $0x68] sm:$0xff] %vm2576_vm11, %v7300_v5 }
 0x2dc   : > { %v7297_v4 = vmax.f32 %v7286_v35, %v2892_v45  ;;  %v3264_v45 = vpop.xlane.xlu1 %3263 }
 0x2dd   : > { %v7319_v9 = vmax.f32 %v7304_v13, %v3264_v45 }
 0x2de   : > { %8266 = vst [vmem:[#allocation84_spill] sm:$0xff] %v7297_v4  ;;  %3214 = vst.msk [vmem:[#allocation5 + $0x68] sm:$0xff] %vm2576_vm11, %v7297_v4  ;;  %2980 = vperm.xlu1 %4859, %v7297_v4  }
 0x2df   : > { %v3262_v36 = vpop.xlane.xlu0 %3261  ;;  %8271 = vst [vmem:[#allocation89_spill] sm:$0xff] %v7319_v9  ;;  %3584 = vst.msk [vmem:[#allocation7 + $0x78] sm:$0xff] %vm2576_vm11, %v7319_v9 }
 0x2e0   : > { %v7316_v0 = vmax.f32 %v7302_v17, %v3262_v36 }
 0x2e2   : > { %8270 = vst [vmem:[#allocation88_spill] sm:$0xff] %v7316_v0  ;;  %3583 = vst.msk [vmem:[#allocation7 + $0x70] sm:$0xff] %vm2576_vm11, %v7316_v0  ;;  %3348 = vperm.xlu1 %4859, %v7300_v5   ;;  %3353 = vperm.xlu0 %4858, %v7316_v0  }
 0x2e3   : > { %v2816_v36 = vpop.xlane.xlu0 %2815 }
 0x2e4   : > { %v2832_v45 = vadd.f32 %v2816_v36, %v2752_v38 }
 0x2e6   : > { %2848 = vst.msk [vmem:[#allocation4 + $0x78] sm:$0xff] %vm2576_vm11, %v2832_v45  ;;  %3358 = vperm.xlu1 %4859, %v7319_v9   ;;  %3343 = vperm.xlu0 %4858, %v7274_v7  }
 0x2e7   : > { %v2812_v35 = vpop.xlane.xlu0 %2811 }
 0x2e8   : > { %v2830_v17 = vadd.f32 %v2812_v35, %v2750_v15 }
 0x2ea   : > { %2846 = vst.msk [vmem:[#allocation4 + $0x68] sm:$0xff] %vm2576_vm11, %v2830_v17 }
 0x2fa   : > { %v3294_v53 = vpop.permute.xlu0 %3293 }
 0x2fb   : > { %v3363_v13 = vsub.f32 %v6760_v54, %v3294_v53 }
 0x2fd   : > { %v3381_v4 = vmul.f32 1.442695, %v3363_v13 }
 0x2fe   : > { %v2926_v5 = vpop.permute.xlu1 %2925 }
 0x2ff   : > { %4892 = vpow2.f32 %v3381_v4  ;;  %v2995_v0 = vsub.f32 %v6790_v16, %v2926_v5 }
 0x301   : > { %v3013_v38 = vmul.f32 1.442695, %v2995_v0 }
 0x302   : > { %v2916_v36 = vpop.permute.xlu1 %2915 }
 0x303   : > { %4894 = vpow2.f32 %v3013_v38  ;;  %v2993_v45 = vsub.f32 %v6812_v27, %v2916_v36 }
 0x305   : > { %v3009_v9 = vmul.f32 1.442695, %v2993_v45 }
 0x306   : > { %v3284_v22 = vpop.permute.xlu0 %3283 }
 0x307   : > { %4896 = vpow2.f32 %v3009_v9  ;;  %v3361_v35 = vsub.f32 %v6833_v47, %v3284_v22 }
 0x309   : > { %v3377_v15 = vmul.f32 1.442695, %v3361_v35 }
 0x30b   : > { %4898 = vpow2.f32 %v3377_v15 }
 0x30c   : > { %v4893_v13 = vpop.eup %4892 }
 0x30d   : > { %v2931_v17 = vpop.permute.xlu1 %2930  ;;  %v3411_v16 = vsel %vm8272_vm14, %v4893_v13, 0.0 }
 0x30e   : > { %v2996_v54 = vsub.f32 %v6838_v34, %v2931_v17  ;;  %3509 = vadd.xlane.f32.xlu1 %v3411_v16 }
 0x310   : > { %v3015_v53 = vmul.f32 1.442695, %v2996_v54  ;;  %v4895_v5 = vpop.eup %4894 }
 0x311   : > { %v2921_v0 = vpop.permute.xlu0 %2920  ;;  %v3299_v4 = vpop.permute.xlu1 %3298  ;;  %v3043_v38 = vsel %vm8272_vm14, %v4895_v5, 0.0 }
 0x312   : > { %4900 = vpow2.f32 %v3015_v53  ;;  %v2994_v27 = vsub.f32 %v6845_v43, %v2921_v0  ;;  %v3364_v9 = vsub.f32 %v6843_v10, %v3299_v4  ;;  %3141 = vadd.xlane.f32.xlu0 %v3043_v38 }
 0x314   : > { %v3011_v47 = vmul.f32 1.442695, %v2994_v27  ;;  %v3383_v22 = vmul.f32 1.442695, %v3364_v9  ;;  %v4897_v45 = vpop.eup %4896 }
 0x315   : > { %v3289_v34 = vpop.permute.xlu1 %3288  ;;  %v3041_v15 = vsel %vm8273_vm4, %v4897_v45, 0.0 }
 0x316   : > { %4902 = vpow2.f32 %v3011_v47  ;;  %v3362_v36 = vsub.f32 %v6852_v52, %v3289_v34  ;;  %3137 = vadd.xlane.f32.xlu0 %v3041_v15  ;;  %v2946_v43 = vpop.permute.xlu0 %2945 }
 0x317   : > { %4904 = vpow2.f32 %v3383_v22  ;;  %v2999_v10 = vsub.f32 %v6856_v33, %v2946_v43 }
 0x318   : > { %v3379_v35 = vmul.f32 1.442695, %v3362_v36  ;;  %v4899_v17 = vpop.eup %4898 }
 0x319   : > { %v3021_v54 = vmul.f32 1.442695, %v2999_v10  ;;  %v3409_v11 = vsel %vm8273_vm4, %v4899_v17, 0.0 }
 0x31a   : > { %4906 = vpow2.f32 %v3379_v35  ;;  %3505 = vadd.xlane.f32.xlu1 %v3409_v11 }
 0x31b   : > { %4908 = vpow2.f32 %v3021_v54 }
 0x31d   : > { %v3314_v13 = vpop.permute.xlu0 %3313 }
 0x31e   : > { %v3367_v52 = vsub.f32 %v6858_v46, %v3314_v13 }
 0x31f   : > { %v4901_v53 = vpop.eup %4900 }
 0x320   : > { %v3389_v16 = vmul.f32 1.442695, %v3367_v52  ;;  %v3044_v0 = vsel %vm8274_vm12, %v4901_v53, 0.0 }
 0x321   : > { %3143 = vadd.xlane.f32.xlu0 %v3044_v0  ;;  %v2936_v4 = vpop.permute.xlu0 %2935 }
 0x322   : > { %4910 = vpow2.f32 %v3389_v16  ;;  %v2997_v33 = vsub.f32 %v6865_v39, %v2936_v4 }
 0x323   : > { %v4903_v27 = vpop.eup %4902 }
 0x324   : > { %v4905_v9 = vpop.eup %4904  ;;  %v3017_v5 = vmul.f32 1.442695, %v2997_v33  ;;  %v3042_v21 = vsel %vm6653_vm3, %v4903_v27, 0.0 }
 0x325   : > { %3139 = vadd.xlane.f32.xlu1 %v3042_v21  ;;  %v3412_v46 = vsel %vm8274_vm12, %v4905_v9, 0.0  ;;  %v3304_v47 = vpop.permute.xlu0 %3303 }
 0x326   : > { %4912 = vpow2.f32 %v3017_v5  ;;  %3511 = vadd.xlane.f32.xlu0 %v3412_v46  ;;  %v3365_v22 = vsub.f32 %v6871_v23, %v3304_v47 }
 0x327   : > { %v4907_v38 = vpop.eup %4906 }
 0x328   : > { %v3385_v34 = vmul.f32 1.442695, %v3365_v22  ;;  %v3410_v39 = vsel %vm6653_vm3, %v4907_v38, 0.0  ;;  %v4909_v35 = vpop.eup %4908  ;;  %vm8276_vm3 = vnez %v8169_v32 }
 0x329   : > { %v2951_v36 = vpop.permute.xlu1 %2950  ;;  %v3047_v19 = vsel %vm8275_vm2, %v4909_v35, 0.0 }
 0x32a   : > { %4914 = vpow2.f32 %v3385_v34  ;;  %v3000_v45 = vsub.f32 %v6880_v3, %v2951_v36  ;;  %3507 = vadd.xlane.f32.xlu0 %v3410_v39  ;;  %3149 = vadd.xlane.f32.xlu1 %v3047_v19 }
 0x32c   : > { %v3023_v15 = vmul.f32 1.442695, %v3000_v45 }
 0x32d   : > { %v3319_v43 = vpop.permute.xlu1 %3318 }
 0x32e   : > { %4916 = vpow2.f32 %v3023_v15  ;;  %v3368_v23 = vsub.f32 %v6875_v56, %v3319_v43  ;;  %v2966_v11 = vpop.permute.xlu0 %2965 }
 0x32f   : > { %v4911_v10 = vpop.eup %4910  ;;  %v3003_v13 = vsub.f32 %v6892_v12, %v2966_v11 }
 0x330   : > { %v3391_v17 = vmul.f32 1.442695, %v3368_v23  ;;  %v3415_v31 = vsel %vm8275_vm2, %v4911_v10, 0.0 }
 0x331   : > { %v2941_v54 = vpop.permute.xlu1 %2940  ;;  %3517 = vadd.xlane.f32.xlu1 %v3415_v31  ;;  %v3029_v16 = vmul.f32 1.442695, %v3003_v13 }
 0x332   : > { %4918 = vpow2.f32 %v3391_v17  ;;  %v2998_v3 = vsub.f32 %v6885_v37, %v2941_v54 }
 0x333   : > { %v4913_v52 = vpop.eup %4912 }
 0x334   : > { %v3019_v53 = vmul.f32 1.442695, %v2998_v3  ;;  %v3045_v0 = vsel %vm6688_vm15, %v4913_v52, 0.0 }
 0x335   : > { %v3309_v56 = vpop.permute.xlu1 %3308  ;;  %3145 = vadd.xlane.f32.xlu1 %v3045_v0  ;;  %v3334_v4 = vpop.permute.xlu0 %3333 }
 0x336   : > { %4920 = vpow2.f32 %v3019_v53  ;;  %v3366_v57 = vsub.f32 %v6887_v40, %v3309_v56  ;;  %v3371_v33 = vsub.f32 %v6894_v48, %v3334_v4 }
 0x337   : > { %v4915_v27 = vpop.eup %4914  ;;  %4922 = vpow2.f32 %v3029_v16 }
 0x338   : > { %v3387_v9 = vmul.f32 1.442695, %v3366_v57  ;;  %v3397_v37 = vmul.f32 1.442695, %v3371_v33  ;;  %v3413_v12 = vsel %vm6688_vm15, %v4915_v27, 0.0  ;;  %vm8277_vm15 = vnez %v8178_v60 }
 0x339   : > { %3513 = vadd.xlane.f32.xlu1 %v3413_v12  ;;  %v2956_v5 = vpop.permute.xlu0 %2955 }
 0x33a   : > { %4924 = vpow2.f32 %v3387_v9  ;;  %v3001_v21 = vsub.f32 %v6901_v51, %v2956_v5  ;;  %v3339_v48 = vpop.permute.xlu1 %3338 }
 0x33b   : > { %v4917_v46 = vpop.eup %4916  ;;  %4926 = vpow2.f32 %v3397_v37  ;;  %v3372_v42 = vsub.f32 %v6911_v41, %v3339_v48 }
 0x33c   : > { %v3025_v47 = vmul.f32 1.442695, %v3001_v21  ;;  %v3048_v40 = vsel %vm8276_vm3, %v4917_v46, 0.0 }
 0x33d   : > { %3151 = vadd.xlane.f32.xlu0 %v3048_v40  ;;  %v3324_v22 = vpop.permute.xlu0 %3323  ;;  %v3399_v19 = vmul.f32 1.442695, %v3372_v42 }
 0x33e   : > { %4928 = vpow2.f32 %v3025_v47  ;;  %v3369_v38 = vsub.f32 %v6907_v55, %v3324_v22 }
 0x33f   : > { %v4919_v34 = vpop.eup %4918 }
 0x340   : > { %v3393_v39 = vmul.f32 1.442695, %v3369_v38  ;;  %v3416_v36 = vsel %vm8276_vm3, %v4919_v34, 0.0 }
 0x341   : > { %3519 = vadd.xlane.f32.xlu0 %v3416_v36  ;;  %v2971_v51 = vpop.permute.xlu0 %2970 }
 0x342   : > { %v3004_v45 = vsub.f32 %v6915_v50, %v2971_v51  ;;  %4930 = vpow2.f32 %v3393_v39 }
 0x343   : > { %v4921_v35 = vpop.eup %4920 }
 0x344   : > { %v4923_v15 = vpop.eup %4922  ;;  %v3031_v43 = vmul.f32 1.442695, %v3004_v45  ;;  %v3046_v23 = vsel %vm6717_vm6, %v4921_v35, 0.0 }
 0x345   : > { %v2961_v55 = vpop.permute.xlu1 %2960  ;;  %3147 = vadd.xlane.f32.xlu0 %v3046_v23  ;;  %v3051_v41 = vsel %vm8277_vm15, %v4923_v15, 0.0 }
 0x346   : > { %4932 = vpow2.f32 %v3031_v43  ;;  %v3002_v32 = vsub.f32 %v6921_v20, %v2961_v55  ;;  %3157 = vadd.xlane.f32.xlu1 %v3051_v41  ;;  %v2986_v3 = vpop.permute.xlu0 %2985  ;;  %v8306_v43 = vld [vmem:[#allocation47_spill] sm:$0xff] }
 0x347   : > { %v4925_v10 = vpop.eup %4924  ;;  %4934 = vpow2.f32 %v3399_v19  ;;  %v3007_v52 = vsub.f32 %v6929_v30, %v2986_v3 }
 0x348   : > { %v4927_v17 = vpop.eup %4926  ;;  %v3027_v50 = vmul.f32 1.442695, %v3002_v32  ;;  %v3414_v31 = vsel %vm6717_vm6, %v4925_v10, 0.0  ;;  %vm8278_vm6 = vnez %v8191_v44 }
 0x349   : > { %v3329_v54 = vpop.permute.xlu1 %3328  ;;  %3515 = vadd.xlane.f32.xlu0 %v3414_v31  ;;  %v3419_v11 = vsel %vm8277_vm15, %v4927_v17, 0.0  ;;  %v3037_v16 = vmul.f32 1.442695, %v3007_v52 }
 0x34a   : > { %v3370_v13 = vsub.f32 %v6923_v6, %v3329_v54  ;;  %3525 = vadd.xlane.f32.xlu1 %v3419_v11  ;;  %4936 = vpow2.f32 %v3027_v50  ;;  %v8282_v11 = vsub.f32 %v6993_v18, %v6998_v14 }
 0x34b   : > { %v4929_v20 = vpop.eup %4928  ;;  %4938 = vpow2.f32 %v3037_v16 }
 0x34c   : > { %v3395_v53 = vmul.f32 1.442695, %v3370_v13  ;;  %v3049_v0 = vsel %vm6746_vm10, %v4929_v20, 0.0  ;;  %v3461_v3 = vmul.f32 1.442695, %v8282_v11  ;;  %v8283_v13 = vsub.f32 %v7000_v62, %v7009_v25  ;;  %v8284_v20 = vld [vmem:[#allocation29_spill] sm:$0xff] }
 0x34d   : > { %v2976_v8 = vpop.permute.xlu1 %2975  ;;  %v8293_v62 = vld [vmem:[#allocation37_spill] sm:$0xff]  ;;  %v8294_v25 = vld [vmem:[#allocation39_spill] sm:$0xff] }
 0x34e   : > { %v3005_v56 = vsub.f32 %v6937_v49, %v2976_v8  ;;  %3153 = vadd.xlane.f32.xlu1 %v3049_v0  ;;  %4940 = vpow2.f32 %v3395_v53  ;;  %v3093_v52 = vmul.f32 1.442695, %v8283_v13  ;;  %v8285_v53 = vld [vmem:[#allocation30_spill] sm:$0xff]  ;;  %v8287_v0 = vld [vmem:[#allocation33_spill] sm:$0xff]  ;;  %v3058_v13 = vld [vmem:[#allocation6 + $0x8] sm:$0xff] }
 0x34f   : > { %v4931_v60 = vpop.eup %4930  ;;  %v8286_v28 = vsub.f32 %v8284_v20, %v8285_v53  ;;  %v8288_v8 = vld [vmem:[#allocation34_spill] sm:$0xff] }
 0x350   : > { %v3033_v4 = vmul.f32 1.442695, %v3005_v56  ;;  %v3417_v6 = vsel %vm6746_vm10, %v4931_v60, 0.0  ;;  %vm8279_vm10 = vnez %v8194_v58  ;;  %v8289_v58 = vsub.f32 %v8287_v0, %v8288_v8  ;;  %v8290_v60 = vld [vmem:[#allocation35_spill] sm:$0xff]  ;;  %v3428_v53 = vld [vmem:[#allocation8 + $0x18] sm:$0xff] }
 0x351   : > { %v3089_v16 = vmul.f32 1.442695, %v8286_v28  ;;  %v8311_v28 = vld [vmem:[#allocation49_spill] sm:$0xff] }
 0x352   : > { %4942 = vpow2.f32 %v3033_v4  ;;  %3521 = vadd.xlane.f32.xlu1 %v3417_v6  ;;  %v3457_v56 = vmul.f32 1.442695, %v8289_v58  ;;  %v8291_v4 = vld [vmem:[#allocation36_spill] sm:$0xff] }
 0x353   : > { %v4933_v30 = vpop.eup %4932  ;;  %v8292_v18 = vsub.f32 %v8290_v60, %v8291_v4 }
 0x354   : > { %v3052_v57 = vsel %vm6756_vm1, %v4933_v30, 0.0  ;;  %v4935_v33 = vpop.eup %4934  ;;  %v3427_v30 = vld [vmem:[#allocation8 + $0x10] sm:$0xff] }
 0x355   : > { %v2991_v27 = vpop.permute.xlu1 %2990  ;;  %3159 = vadd.xlane.f32.xlu0 %v3052_v57  ;;  %v3420_v37 = vsel %vm6756_vm1, %v4935_v33, 0.0  ;;  %v3095_v14 = vmul.f32 1.442695, %v8292_v18  ;;  %v8295_v57 = vsub.f32 %v8293_v62, %v8294_v25  ;;  %v8314_v62 = vld [vmem:[#allocation53_spill] sm:$0xff]  ;;  %v8315_v25 = vld [vmem:[#allocation54_spill] sm:$0xff] }
 0x356   : > { %v3008_v9 = vsub.f32 %v6951_v59, %v2991_v27 }
 0x357   : > { %v4937_v12 = vpop.eup %4936  ;;  %v3091_v33 = vmul.f32 1.442695, %v8295_v57  ;;  %v8316_v57 = vsub.f32 %v8314_v62, %v8315_v25  ;;  %v8339_v62 = vld [vmem:[#allocation70_spill] sm:$0xff] }
 0x358   : > { %v3039_v49 = vmul.f32 1.442695, %v3008_v9  ;;  %v4939_v21 = vpop.eup %4938  ;;  %v3050_v47 = vsel %vm8278_vm6, %v4937_v12, 0.0 }
 0x359   : > { %v2981_v5 = vpop.permute.xlu1 %2980  ;;  %3527 = vadd.xlane.f32.xlu0 %v3420_v37  ;;  %v3055_v59 = vsel %vm8279_vm10, %v4939_v21, 0.0  ;;  %v8297_v37 = vld [vmem:[#allocation40_spill] sm:$0xff]  ;;  %v3059_v21 = vld [vmem:[#allocation6 + $0x10] sm:$0xff] }
 0x35a   : > { %4944 = vpow2.f32 %v3039_v49  ;;  %v3006_v61 = vsub.f32 %v6959_v2, %v2981_v5  ;;  %3165 = vadd.xlane.f32.xlu1 %v3055_v59  ;;  %v8296_v49 = vld [vmem:[#allocation38_spill] sm:$0xff] }
 0x35b   : > { %v4941_v40 = vpop.eup %4940  ;;  %v8298_v12 = vsub.f32 %v8296_v49, %v8297_v37  ;;  %v3063_v49 = vld [vmem:[#allocation6 + $0x30] sm:$0xff] }
 0x35c   : > { %v3035_v46 = vmul.f32 1.442695, %v3006_v61  ;;  %v3418_v2 = vsel %vm8278_vm6, %v4941_v40, 0.0 }
 0x35d   : > { %v3349_v48 = vpop.permute.xlu1 %3348  ;;  %v3354_v22 = vpop.permute.xlu0 %3353  ;;  %3155 = vadd.xlane.f32.xlu0 %v3050_v47  ;;  %v3463_v5 = vmul.f32 1.442695, %v8298_v12 }
 0x35e   : > { %4946 = vpow2.f32 %v3035_v46  ;;  %v3374_v29 = vsub.f32 %v6961_v26, %v3349_v48  ;;  %v3375_v39 = vsub.f32 %v6932_v24, %v3354_v22  ;;  %v8299_v48 = vld [vmem:[#allocation41_spill] sm:$0xff]  ;;  %v8300_v22 = vld [vmem:[#allocation42_spill] sm:$0xff] }
 0x35f   : > { %v4943_v38 = vpop.eup %4942  ;;  %v8301_v59 = vsub.f32 %v8299_v48, %v8300_v22  ;;  %v3431_v22 = vld [vmem:[#allocation8 + $0x30] sm:$0xff] }
 0x360   : > { %v3403_v34 = vmul.f32 1.442695, %v3374_v29  ;;  %v3053_v42 = vsel %vm6799_vm5, %v4943_v38, 0.0  ;;  %v3405_v19 = vmul.f32 1.442695, %v3375_v39  ;;  %v8303_v39 = vld [vmem:[#allocation44_spill] sm:$0xff] }
 0x361   : > { %v3359_v36 = vpop.permute.xlu1 %3358  ;;  %v3344_v51 = vpop.permute.xlu0 %3343  ;;  %3523 = vadd.xlane.f32.xlu0 %v3418_v2  ;;  %3161 = vadd.xlane.f32.xlu1 %v3053_v42  ;;  %v3459_v29 = vmul.f32 1.442695, %v8301_v59  ;;  %v8302_v42 = vld [vmem:[#allocation43_spill] sm:$0xff] }
 0x362   : > { %4948 = vpow2.f32 %v3403_v34  ;;  %v3376_v45 = vsub.f32 %v6954_v1, %v3359_v36  ;;  %v3373_v35 = vsub.f32 %v6942_v63, %v3344_v51  ;;  %v3057_v34 = vld [vmem:[#allocation6] sm:$0xff]  ;;  %v8304_v36 = vsub.f32 %v8302_v42, %v8303_v39 }
 0x364   : > { %v3407_v26 = vmul.f32 1.442695, %v3376_v45  ;;  %v3401_v15 = vmul.f32 1.442695, %v3373_v35  ;;  %v3101_v51 = vmul.f32 1.442695, %v8304_v36 }
 0x365   : > { %v8323_v36 = vld [vmem:[#allocation59_spill] sm:$0xff] }
 0x366   : > { %4950 = vpow2.f32 %v3407_v26 }
 0x367   : > { %v4945_v44 = vpop.eup %4944  ;;  %4952 = vpow2.f32 %v3401_v15  ;;  %v3425_v15 = vld [vmem:[#allocation8] sm:$0xff] }
 0x368   : > { %v3056_v23 = vsel %vm6808_vm7, %v4945_v44, 0.0  ;;  %4954 = vpow2.f32 %v3405_v19  ;;  %v8305_v44 = vld [vmem:[#allocation45_spill] sm:$0xff] }
 0x369   : > { %3167 = vadd.xlane.f32.xlu0 %v3056_v23  ;;  %4956 = vpow2.f32 %v3461_v3  ;;  %v8307_v23 = vsub.f32 %v8305_v44, %v8306_v43  ;;  %v8326_v44 = vld [vmem:[#allocation56_spill] sm:$0xff]  ;;  %v8327_v43 = vld [vmem:[#allocation58_spill] sm:$0xff] }
 0x36a   : > { %4958 = vpow2.f32 %v3093_v52 }
 0x36b   : > { %v4947_v24 = vpop.eup %4946  ;;  %4960 = vpow2.f32 %v3089_v16  ;;  %v8312_v16 = vld [vmem:[#allocation51_spill] sm:$0xff] }
 0x36c   : > { %v3054_v41 = vsel %vm6827_vm9, %v4947_v24, 0.0  ;;  %4962 = vpow2.f32 %v3457_v56  ;;  %v3469_v24 = vmul.f32 1.442695, %v8307_v23  ;;  %v8313_v0 = vsub.f32 %v8311_v28, %v8312_v16  ;;  %v3064_v28 = vld [vmem:[#allocation6 + $0x38] sm:$0xff] }
 0x36d   : > { %3163 = vadd.xlane.f32.xlu0 %v3054_v41  ;;  %4964 = vpow2.f32 %v3095_v14  ;;  %v8328_v23 = vsub.f32 %v8326_v44, %v8327_v43 }
 0x36e   : > { %4966 = vpow2.f32 %v3091_v33  ;;  %v3465_v8 = vmul.f32 1.442695, %v8313_v0  ;;  %v3103_v33 = vmul.f32 1.442695, %v8316_v57 }
 0x36f   : > { %v4949_v1 = vpop.eup %4948  ;;  %4968 = vpow2.f32 %v3463_v5  ;;  %v8317_v5 = vld [vmem:[#allocation50_spill] sm:$0xff] }
 0x370   : > { %v3422_v63 = vsel %vm6827_vm9, %v4949_v1, 0.0  ;;  %4970 = vpow2.f32 %v3459_v29  ;;  %v8320_v29 = vld [vmem:[#allocation55_spill] sm:$0xff] }
 0x371   : > { %3531 = vadd.xlane.f32.xlu0 %v3422_v63  ;;  %4972 = vpow2.f32 %v3101_v51  ;;  %v3060_v63 = vld [vmem:[#allocation6 + $0x18] sm:$0xff]  ;;  %v8324_v51 = vld [vmem:[#allocation60_spill] sm:$0xff] }
 0x372   : > { %4974 = vpow2.f32 %v3469_v24  ;;  %v3467_v24 = vmul.f32 1.442695, %v8328_v23 }
 0x373   : > { %v4951_v32 = vpop.eup %4950 }
 0x374   : > { %v4953_v10 = vpop.eup %4952  ;;  %v3424_v17 = vsel %vm6808_vm7, %v4951_v32, 0.0 }
 0x375   : > { %3535 = vadd.xlane.f32.xlu0 %v3424_v17  ;;  %v3421_v50 = vsel %vm6799_vm5, %v4953_v10, 0.0  ;;  %v4955_v31 = vpop.eup %4954  ;;  %v8308_v10 = vld [vmem:[#allocation46_spill] sm:$0xff]  ;;  %v8309_v17 = vld [vmem:[#allocation48_spill] sm:$0xff] }
 0x376   : > { %3529 = vadd.xlane.f32.xlu1 %v3421_v50  ;;  %v3423_v54 = vsel %vm8279_vm10, %v4955_v31, 0.0  ;;  %v4957_v6 = vpop.eup %4956  ;;  %v8310_v50 = vsub.f32 %v8308_v10, %v8309_v17 }
 0x377   : > { %v3491_v27 = vmul.f32 %v4957_v6, %v3427_v30  ;;  %v4959_v9 = vpop.eup %4958  ;;  %v3426_v6 = vld [vmem:[#allocation8 + $0x8] sm:$0xff] }
 0x378   : > { %v3123_v47 = vmul.f32 %v4959_v9, %v3059_v21  ;;  %v4961_v40 = vpop.eup %4960  ;;  %v3097_v31 = vmul.f32 1.442695, %v8310_v50  ;;  %v3429_v50 = vld [vmem:[#allocation8 + $0x20] sm:$0xff] }
 0x379   : > { %v3121_v45 = vmul.f32 %v4961_v40, %v3057_v34  ;;  %v4963_v35 = vpop.eup %4962 }
 0x37a   : > { %3533 = vadd.xlane.f32.xlu1 %v3423_v54  ;;  %v3489_v55 = vmul.f32 %v4963_v35, %v3425_v15  ;;  %v4965_v41 = vpop.eup %4964  ;;  %4976 = vpow2.f32 %v3097_v31  ;;  %v3061_v15 = vld [vmem:[#allocation6 + $0x20] sm:$0xff] }
 0x37b   : > { %v3124_v54 = vmul.f32 %v4965_v41, %v3060_v63  ;;  %v4967_v11 = vpop.eup %4966  ;;  %4978 = vpow2.f32 %v3465_v8  ;;  %v8330_v63 = vld [vmem:[#allocation63_spill] sm:$0xff] }
 0x37c   : > { %v4969_v52 = vpop.eup %4968  ;;  %v3122_v58 = vmul.f32 %v4967_v11, %v3058_v13  ;;  %4980 = vpow2.f32 %v3103_v33  ;;  %v8333_v13 = vld [vmem:[#allocation64_spill] sm:$0xff] }
 0x37d   : > { %v3492_v60 = vmul.f32 %v4969_v52, %v3428_v53  ;;  %v4971_v4 = vpop.eup %4970 }
 0x37e   : > { %v3490_v9 = vmul.f32 %v4971_v4, %v3426_v6 }
 0x397   : > { %v3510_v61 = vpop.xlane.xlu1 %3509 }
 0x398   : > { %v3539_v46 = vadd.f32 %v3510_v61, %v3491_v27  ;;  %v4973_v27 = vpop.eup %4972  ;;  %v8318_v61 = vld [vmem:[#allocation52_spill] sm:$0xff] }
 0x399   : > { %v8319_v21 = vsub.f32 %v8317_v5, %v8318_v61  ;;  %v4975_v40 = vpop.eup %4974  ;;  %v3067_v5 = vld [vmem:[#allocation6 + $0x50] sm:$0xff]  ;;  %v8341_v61 = vld [vmem:[#allocation66_spill] sm:$0xff] }
 0x39a   : > { %3555 = vst.msk [vmem:[#allocation8 + $0x10] sm:$0xff] %vm2576_vm11, %v3539_v46  ;;  %v3495_v42 = vmul.f32 %v4975_v40, %v3431_v22  ;;  %v4977_v39 = vpop.eup %4976 }
 0x39b   : > { %v3142_v38 = vpop.xlane.xlu0 %3141  ;;  %v3471_v46 = vmul.f32 1.442695, %v8319_v21  ;;  %v4979_v41 = vpop.eup %4978  ;;  %v8342_v21 = vld [vmem:[#allocation68_spill] sm:$0xff] }
 0x39c   : > { %v3171_v2 = vadd.f32 %v3142_v38, %v3123_v47  ;;  %v3127_v47 = vmul.f32 %v4973_v27, %v3063_v49  ;;  %v8321_v38 = vld [vmem:[#allocation57_spill] sm:$0xff]  ;;  %v4981_v11 = vpop.eup %4980  ;;  %v3062_v49 = vld [vmem:[#allocation6 + $0x28] sm:$0xff] }
 0x39d   : > { %4982 = vpow2.f32 %v3471_v46  ;;  %v8322_v34 = vsub.f32 %v8320_v29, %v8321_v38  ;;  %v3128_v0 = vmul.f32 %v4981_v11, %v3064_v28  ;;  %v8343_v46 = vsub.f32 %v8341_v61, %v8342_v21  ;;  %v3430_v29 = vld [vmem:[#allocation8 + $0x28] sm:$0xff]  ;;  %v8354_v11 = vld [vmem:[#allocation78_spill] sm:$0xff]  ;;  %v3433_v28 = vld [vmem:[#allocation8 + $0x40] sm:$0xff] }
 0x39e   : > { %3187 = vst.msk [vmem:[#allocation6 + $0x10] sm:$0xff] %vm2576_vm11, %v3171_v2  ;;  %v3066_v21 = vld [vmem:[#allocation6 + $0x48] sm:$0xff] }
 0x39f   : > { %v3138_v26 = vpop.xlane.xlu0 %3137  ;;  %v3099_v2 = vmul.f32 1.442695, %v8322_v34 }
 0x3a0   : > { %v3169_v19 = vadd.f32 %v3138_v26, %v3121_v45  ;;  %v8325_v45 = vsub.f32 %v8323_v36, %v8324_v51  ;;  %v8344_v36 = vld [vmem:[#allocation71_spill] sm:$0xff]  ;;  %v8345_v51 = vld [vmem:[#allocation73_spill] sm:$0xff] }
 0x3a1   : > { %4984 = vpow2.f32 %v3099_v2 }
 0x3a2   : > { %3185 = vst.msk [vmem:[#allocation6] sm:$0xff] %vm2576_vm11, %v3169_v19  ;;  %v3109_v35 = vmul.f32 1.442695, %v8325_v45  ;;  %v8346_v45 = vsub.f32 %v8344_v36, %v8345_v51 }
 0x3a3   : > { %v3506_v1 = vpop.xlane.xlu1 %3505 }
 0x3a4   : > { %v3537_v32 = vadd.f32 %v3506_v1, %v3489_v55  ;;  %v3125_v55 = vmul.f32 %v4977_v39, %v3061_v15  ;;  %4986 = vpow2.f32 %v3109_v35  ;;  %v8329_v1 = vld [vmem:[#allocation61_spill] sm:$0xff]  ;;  %v3107_v35 = vmul.f32 1.442695, %v8346_v45  ;;  %v8347_v15 = vld [vmem:[#allocation75_spill] sm:$0xff] }
 0x3a5   : > { %4988 = vpow2.f32 %v3467_v24 }
 0x3a6   : > { %3553 = vst.msk [vmem:[#allocation8] sm:$0xff] %vm2576_vm11, %v3537_v32  ;;  %v8331_v32 = vsub.f32 %v8329_v1, %v8330_v63  ;;  %v3065_v63 = vld [vmem:[#allocation6 + $0x40] sm:$0xff] }
 0x3a8   : > { %v3477_v10 = vmul.f32 1.442695, %v8331_v32 }
 0x3aa   : > { %v3144_v3 = vpop.xlane.xlu0 %3143  ;;  %4990 = vpow2.f32 %v3477_v10  ;;  %v4983_v8 = vpop.eup %4982  ;;  %v8350_v10 = vld [vmem:[#allocation72_spill] sm:$0xff] }
 0x3ab   : > { %v3172_v20 = vadd.f32 %v3144_v3, %v3124_v54  ;;  %v3493_v54 = vmul.f32 %v4979_v41, %v3429_v50  ;;  %v8332_v3 = vld [vmem:[#allocation62_spill] sm:$0xff] }
 0x3ac   : > { %v8334_v52 = vsub.f32 %v8332_v3, %v8333_v13 }
 0x3ad   : > { %3188 = vst.msk [vmem:[#allocation6 + $0x18] sm:$0xff] %vm2576_vm11, %v3172_v20 }
 0x3ae   : > { %v3140_v56 = vpop.xlane.xlu1 %3139  ;;  %v3105_v20 = vmul.f32 1.442695, %v8334_v52  ;;  %v4985_v27 = vpop.eup %4984 }
 0x3af   : > { %v3170_v18 = vadd.f32 %v3140_v56, %v3122_v58  ;;  %v3512_v14 = vpop.xlane.xlu0 %3511  ;;  %v8335_v58 = vld [vmem:[#allocation65_spill] sm:$0xff]  ;;  %v8336_v56 = vld [vmem:[#allocation67_spill] sm:$0xff]  ;;  %v3126_v40 = vmul.f32 %v4985_v27, %v3062_v49  ;;  %v8359_v27 = vld [vmem:[#allocation82_spill] sm:$0xff] }
 0x3b0   : > { %v3540_v30 = vadd.f32 %v3512_v14, %v3492_v60  ;;  %4992 = vpow2.f32 %v3105_v20  ;;  %v8337_v60 = vsub.f32 %v8335_v58, %v8336_v56  ;;  %v3432_v14 = vld [vmem:[#allocation8 + $0x38] sm:$0xff] }
 0x3b1   : > { %3186 = vst.msk [vmem:[#allocation6 + $0x8] sm:$0xff] %vm2576_vm11, %v3170_v18  ;;  %v3496_v33 = vmul.f32 %v4983_v8, %v3432_v14  ;;  %v3068_v58 = vld [vmem:[#allocation6 + $0x58] sm:$0xff] }
 0x3b2   : > { %3556 = vst.msk [vmem:[#allocation8 + $0x18] sm:$0xff] %vm2576_vm11, %v3540_v30  ;;  %v3473_v4 = vmul.f32 1.442695, %v8337_v60  ;;  %v8338_v30 = vld [vmem:[#allocation69_spill] sm:$0xff] }
 0x3b3   : > { %v3508_v37 = vpop.xlane.xlu0 %3507  ;;  %v3150_v48 = vpop.xlane.xlu1 %3149  ;;  %v8340_v25 = vsub.f32 %v8338_v30, %v8339_v62 }
 0x3b4   : > { %v3538_v12 = vadd.f32 %v3508_v37, %v3490_v9  ;;  %v3175_v59 = vadd.f32 %v3150_v48, %v3127_v47  ;;  %4994 = vpow2.f32 %v3473_v4  ;;  %v4987_v37 = vpop.eup %4986  ;;  %v3479_v47 = vmul.f32 1.442695, %v8343_v46  ;;  %v8356_v4 = vld [vmem:[#allocation80_spill] sm:$0xff] }
 0x3b5   : > { %v3111_v57 = vmul.f32 1.442695, %v8340_v25  ;;  %v4989_v48 = vpop.eup %4988 }
 0x3b6   : > { %3554 = vst.msk [vmem:[#allocation8 + $0x8] sm:$0xff] %vm2576_vm11, %v3538_v12  ;;  %3191 = vst.msk [vmem:[#allocation6 + $0x30] sm:$0xff] %vm2576_vm11, %v3175_v59  ;;  %v3131_v59 = vmul.f32 %v4987_v37, %v3067_v5 }
 0x3b7   : > { %4996 = vpow2.f32 %v3111_v57  ;;  %v4991_v38 = vpop.eup %4990  ;;  %v3436_v57 = vld [vmem:[#allocation8 + $0x58] sm:$0xff] }
 0x3b8   : > { %4998 = vpow2.f32 %v3479_v47 }
 0x3b9   : > { %5000 = vpow2.f32 %v3107_v35  ;;  %v3069_v35 = vld [vmem:[#allocation6 + $0x60] sm:$0xff] }
 0x3ba   : > { %v3518_v26 = vpop.xlane.xlu1 %3517 }
 0x3bb   : > { %v3543_v19 = vadd.f32 %v3518_v26, %v3495_v42  ;;  %v3435_v42 = vld [vmem:[#allocation8 + $0x50] sm:$0xff]  ;;  %v3494_v26 = vmul.f32 %v4989_v48, %v3430_v29  ;;  %v8362_v48 = vld [vmem:[#allocation83_spill] sm:$0xff] }
 0x3bc   : > { %v3499_v24 = vmul.f32 %v4991_v38, %v3435_v42 }
 0x3bd   : > { %3559 = vst.msk [vmem:[#allocation8 + $0x30] sm:$0xff] %vm2576_vm11, %v3543_v19  ;;  %v8348_v19 = vld [vmem:[#allocation76_spill] sm:$0xff] }
 0x3be   : > { %v3146_v17 = vpop.xlane.xlu1 %3145  ;;  %v8349_v44 = vsub.f32 %v8347_v15, %v8348_v19  ;;  %v8365_v15 = vld [vmem:[#allocation87_spill] sm:$0xff]  ;;  %v8366_v19 = vld [vmem:[#allocation89_spill] sm:$0xff] }
 0x3bf   : > { %v3173_v31 = vadd.f32 %v3146_v17, %v3125_v55  ;;  %v4993_v55 = vpop.eup %4992  ;;  %v8351_v17 = vld [vmem:[#allocation74_spill] sm:$0xff] }
 0x3c0   : > { %v3117_v43 = vmul.f32 1.442695, %v8349_v44  ;;  %v8352_v50 = vsub.f32 %v8350_v10, %v8351_v17  ;;  %v3129_v52 = vmul.f32 %v4993_v55, %v3065_v63  ;;  %v8367_v44 = vsub.f32 %v8365_v15, %v8366_v19 }
 0x3c1   : > { %3189 = vst.msk [vmem:[#allocation6 + $0x20] sm:$0xff] %vm2576_vm11, %v3173_v31  ;;  %v4995_v20 = vpop.eup %4994 }
 0x3c2   : > { %v3514_v53 = vpop.xlane.xlu1 %3513  ;;  %v3475_v31 = vmul.f32 1.442695, %v8352_v50  ;;  %5002 = vpow2.f32 %v3117_v43  ;;  %v3497_v8 = vmul.f32 %v4995_v20, %v3433_v28  ;;  %v3487_v43 = vmul.f32 1.442695, %v8367_v44 }
 0x3c3   : > { %v3541_v16 = vadd.f32 %v3514_v53, %v3493_v54  ;;  %v8353_v54 = vld [vmem:[#allocation77_spill] sm:$0xff] }
 0x3c4   : > { %v8355_v3 = vsub.f32 %v8353_v54, %v8354_v11  ;;  %5004 = vpow2.f32 %v3475_v31  ;;  %v8370_v31 = vld [vmem:[#allocation86_spill] sm:$0xff]  ;;  %v8371_v54 = vld [vmem:[#allocation88_spill] sm:$0xff] }
 0x3c5   : > { %3557 = vst.msk [vmem:[#allocation8 + $0x20] sm:$0xff] %vm2576_vm11, %v3541_v16  ;;  %v8372_v11 = vsub.f32 %v8370_v31, %v8371_v54 }
 0x3c6   : > { %v3152_v18 = vpop.xlane.xlu0 %3151  ;;  %v3113_v13 = vmul.f32 1.442695, %v8355_v3 }
 0x3c7   : > { %v3176_v6 = vadd.f32 %v3152_v18, %v3128_v0  ;;  %v4997_v0 = vpop.eup %4996  ;;  %v8357_v18 = vld [vmem:[#allocation81_spill] sm:$0xff]  ;;  %v3485_v3 = vmul.f32 1.442695, %v8372_v11 }
 0x3c8   : > { %5006 = vpow2.f32 %v3113_v13  ;;  %v8358_v14 = vsub.f32 %v8356_v4, %v8357_v18  ;;  %v3132_v30 = vmul.f32 %v4997_v0, %v3068_v58  ;;  %v4999_v62 = vpop.eup %4998  ;;  %v3438_v58 = vld [vmem:[#allocation8 + $0x68] sm:$0xff] }
 0x3c9   : > { %3192 = vst.msk [vmem:[#allocation6 + $0x38] sm:$0xff] %vm2576_vm11, %v3176_v6  ;;  %v5001_v5 = vpop.eup %5000 }
 0x3ca   : > { %v3520_v9 = vpop.xlane.xlu0 %3519  ;;  %v3119_v6 = vmul.f32 1.442695, %v8358_v14  ;;  %v3130_v38 = vmul.f32 %v5001_v5, %v3066_v21  ;;  %v3440_v14 = vld [vmem:[#allocation8 + $0x78] sm:$0xff] }
 0x3cb   : > { %v3544_v12 = vadd.f32 %v3520_v9, %v3496_v33  ;;  %v8360_v9 = vld [vmem:[#allocation84_spill] sm:$0xff] }
 0x3cc   : > { %5008 = vpow2.f32 %v3119_v6  ;;  %v8361_v49 = vsub.f32 %v8359_v27, %v8360_v9 }
 0x3cd   : > { %3560 = vst.msk [vmem:[#allocation8 + $0x38] sm:$0xff] %vm2576_vm11, %v3544_v12  ;;  %v3500_v12 = vmul.f32 %v4999_v62, %v3436_v57  ;;  %v3437_v62 = vld [vmem:[#allocation8 + $0x60] sm:$0xff] }
 0x3ce   : > { %v3148_v22 = vpop.xlane.xlu0 %3147  ;;  %v3115_v37 = vmul.f32 1.442695, %v8361_v49 }
 0x3cf   : > { %v3174_v34 = vadd.f32 %v3148_v22, %v3126_v40  ;;  %v3158_v2 = vpop.xlane.xlu1 %3157  ;;  %v5003_v46 = vpop.eup %5002  ;;  %v3071_v40 = vld [vmem:[#allocation6 + $0x70] sm:$0xff] }
 0x3d0   : > { %v3179_v39 = vadd.f32 %v3158_v2, %v3131_v59  ;;  %5010 = vpow2.f32 %v3115_v37  ;;  %v8363_v22 = vld [vmem:[#allocation85_spill] sm:$0xff]  ;;  %v3135_v2 = vmul.f32 %v5003_v46, %v3071_v40 }
 0x3d1   : > { %3190 = vst.msk [vmem:[#allocation6 + $0x28] sm:$0xff] %vm2576_vm11, %v3174_v34  ;;  %v8364_v59 = vsub.f32 %v8362_v48, %v8363_v22  ;;  %v5005_v34 = vpop.eup %5004  ;;  %v3439_v37 = vld [vmem:[#allocation8 + $0x70] sm:$0xff] }
 0x3d2   : > { %3195 = vst.msk [vmem:[#allocation6 + $0x50] sm:$0xff] %vm2576_vm11, %v3179_v39  ;;  %v3516_v23 = vpop.xlane.xlu0 %3515  ;;  %v3434_v39 = vld [vmem:[#allocation8 + $0x48] sm:$0xff] }
 0x3d3   : > { %v3542_v41 = vadd.f32 %v3516_v23, %v3494_v26  ;;  %v3526_v1 = vpop.xlane.xlu1 %3525  ;;  %v3483_v29 = vmul.f32 1.442695, %v8364_v59  ;;  %v3498_v23 = vmul.f32 %v5005_v34, %v3434_v39 }
 0x3d4   : > { %v3547_v32 = vadd.f32 %v3526_v1, %v3499_v24  ;;  %v8368_v24 = vld [vmem:[#allocation79_spill] sm:$0xff] }
 0x3d5   : > { %3558 = vst.msk [vmem:[#allocation8 + $0x28] sm:$0xff] %vm2576_vm11, %v3542_v41  ;;  %v5007_v36 = vpop.eup %5006  ;;  %5012 = vpow2.f32 %v3483_v29  ;;  %v8369_v55 = vsub.f32 %v8368_v24, %v7274_v7  ;;  %v3072_v7 = vld [vmem:[#allocation6 + $0x78] sm:$0xff] }
 0x3d6   : > { %3563 = vst.msk [vmem:[#allocation8 + $0x50] sm:$0xff] %vm2576_vm11, %v3547_v32  ;;  %v3133_v1 = vmul.f32 %v5007_v36, %v3069_v35  ;;  %5014 = vpow2.f32 %v3487_v43 }
 0x3d7   : > { %v3154_v53 = vpop.xlane.xlu1 %3153  ;;  %v3481_v41 = vmul.f32 1.442695, %v8369_v55 }
 0x3d8   : > { %v3177_v16 = vadd.f32 %v3154_v53, %v3129_v52  ;;  %v3070_v53 = vld [vmem:[#allocation6 + $0x68] sm:$0xff] }
 0x3d9   : > { %v5009_v50 = vpop.eup %5008  ;;  %5016 = vpow2.f32 %v3481_v41 }
 0x3da   : > { %3193 = vst.msk [vmem:[#allocation6 + $0x40] sm:$0xff] %vm2576_vm11, %v3177_v16  ;;  %v3136_v13 = vmul.f32 %v5009_v50, %v3072_v7  ;;  %5018 = vpow2.f32 %v3485_v3 }
 0x3db   : > { %v3522_v56 = vpop.xlane.xlu1 %3521 }
 0x3dc   : > { %v3545_v60 = vadd.f32 %v3522_v56, %v3497_v8 }
 0x3dd   : > { %v5011_v52 = vpop.eup %5010 }
 0x3de   : > { %3561 = vst.msk [vmem:[#allocation8 + $0x40] sm:$0xff] %vm2576_vm11, %v3545_v60  ;;  %v3160_v25 = vpop.xlane.xlu0 %3159  ;;  %v3134_v16 = vmul.f32 %v5011_v52, %v3070_v53 }
 0x3df   : > { %v3180_v33 = vadd.f32 %v3160_v25, %v3132_v30 }
 0x3e1   : > { %3196 = vst.msk [vmem:[#allocation6 + $0x58] sm:$0xff] %vm2576_vm11, %v3180_v33 }
 0x3e2   : > { %v3528_v61 = vpop.xlane.xlu0 %3527  ;;  %v5013_v0 = vpop.eup %5012 }
 0x3e3   : > { %v3548_v47 = vadd.f32 %v3528_v61, %v3500_v12  ;;  %v3166_v51 = vpop.xlane.xlu1 %3165  ;;  %v3502_v60 = vmul.f32 %v5013_v0, %v3438_v58  ;;  %v5015_v4 = vpop.eup %5014 }
 0x3e4   : > { %v3183_v26 = vadd.f32 %v3166_v51, %v3135_v2  ;;  %v3504_v25 = vmul.f32 %v5015_v4, %v3440_v14 }
 0x3e5   : > { %3564 = vst.msk [vmem:[#allocation8 + $0x58] sm:$0xff] %vm2576_vm11, %v3548_v47 }
 0x3e6   : > { %v3156_v42 = vpop.xlane.xlu0 %3155  ;;  %3199 = vst.msk [vmem:[#allocation6 + $0x70] sm:$0xff] %vm2576_vm11, %v3183_v26  ;;  %v5017_v6 = vpop.eup %5016 }
 0x3e7   : > { %v3178_v45 = vadd.f32 %v3156_v42, %v3130_v38  ;;  %v3501_v57 = vmul.f32 %v5017_v6, %v3437_v62  ;;  %v5019_v27 = vpop.eup %5018 }
 0x3e8   : > { %v3503_v5 = vmul.f32 %v5019_v27, %v3439_v37 }
 0x3e9   : > { %3194 = vst.msk [vmem:[#allocation6 + $0x48] sm:$0xff] %vm2576_vm11, %v3178_v45 }
 0x3ea   : > { %v3524_v63 = vpop.xlane.xlu0 %3523  ;;  %v3162_v32 = vpop.xlane.xlu1 %3161 }
 0x3eb   : > { %v3546_v10 = vadd.f32 %v3524_v63, %v3498_v23  ;;  %v3181_v17 = vadd.f32 %v3162_v32, %v3133_v1 }
 0x3ed   : > { %3562 = vst.msk [vmem:[#allocation8 + $0x48] sm:$0xff] %vm2576_vm11, %v3546_v10  ;;  %3197 = vst.msk [vmem:[#allocation6 + $0x60] sm:$0xff] %vm2576_vm11, %v3181_v17 }
 0x3f2   : > { %v3168_v20 = vpop.xlane.xlu0 %3167 }
 0x3f3   : > { %v3184_v28 = vadd.f32 %v3168_v20, %v3136_v13 }
 0x3f5   : > { %3200 = vst.msk [vmem:[#allocation6 + $0x78] sm:$0xff] %vm2576_vm11, %v3184_v28 }
 0x3f6   : > { %v3164_v8 = vpop.xlane.xlu0 %3163 }
 0x3f7   : > { %v3182_v56 = vadd.f32 %v3164_v8, %v3134_v16 }
 0x3f9   : > { %3198 = vst.msk [vmem:[#allocation6 + $0x68] sm:$0xff] %vm2576_vm11, %v3182_v56 }
 0x3fa   : > { %v3532_v18 = vpop.xlane.xlu0 %3531 }
 0x3fb   : > { %v3550_v30 = vadd.f32 %v3532_v18, %v3502_v60 }
 0x3fd   : > { %3566 = vst.msk [vmem:[#allocation8 + $0x68] sm:$0xff] %vm2576_vm11, %v3550_v30 }
 0x3fe   : > { %v3536_v33 = vpop.xlane.xlu0 %3535 }
 0x3ff   : > { %v3530_v9 = vpop.xlane.xlu1 %3529  ;;  %v3552_v49 = vadd.f32 %v3536_v33, %v3504_v25 }
 0x400   : > { %v3549_v12 = vadd.f32 %v3530_v9, %v3501_v57 }
 0x401   : > { %3568 = vst.msk [vmem:[#allocation8 + $0x78] sm:$0xff] %vm2576_vm11, %v3552_v49 }
 0x402   : > { %3565 = vst.msk [vmem:[#allocation8 + $0x60] sm:$0xff] %vm2576_vm11, %v3549_v12  ;;  %3588 = sbr.rel (%p4570_p6) target bundleno = 1807 (0x70f), region = 282 }
 0x403   : > { %v3534_v61 = vpop.xlane.xlu1 %3533 }
 0x404   : > { %v3551_v21 = vadd.f32 %v3534_v61, %v3503_v5 }
 0x406   : > { %3567 = vst.msk [vmem:[#allocation8 + $0x70] sm:$0xff] %vm2576_vm11, %v3551_v21 }
 0x407   : > { %v7560_v46 = vld [vmem:[#allocation2] sm:$0xff]  ;;  %v7562_v47 = vld [vmem:[#allocation2 + $0x8] sm:$0xff]  ;;  %v7572_v45 = vld [vmem:[#allocation2 + $0x10] sm:$0xff] }
 0x408   : > { %v7564_v40 = vld [vmem:[#allocation3] sm:$0xff]  ;;  %v7566_v48 = vld [vmem:[#allocation3 + $0x8] sm:$0xff]  ;;  %v7576_v15 = vld [vmem:[#allocation3 + $0x10] sm:$0xff] }
 0x409   : > { %v3621_v22 = vld [vmem:[#allocation6] sm:$0xff]  ;;  %v3622_v59 = vld [vmem:[#allocation6 + $0x8] sm:$0xff]  ;;  %v3925_v29 = vmul.f32 %v7564_v40, %v7560_v46  ;;  %v3926_v2 = vmul.f32 %v7566_v48, %v7562_v47  ;;  %v3623_v19 = vld [vmem:[#allocation6 + $0x10] sm:$0xff]  ;;  %v3927_v55 = vmul.f32 %v7576_v15, %v7572_v45 }
 0x40a   : > { %vm3637_vm1 = vcmp.gt.f32.partialorder %v3621_v22, 0.0  ;;  %vm3638_vm7 = vcmp.gt.f32.partialorder %v3622_v59, 0.0  ;;  %v3701_v38 = vld [vmem:[#allocation8] sm:$0xff]  ;;  %v3702_v34 = vld [vmem:[#allocation8 + $0x8] sm:$0xff]  ;;  %v3624_v43 = vld [vmem:[#allocation6 + $0x18] sm:$0xff]  ;;  %vm3639_vm0 = vcmp.gt.f32.partialorder %v3623_v19, 0.0 }
 0x40b   : > { %v3653_v42 = vsel %vm3637_vm1, %v3621_v22, 1.0  ;;  %v3654_v39 = vsel %vm3638_vm7, %v3622_v59, 1.0  ;;  %vm3717_vm5 = vcmp.gt.f32.partialorder %v3701_v38, 0.0  ;;  %vm3718_vm13 = vcmp.gt.f32.partialorder %v3702_v34, 0.0  ;;  %v3703_v23 = vld [vmem:[#allocation8 + $0x10] sm:$0xff]  ;;  %v3704_v24 = vld [vmem:[#allocation8 + $0x18] sm:$0xff] }
 0x40c   : > { %5020 = vlog2.f32 %v3653_v42  ;;  %v3733_v36 = vsel %vm3717_vm5, %v3701_v38, 1.0  ;;  %v3734_v51 = vsel %vm3718_vm13, %v3702_v34, 1.0  ;;  %v3941_v35 = vsel %vm2576_vm11, %v3925_v29, 0.0  ;;  %v7580_v41 = vld [vmem:[#allocation2 + $0x18] sm:$0xff]  ;;  %v3813_v7 = vld [vmem:[#allocation5] sm:$0xff]  ;;  %v3814_v53 = vld [vmem:[#allocation5 + $0x8] sm:$0xff] }
 0x40d   : > { %5022 = vlog2.f32 %v3654_v39  ;;  %v3942_v26 = vsel %vm2576_vm11, %v3926_v2, 0.0  ;;  %v7582_v1 = vld [vmem:[#allocation3 + $0x18] sm:$0xff]  ;;  %vm3640_vm8 = vcmp.gt.f32.partialorder %v3624_v43, 0.0  ;;  %v3655_v63 = vsel %vm3639_vm0, %v3623_v19, 1.0  ;;  %v3829_v13 = vld [vmem:[#allocation7] sm:$0xff]  ;;  %v3830_v28 = vld [vmem:[#allocation7 + $0x8] sm:$0xff] }
 0x40e   : > { %5024 = vlog2.f32 %v3733_v36  ;;  %v3943_v44 = vadd.f32 %v3942_v26, %v3941_v35  ;;  %vm3719_vm9 = vcmp.gt.f32.partialorder %v3703_v23, 0.0  ;;  %v3656_v32 = vsel %vm3640_vm8, %v3624_v43, 1.0  ;;  %v3815_v14 = vld [vmem:[#allocation5 + $0x10] sm:$0xff]  ;;  %v3816_v57 = vld [vmem:[#allocation5 + $0x18] sm:$0xff]  ;;  %v3797_v29 = vld [vmem:[#allocation4] sm:$0xff] }
 0x40f   : > { %5026 = vlog2.f32 %v3734_v51  ;;  %vm3720_vm14 = vcmp.gt.f32.partialorder %v3704_v24, 0.0  ;;  %v3735_v10 = vsel %vm3719_vm9, %v3703_v23, 1.0  ;;  %v3928_v50 = vmul.f32 %v7582_v1, %v7580_v41  ;;  %v3831_v6 = vld [vmem:[#allocation7 + $0x10] sm:$0xff]  ;;  %v3832_v33 = vld [vmem:[#allocation7 + $0x18] sm:$0xff]  ;;  %v3798_v38 = vld [vmem:[#allocation4 + $0x8] sm:$0xff] }
 0x410   : > { %3944 = vadd.xlane.f32.xlu0 %v3943_v44  ;;  %5028 = vlog2.f32 %v3655_v63  ;;  %v3736_v17 = vsel %vm3720_vm14, %v3704_v24, 1.0  ;;  %v3973_v31 = vsel %vm2576_vm11, %v3927_v55, 0.0  ;;  %v3845_v56 = vadd.f32 %v3829_v13, %v3813_v7  ;;  %v7588_v34 = vld [vmem:[#allocation2 + $0x20] sm:$0xff]  ;;  %v7591_v39 = vld [vmem:[#allocation2 + $0x28] sm:$0xff]  ;;  %v3799_v24 = vld [vmem:[#allocation4 + $0x10] sm:$0xff] }
 0x411   : > { %5030 = vlog2.f32 %v3656_v32  ;;  %v3974_v54 = vsel %vm2576_vm11, %v3928_v50, 0.0  ;;  %v3846_v18 = vadd.f32 %v3830_v28, %v3814_v53  ;;  %v3847_v61 = vadd.f32 %v3831_v6, %v3815_v14  ;;  %v7593_v36 = vld [vmem:[#allocation3 + $0x20] sm:$0xff]  ;;  %v7595_v51 = vld [vmem:[#allocation3 + $0x28] sm:$0xff] }
 0x412   : > { %5032 = vlog2.f32 %v3735_v10  ;;  %v3975_v11 = vadd.f32 %v3974_v54, %v3973_v31  ;;  %v3848_v59 = vadd.f32 %v3832_v33, %v3816_v57  ;;  %v3625_v55 = vld [vmem:[#allocation6 + $0x20] sm:$0xff]  ;;  %v3929_v63 = vmul.f32 %v7593_v36, %v7588_v34  ;;  %v3626_v31 = vld [vmem:[#allocation6 + $0x28] sm:$0xff] }
 0x413   : > { %5034 = vlog2.f32 %v3736_v17  ;;  %v3800_v17 = vld [vmem:[#allocation4 + $0x18] sm:$0xff]  ;;  %vm3641_vm4 = vcmp.gt.f32.partialorder %v3625_v55, 0.0  ;;  %vm3642_vm12 = vcmp.gt.f32.partialorder %v3626_v31, 0.0  ;;  %v3817_v6 = vld [vmem:[#allocation5 + $0x20] sm:$0xff]  ;;  %v3818_v57 = vld [vmem:[#allocation5 + $0x28] sm:$0xff] }
 0x414   : > { %3976 = vadd.xlane.f32.xlu1 %v3975_v11  ;;  %v3657_v28 = vsel %vm3641_vm4, %v3625_v55, 1.0  ;;  %v3833_v33 = vld [vmem:[#allocation7 + $0x20] sm:$0xff] }
 0x415   : > { %5036 = vlog2.f32 %v3657_v28  ;;  %v3836_v28 = vld [vmem:[#allocation7 + $0x38] sm:$0xff] }
 0x419   : > { %v5021_v3 = vpop.eup %5020 }
 0x41a   : > { %v5023_v52 = vpop.eup %5022  ;;  %v3670_v20 = vmul.f32 0.6931472, %v5021_v3  ;;  %v3705_v3 = vld [vmem:[#allocation8 + $0x20] sm:$0xff] }
 0x41b   : > { %v5025_v16 = vpop.eup %5024  ;;  %v3672_v0 = vmul.f32 0.6931472, %v5023_v52  ;;  %v3706_v52 = vld [vmem:[#allocation8 + $0x28] sm:$0xff]  ;;  %vm3721_vm2 = vcmp.gt.f32.partialorder %v3705_v3, 0.0 }
 0x41c   : > { %v5027_v8 = vpop.eup %5026  ;;  %v3750_v58 = vmul.f32 0.6931472, %v5025_v16  ;;  %vm3722_vm3 = vcmp.gt.f32.partialorder %v3706_v52, 0.0 }
 0x41d   : > { %v5029_v60 = vpop.eup %5028  ;;  %v3752_v4 = vmul.f32 0.6931472, %v5027_v8  ;;  %v3658_v8 = vsel %vm3642_vm12, %v3626_v31, 1.0 }
 0x41e   : > { %v5031_v30 = vpop.eup %5030  ;;  %v3781_v62 = vadd.f32 %v3750_v58, %v3670_v20  ;;  %v3674_v25 = vmul.f32 0.6931472, %v5029_v60  ;;  %v4005_v20 = vsel %vm2576_vm11, %v3929_v63, 0.0  ;;  %v3738_v60 = vsel %vm3722_vm3, %v3706_v52, 1.0 }
 0x41f   : > { %v5033_v27 = vpop.eup %5032  ;;  %v3782_v9 = vadd.f32 %v3752_v4, %v3672_v0  ;;  %v3676_v49 = vmul.f32 0.6931472, %v5031_v30  ;;  %5038 = vlog2.f32 %v3658_v8 }
 0x420   : > { %v5035_v37 = vpop.eup %5034  ;;  %v3861_v12 = vadd.f32 %v3845_v56, %v3781_v62  ;;  %v3754_v5 = vmul.f32 0.6931472, %v5033_v27  ;;  %v3737_v56 = vsel %vm3721_vm2, %v3705_v3, 1.0  ;;  %v3834_v27 = vld [vmem:[#allocation7 + $0x28] sm:$0xff] }
 0x421   : > { %v3862_v21 = vadd.f32 %v3846_v18, %v3782_v9  ;;  %v3756_v22 = vmul.f32 0.6931472, %v5035_v37  ;;  %5040 = vlog2.f32 %v3737_v56  ;;  %v3849_v37 = vadd.f32 %v3833_v33, %v3817_v6 }
 0x422   : > { %v3877_v2 = vmul.f32 %v3861_v12, %v7564_v40  ;;  %v3783_v42 = vadd.f32 %v3754_v5, %v3674_v25  ;;  %v3930_v40 = vmul.f32 %v7595_v51, %v7591_v39  ;;  %5042 = vlog2.f32 %v3738_v60 }
 0x423   : > { %v3878_v35 = vmul.f32 %v3862_v21, %v7566_v48  ;;  %v3784_v26 = vadd.f32 %v3756_v22, %v3676_v49  ;;  %v3850_v12 = vadd.f32 %v3834_v27, %v3818_v57  ;;  %v7626_v57 = vld [vmem:[#allocation3 + $0x40] sm:$0xff] }
 0x424   : > { %v3863_v19 = vadd.f32 %v3847_v61, %v3783_v42  ;;  %v3893_v44 = vsub.f32 %v3797_v29, %v3877_v2  ;;  %v3802_v29 = vld [vmem:[#allocation4 + $0x28] sm:$0xff]  ;;  %v3595_v42 = vld [vmem:[#allocation2 + $0x30] sm:$0xff] }
 0x425   : > { %v3864_v43 = vadd.f32 %v3848_v59, %v3784_v26  ;;  %v3894_v23 = vsub.f32 %v3798_v38, %v3878_v35  ;;  %v3801_v59 = vld [vmem:[#allocation4 + $0x20] sm:$0xff]  ;;  %v3596_v35 = vld [vmem:[#allocation2 + $0x38] sm:$0xff]  ;;  %v3611_v26 = vld [vmem:[#allocation3 + $0x30] sm:$0xff] }
 0x426   : > { %v3879_v32 = vmul.f32 %v3863_v19, %v7576_v15  ;;  %v3909_v10 = vmul.f32 %v3893_v44, %v7560_v46  ;;  %v4006_v15 = vsel %vm2576_vm11, %v3930_v40, 0.0 }
 0x427   : > { %v3880_v48 = vmul.f32 %v3864_v43, %v7582_v1  ;;  %v3910_v50 = vmul.f32 %v3894_v23, %v7562_v47  ;;  %v4007_v16 = vadd.f32 %v4006_v15, %v4005_v20  ;;  %v3612_v43 = vld [vmem:[#allocation3 + $0x38] sm:$0xff]  ;;  %v3931_v23 = vmul.f32 %v3611_v26, %v3595_v42  ;;  %v3819_v20 = vld [vmem:[#allocation5 + $0x30] sm:$0xff] }
 0x428   : > { %v3953_v54 = vsel %vm2576_vm11, %v3909_v10, 0.0  ;;  %v3895_v11 = vsub.f32 %v3799_v24, %v3879_v32  ;;  %v3932_v24 = vmul.f32 %v3612_v43, %v3596_v35  ;;  %v3627_v10 = vld [vmem:[#allocation6 + $0x30] sm:$0xff] }
 0x429   : > { %v3954_v7 = vsel %vm2576_vm11, %v3910_v50, 0.0  ;;  %v3896_v13 = vsub.f32 %v3800_v17, %v3880_v48  ;;  %v3628_v17 = vld [vmem:[#allocation6 + $0x38] sm:$0xff]  ;;  %vm3643_vm15 = vcmp.gt.f32.partialorder %v3627_v10, 0.0 }
 0x42a   : > { %v3955_v46 = vadd.f32 %v3954_v7, %v3953_v54  ;;  %v3911_v53 = vmul.f32 %v3895_v11, %v7572_v45  ;;  %v5037_v45 = vpop.eup %5036  ;;  %v4038_v40 = vsel %vm2576_vm11, %v3932_v24, 0.0  ;;  %vm3644_vm6 = vcmp.gt.f32.partialorder %v3628_v17, 0.0  ;;  %v3710_v24 = vld [vmem:[#allocation8 + $0x48] sm:$0xff] }
 0x42b   : > { %v3912_v47 = vmul.f32 %v3896_v13, %v7580_v41  ;;  %v3678_v14 = vmul.f32 0.6931472, %v5037_v45  ;;  %v3659_v48 = vsel %vm3643_vm15, %v3627_v10, 1.0  ;;  %v3660_v50 = vsel %vm3644_vm6, %v3628_v17, 1.0 }
 0x42c   : > { %3956 = vadd.xlane.f32.xlu0 %v3955_v46  ;;  %v3985_v1 = vsel %vm2576_vm11, %v3911_v53, 0.0  ;;  %v5039_v41 = vpop.eup %5038  ;;  %5044 = vlog2.f32 %v3659_v48  ;;  %vm3726_vm0 = vcmp.gt.f32.partialorder %v3710_v24, 0.0 }
 0x42d   : > { %v3986_v0 = vsel %vm2576_vm11, %v3912_v47, 0.0  ;;  %v3680_v30 = vmul.f32 0.6931472, %v5039_v41  ;;  %5046 = vlog2.f32 %v3660_v50  ;;  %v3820_v47 = vld [vmem:[#allocation5 + $0x38] sm:$0xff]  ;;  %v3742_v10 = vsel %vm3726_vm0, %v3710_v24, 1.0 }
 0x42e   : > { %v3987_v58 = vadd.f32 %v3986_v0, %v3985_v1  ;;  %v5041_v4 = vpop.eup %5040  ;;  %v3835_v1 = vld [vmem:[#allocation7 + $0x30] sm:$0xff] }
 0x42f   : > { %v5043_v18 = vpop.eup %5042  ;;  %v3758_v62 = vmul.f32 0.6931472, %v5041_v4  ;;  %v3851_v8 = vadd.f32 %v3835_v1, %v3819_v20  ;;  %v3803_v4 = vld [vmem:[#allocation4 + $0x30] sm:$0xff] }
 0x430   : > { %3988 = vadd.xlane.f32.xlu1 %v3987_v58  ;;  %4008 = vadd.xlane.f32.xlu0 %v4007_v16  ;;  %v3760_v25 = vmul.f32 0.6931472, %v5043_v18  ;;  %v3852_v58 = vadd.f32 %v3836_v28, %v3820_v47  ;;  %v3804_v18 = vld [vmem:[#allocation4 + $0x38] sm:$0xff] }
 0x431   : > { %v3785_v9 = vadd.f32 %v3758_v62, %v3678_v14  ;;  %v7622_v62 = vld [vmem:[#allocation2 + $0x40] sm:$0xff] }
 0x432   : > { %v3786_v49 = vadd.f32 %v3760_v25, %v3680_v30  ;;  %v7624_v25 = vld [vmem:[#allocation2 + $0x48] sm:$0xff] }
 0x433   : > { %v3865_v5 = vadd.f32 %v3849_v37, %v3785_v9  ;;  %v3933_v37 = vmul.f32 %v7626_v57, %v7622_v62 }
 0x434   : > { %v3866_v61 = vadd.f32 %v3850_v12, %v3786_v49  ;;  %v7628_v49 = vld [vmem:[#allocation3 + $0x48] sm:$0xff] }
 0x435   : > { %v3881_v21 = vmul.f32 %v3865_v5, %v7593_v36  ;;  %v3934_v12 = vmul.f32 %v7628_v49, %v7624_v25 }
 0x436   : > { %v3882_v22 = vmul.f32 %v3866_v61, %v7595_v51  ;;  %v4037_v51 = vsel %vm2576_vm11, %v3931_v23, 0.0 }
 0x437   : > { %v3897_v38 = vsub.f32 %v3801_v59, %v3881_v21  ;;  %v4039_v32 = vadd.f32 %v4038_v40, %v4037_v51 }
 0x438   : > { %v3898_v2 = vsub.f32 %v3802_v29, %v3882_v22  ;;  %v4069_v22 = vsel %vm2576_vm11, %v3933_v37, 0.0  ;;  %v4070_v29 = vsel %vm2576_vm11, %v3934_v12, 0.0  ;;  %v7646_v12 = vld [vmem:[#allocation2 + $0x50] sm:$0xff] }
 0x439   : > { %v3913_v19 = vmul.f32 %v3897_v38, %v7588_v34  ;;  %4040 = vadd.xlane.f32.xlu0 %v4039_v32  ;;  %v3707_v34 = vld [vmem:[#allocation8 + $0x30] sm:$0xff]  ;;  %v5045_v11 = vpop.eup %5044 }
 0x43a   : > { %v3914_v44 = vmul.f32 %v3898_v2, %v7591_v39  ;;  %v3708_v39 = vld [vmem:[#allocation8 + $0x38] sm:$0xff]  ;;  %vm3723_vm10 = vcmp.gt.f32.partialorder %v3707_v34, 0.0  ;;  %v5047_v3 = vpop.eup %5046  ;;  %v3682_v52 = vmul.f32 0.6931472, %v5045_v11  ;;  %v4071_v2 = vadd.f32 %v4070_v29, %v4069_v22 }
 0x43b   : > { %v4017_v55 = vsel %vm2576_vm11, %v3913_v19, 0.0  ;;  %vm3724_vm1 = vcmp.gt.f32.partialorder %v3708_v39, 0.0  ;;  %v3739_v31 = vsel %vm3723_vm10, %v3707_v34, 1.0  ;;  %v3684_v15 = vmul.f32 0.6931472, %v5047_v3  ;;  %v3629_v19 = vld [vmem:[#allocation6 + $0x40] sm:$0xff] }
 0x43c   : > { %v4018_v36 = vsel %vm2576_vm11, %v3914_v44, 0.0  ;;  %v3740_v54 = vsel %vm3724_vm1, %v3708_v39, 1.0  ;;  %5048 = vlog2.f32 %v3739_v31  ;;  %v3630_v44 = vld [vmem:[#allocation6 + $0x48] sm:$0xff]  ;;  %vm3645_vm7 = vcmp.gt.f32.partialorder %v3629_v19, 0.0  ;;  %v3821_v3 = vld [vmem:[#allocation5 + $0x40] sm:$0xff]  ;;  %v7654_v22 = vld [vmem:[#allocation3 + $0x58] sm:$0xff] }
 0x43d   : > { %v4019_v63 = vadd.f32 %v4018_v36, %v4017_v55  ;;  %5050 = vlog2.f32 %v3740_v54  ;;  %4072 = vadd.xlane.f32.xlu0 %v4071_v2  ;;  %vm3646_vm5 = vcmp.gt.f32.partialorder %v3630_v44, 0.0  ;;  %v3661_v51 = vsel %vm3645_vm7, %v3629_v19, 1.0 }
 0x43e   : > { %5052 = vlog2.f32 %v3661_v51  ;;  %v3711_v51 = vld [vmem:[#allocation8 + $0x50] sm:$0xff] }
 0x43f   : > { %4020 = vadd.xlane.f32.xlu1 %v4019_v63  ;;  %v3662_v63 = vsel %vm3646_vm5, %v3630_v44, 1.0  ;;  %vm3727_vm14 = vcmp.gt.f32.partialorder %v3711_v51, 0.0 }
 0x440   : > { %5054 = vlog2.f32 %v3662_v63  ;;  %v3712_v63 = vld [vmem:[#allocation8 + $0x58] sm:$0xff] }
 0x441   : > { %vm3728_vm4 = vcmp.gt.f32.partialorder %v3712_v63, 0.0 }
 0x449   : > { %v5049_v7 = vpop.eup %5048 }
 0x44a   : > { %v5051_v13 = vpop.eup %5050  ;;  %v3762_v46 = vmul.f32 0.6931472, %v5049_v7 }
 0x44b   : > { %v3764_v53 = vmul.f32 0.6931472, %v5051_v13  ;;  %v5053_v48 = vpop.eup %5052 }
 0x44c   : > { %v3787_v16 = vadd.f32 %v3762_v46, %v3682_v52  ;;  %v3686_v11 = vmul.f32 0.6931472, %v5053_v48  ;;  %v3837_v46 = vld [vmem:[#allocation7 + $0x40] sm:$0xff] }
 0x44d   : > { %v3788_v0 = vadd.f32 %v3764_v53, %v3684_v15  ;;  %v5055_v50 = vpop.eup %5054  ;;  %v3822_v15 = vld [vmem:[#allocation5 + $0x48] sm:$0xff] }
 0x44e   : > { %v3867_v56 = vadd.f32 %v3851_v8, %v3787_v16  ;;  %v3688_v13 = vmul.f32 0.6931472, %v5055_v50  ;;  %v3838_v53 = vld [vmem:[#allocation7 + $0x48] sm:$0xff]  ;;  %v3853_v16 = vadd.f32 %v3837_v46, %v3821_v3 }
 0x44f   : > { %v3868_v60 = vadd.f32 %v3852_v58, %v3788_v0  ;;  %v3854_v0 = vadd.f32 %v3838_v53, %v3822_v15 }
 0x450   : > { %v3883_v45 = vmul.f32 %v3867_v56, %v3611_v26 }
 0x451   : > { %v3884_v41 = vmul.f32 %v3868_v60, %v3612_v43  ;;  %v3709_v43 = vld [vmem:[#allocation8 + $0x40] sm:$0xff] }
 0x452   : > { %v3899_v14 = vsub.f32 %v3803_v4, %v3883_v45  ;;  %vm3725_vm13 = vcmp.gt.f32.partialorder %v3709_v43, 0.0 }
 0x453   : > { %v3900_v6 = vsub.f32 %v3804_v18, %v3884_v41  ;;  %v3741_v32 = vsel %vm3725_vm13, %v3709_v43, 1.0 }
 0x454   : > { %v3915_v27 = vmul.f32 %v3899_v14, %v3595_v42  ;;  %5056 = vlog2.f32 %v3741_v32 }
 0x455   : > { %v3916_v9 = vmul.f32 %v3900_v6, %v3596_v35  ;;  %5058 = vlog2.f32 %v3742_v10  ;;  %v3743_v10 = vsel %vm3727_vm14, %v3711_v51, 1.0 }
 0x456   : > { %v4049_v61 = vsel %vm2576_vm11, %v3915_v27, 0.0 }
 0x457   : > { %v4050_v21 = vsel %vm2576_vm11, %v3916_v9, 0.0 }
 0x458   : > { %v4051_v59 = vadd.f32 %v4050_v21, %v4049_v61  ;;  %v7650_v61 = vld [vmem:[#allocation3 + $0x50] sm:$0xff] }
 0x45a   : > { %4052 = vadd.xlane.f32.xlu1 %v4051_v59 }
 0x461   : > { %v5057_v31 = vpop.eup %5056 }
 0x462   : > { %v5059_v54 = vpop.eup %5058  ;;  %v3766_v52 = vmul.f32 0.6931472, %v5057_v31 }
 0x463   : > { %v3768_v20 = vmul.f32 0.6931472, %v5059_v54  ;;  %v3823_v54 = vld [vmem:[#allocation5 + $0x50] sm:$0xff] }
 0x464   : > { %v3789_v1 = vadd.f32 %v3766_v52, %v3686_v11  ;;  %v3839_v52 = vld [vmem:[#allocation7 + $0x50] sm:$0xff] }
 0x465   : > { %v3790_v28 = vadd.f32 %v3768_v20, %v3688_v13  ;;  %v3824_v13 = vld [vmem:[#allocation5 + $0x58] sm:$0xff] }
 0x466   : > { %v3869_v56 = vadd.f32 %v3853_v16, %v3789_v1  ;;  %v3840_v20 = vld [vmem:[#allocation7 + $0x58] sm:$0xff] }
 0x467   : > { %v3870_v60 = vadd.f32 %v3854_v0, %v3790_v28  ;;  %v3856_v1 = vadd.f32 %v3840_v20, %v3824_v13  ;;  %v3842_v13 = vld [vmem:[#allocation7 + $0x68] sm:$0xff] }
 0x468   : > { %v3885_v4 = vmul.f32 %v3869_v56, %v7626_v57 }
 0x469   : > { %v3886_v18 = vmul.f32 %v3870_v60, %v7628_v49  ;;  %v3935_v49 = vmul.f32 %v7650_v61, %v7646_v12 }
 0x499   : > { %v3945_v30 = vpop.xlane.xlu0 %3944 }
 0x49a   : > { %v3946_v33 = vrot.slane %v3945_v30, 4 }
 0x49c   : > { %v3947_v5 = vadd.f32 %v3946_v33, %v3945_v30  ;;  %v3805_v30 = vld [vmem:[#allocation4 + $0x40] sm:$0xff]  ;;  %v3806_v33 = vld [vmem:[#allocation4 + $0x48] sm:$0xff] }
 0x49d   : > { %v3977_v7 = vpop.xlane.xlu1 %3976  ;;  %v3901_v9 = vsub.f32 %v3805_v30, %v3885_v4  ;;  %v3902_v37 = vsub.f32 %v3806_v33, %v3886_v18 }
 0x49e   : > { %v3948_v38 = vrot.slane %v3947_v5, 2  ;;  %v3978_v58 = vrot.slane %v3977_v7, 4 }
 0x49f   : > { %v3917_v21 = vmul.f32 %v3901_v9, %v7622_v62  ;;  %v3918_v57 = vmul.f32 %v3902_v37, %v7624_v25  ;;  %v7678_v9 = vld [vmem:[#allocation2 + $0x60] sm:$0xff]  ;;  %v7680_v37 = vld [vmem:[#allocation2 + $0x68] sm:$0xff] }
 0x4a0   : > { %v3949_v42 = vadd.f32 %v3948_v38, %v3947_v5  ;;  %v3979_v41 = vadd.f32 %v3978_v58, %v3977_v7  ;;  %v7648_v5 = vld [vmem:[#allocation2 + $0x58] sm:$0xff] }
 0x4a1   : > { %v3936_v29 = vmul.f32 %v7654_v22, %v7648_v5  ;;  %v4081_v2 = vsel %vm2576_vm11, %v3917_v21, 0.0  ;;  %v7682_v21 = vld [vmem:[#allocation3 + $0x60] sm:$0xff] }
 0x4a2   : > { %v3950_v35 = vrot.slane %v3949_v42, 1  ;;  %v3980_v27 = vrot.slane %v3979_v41, 2 }
 0x4a3   : > { %v4102_v62 = vsel %vm2576_vm11, %v3936_v29, 0.0 }
 0x4a4   : > { %v3951_v26 = vadd.f32 %v3950_v35, %v3949_v42  ;;  %v3981_v38 = vadd.f32 %v3980_v27, %v3979_v41  ;;  %v4082_v42 = vsel %vm2576_vm11, %v3918_v57, 0.0  ;;  %v4101_v35 = vsel %vm2576_vm11, %v3935_v49, 0.0  ;;  %v7686_v49 = vld [vmem:[#allocation3 + $0x68] sm:$0xff] }
 0x4a5   : > { %v4103_v25 = vadd.f32 %v4102_v62, %v4101_v35  ;;  %v3938_v29 = vmul.f32 %v7686_v49, %v7680_v37 }
 0x4a6   : > { %4719 = vpush %v3951_v26  ;;  %v4083_v26 = vadd.f32 %v4082_v42, %v4081_v2  ;;  %v3982_v44 = vrot.slane %v3981_v38, 1 }
 0x4a7   : > { %4104 = vadd.xlane.f32.xlu0 %v4103_v25 }
 0x4a8   : > { %4084 = vadd.xlane.f32.xlu1 %v4083_v26  ;;  %v3983_v24 = vadd.f32 %v3982_v44, %v3981_v38 }
 0x4b5   : > { %v3957_v23 = vpop.xlane.xlu0 %3956 }
 0x4b6   : > { %v3958_v55 = vrot.slane %v3957_v23, 4 }
 0x4b8   : > { %v3959_v36 = vadd.f32 %v3958_v55, %v3957_v23  ;;  %v3631_v55 = vld [vmem:[#allocation6 + $0x50] sm:$0xff] }
 0x4b9   : > { %v3989_v47 = vpop.xlane.xlu1 %3988  ;;  %vm3647_vm8 = vcmp.gt.f32.partialorder %v3631_v55, 0.0  ;;  %v4009_v28 = vpop.xlane.xlu0 %4008 }
 0x4ba   : > { %v3960_v40 = vrot.slane %v3959_v36, 2  ;;  %v3990_v8 = vrot.slane %v3989_v47, 4  ;;  %v4010_v0 = vrot.slane %v4009_v28, 4 }
 0x4bc   : > { %v3961_v17 = vadd.f32 %v3960_v40, %v3959_v36  ;;  %v3991_v45 = vadd.f32 %v3990_v8, %v3989_v47  ;;  %v3632_v36 = vld [vmem:[#allocation6 + $0x58] sm:$0xff]  ;;  %v3663_v40 = vsel %vm3647_vm8, %v3631_v55, 1.0  ;;  %v3855_v47 = vadd.f32 %v3839_v52, %v3823_v54  ;;  %v3713_v55 = vld [vmem:[#allocation8 + $0x60] sm:$0xff] }
 0x4bd   : > { %vm3648_vm9 = vcmp.gt.f32.partialorder %v3632_v36, 0.0  ;;  %v4011_v60 = vadd.f32 %v4010_v0, %v4009_v28  ;;  %vm3729_vm3 = vcmp.gt.f32.partialorder %v3713_v55, 0.0 }
 0x4be   : > { %v3962_v34 = vrot.slane %v3961_v17, 1  ;;  %v3992_v6 = vrot.slane %v3991_v45, 2  ;;  %v3664_v32 = vsel %vm3648_vm9, %v3632_v36, 1.0  ;;  %v3714_v36 = vld [vmem:[#allocation8 + $0x68] sm:$0xff] }
 0x4bf   : > { %v4012_v30 = vrot.slane %v4011_v60, 2  ;;  %vm3730_vm15 = vcmp.gt.f32.partialorder %v3714_v36, 0.0 }
 0x4c0   : > { %v3963_v39 = vadd.f32 %v3962_v34, %v3961_v17  ;;  %v3993_v59 = vadd.f32 %v3992_v6, %v3991_v45  ;;  %v3744_v17 = vsel %vm3728_vm4, %v3712_v63, 1.0  ;;  %v3808_v6 = vld [vmem:[#allocation4 + $0x58] sm:$0xff] }
 0x4c1   : > { %v4013_v38 = vadd.f32 %v4012_v30, %v4011_v60 }
 0x4c2   : > { %4721 = vpush %v3963_v39  ;;  %v3994_v19 = vrot.slane %v3993_v59, 1 }
 0x4c3   : > { %v4014_v25 = vrot.slane %v4013_v38, 1 }
 0x4c4   : > { %v3995_v43 = vadd.f32 %v3994_v19, %v3993_v59 }
 0x4c8   : > { %v4021_v15 = vpop.xlane.xlu1 %4020 }
 0x4c9   : > { %v4022_v16 = vrot.slane %v4021_v15, 4 }
 0x4cb   : > { %v4023_v56 = vadd.f32 %v4022_v16, %v4021_v15 }
 0x4cd   : > { %v4024_v18 = vrot.slane %v4023_v56, 2 }
 0x4cf   : > { %v4025_v59 = vadd.f32 %v4024_v18, %v4023_v56  ;;  %v3810_v18 = vld [vmem:[#allocation4 + $0x68] sm:$0xff] }
 0x4d1   : > { %v4026_v62 = vrot.slane %v4025_v59, 1 }
 0x4d3   : > { %v4027_v19 = vadd.f32 %v4026_v62, %v4025_v59 }
 0x4d7   : > { %s7638_s3 = spop %4719 }
 0x4d8   : > { %p3965_p7 = scmp.gt.f32.partialorder %s7638_s3, 0.0 }
 0x4da   : > { %s3966_s30 = scalar_select %p3965_p7, %s7638_s3, 1.0 }
 0x4dc   : > { %v3967_v14 = vstv %s3966_s30 }
 0x4dd   : > { %5060 = vrcp.f32 %v3967_v14  ;;  %v3807_v14 = vld [vmem:[#allocation4 + $0x50] sm:$0xff] }
 0x4de   : > { %5062 = vlog2.f32 %v3663_v40  ;;  %v3745_v40 = vsel %vm3729_vm3, %v3713_v55, 1.0 }
 0x4df   : > { %5064 = vlog2.f32 %v3664_v32  ;;  %v3746_v32 = vsel %vm3730_vm15, %v3714_v36, 1.0 }
 0x4e0   : > { %5066 = vlog2.f32 %v3743_v10 }
 0x4e1   : > { %5068 = vlog2.f32 %v3744_v17 }
 0x4e3   : > { %v4053_v52 = vpop.xlane.xlu1 %4052 }
 0x4ea   : > { %v5061_v23 = vpop.eup %5060 }
 0x4eb   : > { %4723 = vpush %v5061_v23  ;;  %v5063_v34 = vpop.eup %5062  ;;  %v3633_v23 = vld [vmem:[#allocation6 + $0x60] sm:$0xff] }
 0x4ec   : > { %4725 = vpush %v3983_v24  ;;  %v5065_v39 = vpop.eup %5064  ;;  %v3690_v31 = vmul.f32 0.6931472, %v5063_v34  ;;  %v3634_v24 = vld [vmem:[#allocation6 + $0x68] sm:$0xff]  ;;  %vm3649_vm12 = vcmp.gt.f32.partialorder %v3633_v23, 0.0 }
 0x4ed   : > { %4727 = vpush %v3995_v43  ;;  %v5067_v48 = vpop.eup %5066  ;;  %v3692_v11 = vmul.f32 0.6931472, %v5065_v39  ;;  %v4015_v43 = vadd.f32 %v4014_v25, %v4013_v38  ;;  %vm3650_vm2 = vcmp.gt.f32.partialorder %v3634_v24, 0.0  ;;  %v3665_v51 = vsel %vm3649_vm12, %v3633_v23, 1.0  ;;  %v3715_v23 = vld [vmem:[#allocation8 + $0x70] sm:$0xff] }
 0x4ee   : > { %v5069_v50 = vpop.eup %5068  ;;  %v3770_v3 = vmul.f32 0.6931472, %v5067_v48  ;;  %v3666_v63 = vsel %vm3650_vm2, %v3634_v24, 1.0  ;;  %v3716_v24 = vld [vmem:[#allocation8 + $0x78] sm:$0xff]  ;;  %vm3731_vm1 = vcmp.gt.f32.partialorder %v3715_v23, 0.0 }
 0x4ef   : > { %v3772_v7 = vmul.f32 0.6931472, %v5069_v50  ;;  %v3825_v50 = vld [vmem:[#allocation5 + $0x60] sm:$0xff]  ;;  %vm3732_vm7 = vcmp.gt.f32.partialorder %v3716_v24, 0.0 }
 0x4f0   : > { %v3791_v46 = vadd.f32 %v3770_v3, %v3690_v31  ;;  %v3826_v3 = vld [vmem:[#allocation5 + $0x68] sm:$0xff] }
 0x4f1   : > { %v3792_v53 = vadd.f32 %v3772_v7, %v3692_v11  ;;  %v3841_v7 = vld [vmem:[#allocation7 + $0x60] sm:$0xff] }
 0x4f2   : > { %v3871_v8 = vadd.f32 %v3855_v47, %v3791_v46  ;;  %v3857_v46 = vadd.f32 %v3841_v7, %v3825_v50  ;;  %v4041_v47 = vpop.xlane.xlu0 %4040 }
 0x4f3   : > { %s7664_s10 = spop %4721  ;;  %v3872_v58 = vadd.f32 %v3856_v1, %v3792_v53  ;;  %v3858_v53 = vadd.f32 %v3842_v13, %v3826_v3  ;;  %v4054_v1 = vrot.slane %v4053_v52, 4  ;;  %v4042_v28 = vrot.slane %v4041_v47, 4  ;;  %v3844_v3 = vld [vmem:[#allocation7 + $0x78] sm:$0xff] }
 0x4f4   : > { %v3887_v45 = vmul.f32 %v3871_v8, %v7650_v61 }
 0x4f5   : > { %v3888_v41 = vmul.f32 %v3872_v58, %v7654_v22  ;;  %v3937_v22 = vmul.f32 %v7682_v21, %v7678_v9  ;;  %v4055_v8 = vadd.f32 %v4054_v1, %v4053_v52  ;;  %v4043_v58 = vadd.f32 %v4042_v28, %v4041_v47 }
 0x4f6   : > { %v3903_v33 = vsub.f32 %v3807_v14, %v3887_v45 }
 0x4f7   : > { %v3904_v27 = vsub.f32 %v3808_v6, %v3888_v41  ;;  %v4133_v35 = vsel %vm2576_vm11, %v3937_v22, 0.0  ;;  %v4056_v41 = vrot.slane %v4055_v8, 2  ;;  %v4044_v14 = vrot.slane %v4043_v58, 2 }
 0x4f8   : > { %v3919_v57 = vmul.f32 %v3903_v33, %v7646_v12  ;;  %v4134_v12 = vsel %vm2576_vm11, %v3938_v29, 0.0  ;;  %v7717_v33 = vld [vmem:[#allocation2 + $0x70] sm:$0xff] }
 0x4f9   : > { %v3920_v61 = vmul.f32 %v3904_v27, %v7648_v5  ;;  %v4135_v5 = vadd.f32 %v4134_v12, %v4133_v35  ;;  %v7719_v27 = vld [vmem:[#allocation2 + $0x78] sm:$0xff]  ;;  %v4057_v59 = vadd.f32 %v4056_v41, %v4055_v8  ;;  %v4045_v38 = vadd.f32 %v4044_v14, %v4043_v58 }
 0x4fa   : > { %v4113_v2 = vsel %vm2576_vm11, %v3919_v57, 0.0  ;;  %v7721_v57 = vld [vmem:[#allocation3 + $0x70] sm:$0xff]  ;;  %v3812_v41 = vld [vmem:[#allocation4 + $0x78] sm:$0xff] }
 0x4fb   : > { %v4114_v42 = vsel %vm2576_vm11, %v3920_v61, 0.0  ;;  %4136 = vadd.xlane.f32.xlu0 %v4135_v5  ;;  %v3939_v22 = vmul.f32 %v7721_v57, %v7717_v33  ;;  %v4058_v12 = vrot.slane %v4057_v59, 1  ;;  %v4046_v5 = vrot.slane %v4045_v38, 1 }
 0x4fc   : > { %v4115_v26 = vadd.f32 %v4114_v42, %v4113_v2 }
 0x4fd   : > { %v4165_v35 = vsel %vm2576_vm11, %v3939_v22, 0.0  ;;  %v4059_v62 = vadd.f32 %v4058_v12, %v4057_v59 }
 0x4fe   : > { %4116 = vadd.xlane.f32.xlu1 %v4115_v26 }
 0x51c   : > { %s7666_s18 = spop %4723 }
 0x51d   : > { %s3970_s11 = smul.f32 %s7666_s18, %s7664_s10  ;;  %s7670_s19 = spop %4725 }
 0x51e   : > { %p3997_p8 = scmp.gt.f32.partialorder %s7670_s19, 0.0  ;;  %s4728_s5 = spop %4727 }
 0x51f   : > { %s8398_s11 = smov (!%p3965_p7, %s3970_s11), 0.0 }
 0x520   : > { %s3998_s28 = scalar_select %p3997_p8, %s7670_s19, 1.0 }
 0x522   : > { %v3999_v4 = vstv %s3998_s28 }
 0x523   : > { %5070 = vrcp.f32 %v3999_v4  ;;  %v3809_v4 = vld [vmem:[#allocation4 + $0x60] sm:$0xff] }
 0x524   : > { %5072 = vlog2.f32 %v3665_v51  ;;  %v3747_v51 = vsel %vm3731_vm1, %v3715_v23, 1.0 }
 0x525   : > { %5074 = vlog2.f32 %v3666_v63  ;;  %v3748_v63 = vsel %vm3732_vm7, %v3716_v24, 1.0 }
 0x526   : > { %5076 = vlog2.f32 %v3745_v40 }
 0x527   : > { %5078 = vlog2.f32 %v3746_v32 }
 0x530   : > { %v5071_v44 = vpop.eup %5070 }
 0x531   : > { %4729 = vpush %v5071_v44  ;;  %v5073_v10 = vpop.eup %5072  ;;  %v3635_v44 = vld [vmem:[#allocation6 + $0x70] sm:$0xff]  ;;  %v4085_v7 = vpop.xlane.xlu1 %4084 }
 0x532   : > { %4731 = vpush %v4015_v43  ;;  %v5075_v17 = vpop.eup %5074  ;;  %v3694_v48 = vmul.f32 0.6931472, %v5073_v10  ;;  %v3636_v43 = vld [vmem:[#allocation6 + $0x78] sm:$0xff]  ;;  %vm3651_vm6 = vcmp.gt.f32.partialorder %v3635_v44, 0.0 }
 0x533   : > { %4733 = vpush %v4027_v19  ;;  %v5077_v34 = vpop.eup %5076  ;;  %v3696_v31 = vmul.f32 0.6931472, %v5075_v17  ;;  %v4047_v19 = vadd.f32 %v4046_v5, %v4045_v38  ;;  %vm3652_vm10 = vcmp.gt.f32.partialorder %v3636_v43, 0.0  ;;  %v3667_v55 = vsel %vm3651_vm6, %v3635_v44, 1.0 }
 0x534   : > { %v5079_v39 = vpop.eup %5078  ;;  %v3774_v54 = vmul.f32 0.6931472, %v5077_v34  ;;  %v3668_v36 = vsel %vm3652_vm10, %v3636_v43, 1.0 }
 0x535   : > { %v3776_v11 = vmul.f32 0.6931472, %v5079_v39  ;;  %v3827_v39 = vld [vmem:[#allocation5 + $0x70] sm:$0xff] }
 0x536   : > { %v3793_v20 = vadd.f32 %v3774_v54, %v3694_v48  ;;  %v3828_v54 = vld [vmem:[#allocation5 + $0x78] sm:$0xff] }
 0x537   : > { %v3794_v15 = vadd.f32 %v3776_v11, %v3696_v31  ;;  %v3843_v11 = vld [vmem:[#allocation7 + $0x70] sm:$0xff] }
 0x538   : > { %v3873_v16 = vadd.f32 %v3857_v46, %v3793_v20  ;;  %v3859_v20 = vadd.f32 %v3843_v11, %v3827_v39  ;;  %v4073_v46 = vpop.xlane.xlu0 %4072 }
 0x539   : > { %v3874_v0 = vadd.f32 %v3858_v53, %v3794_v15  ;;  %v3860_v15 = vadd.f32 %v3844_v3, %v3828_v54  ;;  %v4086_v53 = vrot.slane %v4085_v7, 4  ;;  %v4074_v47 = vrot.slane %v4073_v46, 4 }
 0x53a   : > { %v3889_v56 = vmul.f32 %v3873_v16, %v7682_v21 }
 0x53b   : > { %v3890_v60 = vmul.f32 %v3874_v0, %v7686_v49  ;;  %v7725_v49 = vld [vmem:[#allocation3 + $0x78] sm:$0xff]  ;;  %v4087_v16 = vadd.f32 %v4086_v53, %v4085_v7  ;;  %v4075_v0 = vadd.f32 %v4074_v47, %v4073_v46 }
 0x53c   : > { %v3905_v6 = vsub.f32 %v3809_v4, %v3889_v56  ;;  %v3940_v29 = vmul.f32 %v7725_v49, %v7719_v27 }
 0x53d   : > { %v3906_v30 = vsub.f32 %v3810_v18, %v3890_v60  ;;  %v4088_v60 = vrot.slane %v4087_v16, 2  ;;  %v4076_v4 = vrot.slane %v4075_v0, 2 }
 0x53e   : > { %v3921_v61 = vmul.f32 %v3905_v6, %v7678_v9  ;;  %v4166_v9 = vsel %vm2576_vm11, %v3940_v29, 0.0 }
 0x53f   : > { %v3922_v21 = vmul.f32 %v3906_v30, %v7680_v37  ;;  %v4167_v37 = vadd.f32 %v4166_v9, %v4165_v35 }
 0x540   : > { %v4145_v2 = vsel %vm2576_vm11, %v3921_v61, 0.0  ;;  %v4089_v61 = vadd.f32 %v4088_v60, %v4087_v16 }
 0x541   : > { %v4146_v42 = vsel %vm2576_vm11, %v3922_v21, 0.0  ;;  %4168 = vadd.xlane.f32.xlu0 %v4167_v37  ;;  %v4077_v21 = vadd.f32 %v4076_v4, %v4075_v0 }
 0x542   : > { %v4147_v26 = vadd.f32 %v4146_v42, %v4145_v2  ;;  %v4090_v59 = vrot.slane %v4089_v61, 1 }
 0x543   : > { %v4078_v29 = vrot.slane %v4077_v21, 1 }
 0x544   : > { %4148 = vadd.xlane.f32.xlu1 %v4147_v26  ;;  %v4091_v38 = vadd.f32 %v4090_v59, %v4089_v61 }
 0x545   : > { %v4079_v42 = vadd.f32 %v4078_v29, %v4077_v21 }
 0x562   : > { %s4730_s24 = spop %4729 }
 0x563   : > { %s4002_s6 = smul.f32 %s4730_s24, %s4728_s5  ;;  %s7703_s16 = spop %4731 }
 0x564   : > { %p4029_p9 = scmp.gt.f32.partialorder %s7703_s16, 0.0  ;;  %s4734_s29 = spop %4733 }
 0x565   : > { %s8400_s6 = smov (!%p3997_p8, %s4002_s6), 0.0 }
 0x566   : > { %s4030_s7 = scalar_select %p4029_p9, %s7703_s16, 1.0 }
 0x567   : > { %s4004_s12 = sadd.f32 %s8400_s6, %s8398_s11 }
 0x568   : > { %v4031_v45 = vstv %s4030_s7 }
 0x569   : > { %5080 = vrcp.f32 %v4031_v45  ;;  %v3811_v45 = vld [vmem:[#allocation4 + $0x70] sm:$0xff] }
 0x56a   : > { %5082 = vlog2.f32 %v3667_v55 }
 0x56b   : > { %5084 = vlog2.f32 %v3668_v36 }
 0x56c   : > { %5086 = vlog2.f32 %v3747_v51 }
 0x56d   : > { %5088 = vlog2.f32 %v3748_v63 }
 0x576   : > { %v5081_v25 = vpop.eup %5080 }
 0x577   : > { %4735 = vpush %v5081_v25  ;;  %v5083_v40 = vpop.eup %5082 }
 0x578   : > { %4737 = vpush %v4047_v19  ;;  %v5085_v32 = vpop.eup %5084  ;;  %v3698_v34 = vmul.f32 0.6931472, %v5083_v40 }
 0x579   : > { %4739 = vpush %v4059_v62  ;;  %v5087_v10 = vpop.eup %5086  ;;  %v3700_v48 = vmul.f32 0.6931472, %v5085_v32 }
 0x57a   : > { %v5089_v17 = vpop.eup %5088  ;;  %v3778_v50 = vmul.f32 0.6931472, %v5087_v10 }
 0x57b   : > { %v3780_v31 = vmul.f32 0.6931472, %v5089_v17 }
 0x57c   : > { %v3795_v13 = vadd.f32 %v3778_v50, %v3698_v34 }
 0x57d   : > { %v3796_v52 = vadd.f32 %v3780_v31, %v3700_v48 }
 0x57e   : > { %v3875_v1 = vadd.f32 %v3859_v20, %v3795_v13 }
 0x57f   : > { %v3876_v28 = vadd.f32 %v3860_v15, %v3796_v52 }
 0x580   : > { %v3891_v8 = vmul.f32 %v3875_v1, %v7721_v57 }
 0x581   : > { %v3892_v58 = vmul.f32 %v3876_v28, %v7725_v49 }
 0x582   : > { %v3907_v18 = vsub.f32 %v3811_v45, %v3891_v8 }
 0x583   : > { %v3908_v14 = vsub.f32 %v3812_v41, %v3892_v58 }
 0x584   : > { %v3923_v6 = vmul.f32 %v3907_v18, %v7717_v33 }
 0x585   : > { %v3924_v30 = vmul.f32 %v3908_v14, %v7719_v27  ;;  %v4105_v27 = vpop.xlane.xlu0 %4104 }
 0x586   : > { %v4177_v57 = vsel %vm2576_vm11, %v3923_v6, 0.0  ;;  %v4106_v26 = vrot.slane %v4105_v27, 4 }
 0x587   : > { %v4178_v49 = vsel %vm2576_vm11, %v3924_v30, 0.0  ;;  %v4117_v33 = vpop.xlane.xlu1 %4116 }
 0x588   : > { %v4179_v22 = vadd.f32 %v4178_v49, %v4177_v57  ;;  %v4118_v35 = vrot.slane %v4117_v33, 4  ;;  %v4107_v37 = vadd.f32 %v4106_v26, %v4105_v27 }
 0x589   : > { %v4137_v51 = vpop.xlane.xlu0 %4136 }
 0x58a   : > { %4180 = vadd.xlane.f32.xlu1 %v4179_v22  ;;  %v4119_v9 = vadd.f32 %v4118_v35, %v4117_v33  ;;  %v4108_v62 = vrot.slane %v4107_v37, 2  ;;  %v4138_v40 = vrot.slane %v4137_v51, 4 }
 0x58c   : > { %v4120_v5 = vrot.slane %v4119_v9, 2  ;;  %v4109_v19 = vadd.f32 %v4108_v62, %v4107_v37  ;;  %v4139_v10 = vadd.f32 %v4138_v40, %v4137_v51 }
 0x58e   : > { %v4121_v25 = vadd.f32 %v4120_v5, %v4119_v9  ;;  %v4110_v43 = vrot.slane %v4109_v19, 1  ;;  %v4140_v39 = vrot.slane %v4139_v10, 2 }
 0x590   : > { %v4122_v44 = vrot.slane %v4121_v25, 1  ;;  %v4111_v55 = vadd.f32 %v4110_v43, %v4109_v19  ;;  %v4141_v50 = vadd.f32 %v4140_v39, %v4139_v10 }
 0x592   : > { %v4123_v23 = vadd.f32 %v4122_v44, %v4121_v25  ;;  %v4142_v54 = vrot.slane %v4141_v50, 1 }
 0x594   : > { %v4143_v7 = vadd.f32 %v4142_v54, %v4141_v50 }
 0x5a8   : > { %s4736_s20 = spop %4735 }
 0x5a9   : > { %s4034_s13 = smul.f32 %s4736_s20, %s4734_s29  ;;  %s7735_s23 = spop %4737 }
 0x5aa   : > { %p4061_p11 = scmp.gt.f32.partialorder %s7735_s23, 0.0  ;;  %s4740_s9 = spop %4739 }
 0x5ab   : > { %s8402_s13 = smov (!%p4029_p9, %s4034_s13), 0.0 }
 0x5ac   : > { %s4062_s4 = scalar_select %p4061_p11, %s7735_s23, 1.0 }
 0x5ad   : > { %s7748_s1 = sadd.f32 %s8402_s13, %s4004_s12 }
 0x5ae   : > { %v4063_v56 = vstv %s4062_s4 }
 0x5af   : > { %5090 = vrcp.f32 %v4063_v56 }
 0x5bc   : > { %v5091_v2 = vpop.eup %5090 }
 0x5bd   : > { %4741 = vpush %v5091_v2 }
 0x5be   : > { %4743 = vpush %v4079_v42 }
 0x5bf   : > { %4745 = vpush %v4091_v38 }
 0x5ca   : > { %v4169_v52 = vpop.xlane.xlu0 %4168 }
 0x5cb   : > { %v4170_v15 = vrot.slane %v4169_v52, 4 }
 0x5cd   : > { %v4149_v36 = vpop.xlane.xlu1 %4148  ;;  %v4171_v53 = vadd.f32 %v4170_v15, %v4169_v52 }
 0x5ce   : > { %v4150_v63 = vrot.slane %v4149_v36, 4 }
 0x5cf   : > { %v4172_v28 = vrot.slane %v4171_v53, 2 }
 0x5d0   : > { %v4151_v32 = vadd.f32 %v4150_v63, %v4149_v36 }
 0x5d1   : > { %v4173_v0 = vadd.f32 %v4172_v28, %v4171_v53 }
 0x5d2   : > { %v4152_v34 = vrot.slane %v4151_v32, 2 }
 0x5d3   : > { %v4174_v58 = vrot.slane %v4173_v0, 1 }
 0x5d4   : > { %v4153_v48 = vadd.f32 %v4152_v34, %v4151_v32 }
 0x5d5   : > { %v4175_v45 = vadd.f32 %v4174_v58, %v4173_v0 }
 0x5d6   : > { %v4154_v31 = vrot.slane %v4153_v48, 1 }
 0x5d8   : > { %v4155_v11 = vadd.f32 %v4154_v31, %v4153_v48 }
 0x5ee   : > { %s4742_s25 = spop %4741 }
 0x5ef   : > { %s4066_s27 = smul.f32 %s4742_s25, %s4740_s9  ;;  %s7754_s15 = spop %4743 }
 0x5f0   : > { %p4093_p13 = scmp.gt.f32.partialorder %s7754_s15, 0.0  ;;  %s4746_s3 = spop %4745 }
 0x5f1   : > { %s8404_s27 = smov (!%p4061_p11, %s4066_s27), 0.0 }
 0x5f2   : > { %s4094_s17 = scalar_select %p4093_p13, %s7754_s15, 1.0 }
 0x5f3   : > { %s4068_s21 = sadd.f32 %s8404_s27, %s7748_s1 }
 0x5f4   : > { %v4095_v12 = vstv %s4094_s17 }
 0x5f5   : > { %5092 = vrcp.f32 %v4095_v12 }
 0x602   : > { %v5093_v24 = vpop.eup %5092 }
 0x603   : > { %4747 = vpush %v5093_v24 }
 0x604   : > { %4749 = vpush %v4111_v55 }
 0x605   : > { %4751 = vpush %v4123_v23 }
 0x613   : > { %v4181_v13 = vpop.xlane.xlu1 %4180 }
 0x614   : > { %v4182_v20 = vrot.slane %v4181_v13, 4 }
 0x616   : > { %v4183_v46 = vadd.f32 %v4182_v20, %v4181_v13 }
 0x618   : > { %v4184_v1 = vrot.slane %v4183_v46, 2 }
 0x61a   : > { %v4185_v16 = vadd.f32 %v4184_v1, %v4183_v46 }
 0x61c   : > { %v4186_v8 = vrot.slane %v4185_v16, 1 }
 0x61e   : > { %v4187_v56 = vadd.f32 %v4186_v8, %v4185_v16 }
 0x634   : > { %s4748_s30 = spop %4747 }
 0x635   : > { %s4098_s10 = smul.f32 %s4748_s30, %s4746_s3  ;;  %s7766_s18 = spop %4749 }
 0x636   : > { %p4125_p0 = scmp.gt.f32.partialorder %s7766_s18, 0.0  ;;  %s4752_s28 = spop %4751 }
 0x637   : > { %s8406_s10 = smov (!%p4093_p13, %s4098_s10), 0.0 }
 0x638   : > { %s4126_s11 = scalar_select %p4125_p0, %s7766_s18, 1.0 }
 0x639   : > { %s7774_s19 = sadd.f32 %s8406_s10, %s4068_s21 }
 0x63a   : > { %v4127_v17 = vstv %s4126_s11 }
 0x63b   : > { %5094 = vrcp.f32 %v4127_v17 }
 0x648   : > { %v5095_v3 = vpop.eup %5094 }
 0x649   : > { %4753 = vpush %v5095_v3 }
 0x64a   : > { %4755 = vpush %v4143_v7 }
 0x64b   : > { %4757 = vpush %v4155_v11 }
 0x67a   : > { %s4754_s5 = spop %4753 }
 0x67b   : > { %s4130_s24 = smul.f32 %s4754_s5, %s4752_s28  ;;  %s4756_s6 = spop %4755 }
 0x67c   : > { %p4157_p1 = scmp.gt.f32.partialorder %s4756_s6, 0.0  ;;  %s4758_s12 = spop %4757 }
 0x67d   : > { %s8408_s24 = smov (!%p4125_p0, %s4130_s24), 0.0 }
 0x67e   : > { %s4158_s16 = scalar_select %p4157_p1, %s4756_s6, 1.0 }
 0x67f   : > { %s4132_s7 = sadd.f32 %s8408_s24, %s7774_s19 }
 0x680   : > { %v4159_v47 = vstv %s4158_s16 }
 0x681   : > { %5096 = vrcp.f32 %v4159_v47 }
 0x68e   : > { %v5097_v60 = vpop.eup %5096 }
 0x68f   : > { %4759 = vpush %v5097_v60 }
 0x690   : > { %4761 = vpush %v4175_v45 }
 0x691   : > { %4763 = vpush %v4187_v56 }
 0x6c0   : > { %s4760_s29 = spop %4759 }
 0x6c1   : > { %s4162_s20 = smul.f32 %s4760_s29, %s4758_s12  ;;  %s4762_s13 = spop %4761 }
 0x6c2   : > { %p4189_p2 = scmp.gt.f32.partialorder %s4762_s13, 0.0  ;;  %s4764_s4 = spop %4763 }
 0x6c3   : > { %s8410_s20 = smov (!%p4157_p1, %s4162_s20), 0.0 }
 0x6c4   : > { %s8412_s13 = smov (!%p4189_p2, %s4762_s13), 1.0  ;;  %s4164_s23 = sadd.f32 %s8410_s20, %s4132_s7 }
 0x6c5   : > { %v4191_v41 = vstv %s8412_s13 }
 0x6c6   : > { %5098 = vrcp.f32 %v4191_v41 }
 0x6d3   : > { %v5099_v4 = vpop.eup %5098 }
 0x6d4   : > { %4765 = vpush %v5099_v4 }
 0x705   : > { %s4766_s1 = spop %4765 }
 0x706   : > { %s4194_s9 = smul.f32 %s4766_s1, %s4764_s4 }
 0x708   : > { %s8414_s9 = smov (!%p4189_p2, %s4194_s9), 0.0 }
 0x709   : > { %s4196_s25 = sadd.f32 %s8414_s9, %s4164_s23 }
 0x70b   : > { %s4197_s27 = smul.f32 -1.0, %s4196_s25 }
 0x70d   : > { %v4198_v18 = vstv %s4197_s27 }
 0x70e   : > { %4199 = vst [vmem:[%s1027_s0] sm:$0xff] %v4198_v18 }
 0x70f PF: > { %s8373_s21 = sld [smem:[#allocation102_spill]]  ;;  %s4214_s10 = sshll.u32 %s1027_s0, 4  ;;  %s4215_s10 = int_to_ptr.vmem [resolvable:$true] %s4214_s10 }
 0x710   : > { %s8375_s18 = sand.u32 1, %s5176_s26   ;;  %s5100_s19 = scalar_lea.vmem %s4215_s10, 128 }
 0x711   : > { %s4201_s11 = scalar_lea.sflag [#allocation15], %s8375_s18  ;;  %p5101_p3 = scmp.ne.s32.totalorder %s4215_s10, %s5100_s19 }
 0x712   : > { %s5214_s28 = smov [#allocation14]  }
 0x713   : > { %p5102_p4 = pnand %p5101_p3, %p5364_p10  ;;  %s5104_s5 = sshll.u32 %s5214_s28, 4  ;;  %s5105_s5 = int_to_ptr.vmem [resolvable:$false] %s5104_s5 }
 0x714   : > { %s5106_s14 = scalar_lea.vmem %s5105_s5, 256  ;;  %p5107_p6 = scmp.lt.s32.totalorder %s4215_s10, %s5105_s5 }
 0x715   : > { %s4212_s30 = scalar_lea.hbm %s8373_s21, %s4566_s2  ;;  %p5103_p5 = pneg %p5102_p4 }
 0x716   : > { %p5108_p7 = scmp.lt.s32.totalorder %s5106_s14, %s5100_s19 }
 0x718   : > { %p5109_p8 = por %p5108_p7, %p5107_p6 }
 0x71a   : > { %p5110_p9 = pnand %p5109_p8, %p5103_p5 }
 0x71c   : > { %5113 = shalt.err (!%p5110_p9)
}
 0x71d   : > { %s5114_s2 = scalar_lea.hbm %s4212_s30, 128  ;;  %s5118_s24 = scalar_lea.hbm %s8373_s21, 256 }
 0x71e   : > { %p5115_p11 = scmp.ne.s32.totalorder %s4212_s30, %s5114_s2  ;;  %p5119_p1 = scmp.lt.s32.totalorder %s4212_s30, %s8373_s21 }
 0x71f   : > { %p5120_p2 = scmp.lt.s32.totalorder %s5118_s24, %s5114_s2 }
 0x720   : > { %p5116_p13 = pnand %p5115_p11, %p5364_p10 }
 0x721   : > { %p5121_p3 = por %p5120_p2, %p5119_p1 }
 0x722   : > { %p5117_p0 = pneg %p5116_p13 }
 0x724   : > { %p5122_p4 = pnand %p5121_p3, %p5117_p0 }
 0x726   : > { %5125 = shalt.err (!%p5122_p4)
}
 0x727   : > { %4767 = dma.vmem_to_hbm [thread:$0]  (%p5364_p10), %s4215_s10, 128, %s4212_s30, %s4201_s11  }
 0x728 PF: > { %s8376_s7 = sld [smem:[#allocation22_spill]] }
 0x729   : > { %s8377_s12 = sld [smem:[#allocation17_spill]] }
 0x72e   : > { %p4773_p5 = scmp.ge.s32.totalorder %s8376_s7, 2 }
 0x72f   : > { %s4226_s20 = sand.u32 1, %s8377_s12  }
 0x730   : > { %p4770_p6 = pnand %p4773_p5, %p5371_p12  ;;  %s4227_s13 = scalar_lea.sflag [#allocation15], %s4226_s20 }
 0x732   : > { %p4771_p7 = pneg %p4770_p6 }
 0x734   : > { %5167 = dma.done.wait (%p4771_p7), %s4227_s13, 128  }
 0x735   : > { %5169 = vsyncadd (%p4771_p7), %s4227_s13, 4294967168  ;;  %s26_s17 = sadd.s32 1, %s8376_s7   ;;  %s8379_s23 = sld [smem:[#allocation18_spill]] }
 0x736   : > { %p23_p8 = scmp.ge.s32.totalorder %s26_s17, 6   ;;  %s8380_s27 = sld [smem:[#allocation27_spill]] }
 0x737   : > { %s8381_s28 = sld [smem:[#allocation19_spill]]  ;;  %s8387_s25 = smov %s5176_s26 }
 0x738   : > { %s8382_s29 = sld [smem:[#allocation25_spill]]  ;;  %25 = sbr.rel (!%p23_p8) target bundleno = 20 (0x14), region = 378 }
 0x739   : > { %s8383_s30 = sld [smem:[#allocation20_spill]] }
 0x73a   : > { %s8384_s14 = sld [smem:[#allocation21_spill]] }
 0x73b   : > { %s8385_s15 = sld [smem:[#allocation23_spill]]  ;;  %s8388_s26 = smov %s8379_s23 }
 0x73c   : > { %s8386_s16 = sld [smem:[#allocation24_spill]] }
 0x73d   :  { %4232 = vsyncpa [#allocation15], 1 }
 0x73e   :  { %4234 = vsyncpa [#allocation15 + $0x1], 1 }

</bundles_post_ra>
